<compile_context>
chip_gen: v6e
topology: v6e:2x2x1
jax: 0.10.0
libtpu: 0.0.40
codegen_flags: <defaults>
</compile_context>

<pallas_src>
import functools

import numpy as np
import jax
import jax.numpy as jnp
from jax import lax
from jax.experimental import pallas as pl
from jax.experimental.pallas import tpu as pltpu

# ---- static network dimensions (LeNet-5 Caffe variant, 28x28 input) ----
IN_H = IN_W = 28
K = 5                      # conv kernel size
C1 = 20                    # conv1 out channels
H1 = W1 = 24               # conv1 out spatial
P1 = 12                    # pool1 out spatial
C2 = 50                    # conv2 out channels
H2 = W2 = 8                # conv2 out spatial
P2 = 4                     # pool2 out spatial
FC3_IN = C2 * P2 * P2      # 800
FC3_OUT = 500
FC3_PAD = 512              # fc3 output padded to a lane multiple
NCLASS = 10
NCLASS_PAD = 128           # fc4 output padded for a lane-dense store
NEG_INF = -1e30
HALF = 256                 # lane offset of the odd-output-column half
CONV_PAD = 2 * HALF        # padded conv output lanes (512)


def lenet5_kernel(x_ref, w1_ref, b1_ref, w2_ref, b2_ref, w3_ref, b3_ref,
                  w4_ref, b4_ref, out_ref):
    tb = x_ref.shape[1]
    x = x_ref[...]                                            # (28, TB, 28) bf16

    # ---- conv1: all 5 row taps fused into a single K=140 MXU matmul ----
    lhs1 = jnp.concatenate([x[di:di + H1] for di in range(K)], axis=-1)
    lhs1 = lhs1.reshape(H1 * tb, K * IN_W)                    # (24*TB, 140) bf16
    acc1 = jnp.dot(lhs1, w1_ref[...], preferred_element_type=jnp.float32)
    h1 = jnp.maximum(acc1 + b1_ref[...], 0.0).astype(jnp.bfloat16)
    h1 = h1.reshape(H1, tb, CONV_PAD)                         # (24, TB, 512)

    # ---- pool1 (2x2): W-pool = max of two 256-aligned lane halves;
    #      H-pool = one major-dim reshape + max (no per-row concat) ----
    h1 = jnp.maximum(h1[:, :, :P1 * C1], h1[:, :, HALF:HALF + P1 * C1])
    p1 = h1.reshape(P1, 2, tb, P1 * C1).max(axis=1)           # (12, TB, 240) bf16

    # ---- conv2: 5 banded matmuls (K=240 per tap already fills the MXU) ----
    acc2 = None
    for di in range(K):
        lhs = p1[di:di + H2].reshape(H2 * tb, P1 * C1)        # (8*TB, 240) bf16
        part = jnp.dot(lhs, w2_ref[di], preferred_element_type=jnp.float32)
        acc2 = part if acc2 is None else acc2 + part          # (8*TB, 512) f32
    h2 = jnp.maximum(acc2 + b2_ref[...], 0.0).astype(jnp.bfloat16)
    h2 = h2.reshape(H2, tb, CONV_PAD)                         # (8, TB, 512)

    # ---- pool2 (2x2) ----
    h2 = jnp.maximum(h2[:, :, :P2 * C2], h2[:, :, HALF:HALF + P2 * C2])
    p2 = h2.reshape(P2, 2, tb, P2 * C2).max(axis=1)           # (4, TB, 200) bf16

    # ---- fc3 (+ReLU): PyTorch's NCHW flatten is absorbed into a pre-permuted
    #      (4, 200, 512) weight; leading-dim indexing keeps slices free ----
    acc3 = None
    for h in range(P2):
        part = jnp.dot(p2[h], w3_ref[h], preferred_element_type=jnp.float32)
        acc3 = part if acc3 is None else acc3 + part          # (TB, 512) f32
    h3 = jnp.maximum(acc3 + b3_ref[...], 0.0).astype(jnp.bfloat16)

    # ---- fc4 + log_softmax (padded class lanes carry a -1e30 bias) ----
    logits = jnp.dot(h3, w4_ref[...], preferred_element_type=jnp.float32) + b4_ref[...]
    m = jnp.max(logits, axis=-1, keepdims=True)
    s = logits - m
    lse = jnp.log(jnp.sum(jnp.exp(s), axis=-1, keepdims=True))
    out_ref[...] = s - lse


def init_params(key):
    """Deterministic init with the PyTorch parameter shapes:
    conv weights (Cout, Cin, K, K), linear weights (out, in), biases (out,)."""
    def uinit(k, shape, fan_in):
        bound = 1.0 / np.sqrt(fan_in)
        return jax.random.uniform(k, shape, jnp.float32, -bound, bound)

    ks = jax.random.split(key, 8)
    w1 = uinit(ks[0], (C1, 1, K, K), 1 * K * K)
    b1 = uinit(ks[1], (C1,), 1 * K * K)
    w2 = uinit(ks[2], (C2, C1, K, K), C1 * K * K)
    b2 = uinit(ks[3], (C2,), C1 * K * K)
    w3 = uinit(ks[4], (FC3_OUT, FC3_IN), FC3_IN)
    b3 = uinit(ks[5], (FC3_OUT,), FC3_IN)
    w4 = uinit(ks[6], (NCLASS, FC3_OUT), FC3_OUT)
    b4 = uinit(ks[7], (NCLASS,), FC3_OUT)
    return (w1, b1, w2, b2, w3, b3, w4, b4)


def prepare_params(params, compute_dtype=jnp.bfloat16):
    """One-time repacking of PyTorch-layout params into kernel-friendly form."""
    w1, b1, w2, b2, w3, b3, w4, b4 = [np.asarray(p, np.float32) for p in params]

    # conv1 -> one fused banded matrix (row = di*28 + input col, K = 140).
    # Output columns parity-major with 256-lane halves:
    #   col = (j % 2) * 256 + (j // 2) * C1 + c   (pad lanes stay zero).
    w1f = np.zeros((K * IN_W, CONV_PAD), np.float32)
    b1row = np.zeros((1, CONV_PAD), np.float32)
    for j in range(W1):
        col = (j % 2) * HALF + (j // 2) * C1
        b1row[0, col:col + C1] = b1
        for di in range(K):
            for dj in range(K):
                w1f[di * IN_W + j + dj, col:col + C1] = w1[:, 0, di, dj]

    # conv2 -> banded matrices over (input w, cin), same 256-aligned packing.
    w2band = np.zeros((K, P1 * C1, CONV_PAD), np.float32)
    b2row = np.zeros((1, CONV_PAD), np.float32)
    for j in range(W2):
        col = (j % 2) * HALF + (j // 2) * C2
        b2row[0, col:col + C2] = b2
        for di in range(K):
            for dj in range(K):
                row = (j + dj) * C1
                w2band[di, row:row + C1, col:col + C2] = w2[:, :, di, dj].T

    # fc3: permute the 800 input features from PyTorch's (c, h, w) flatten to
    # the kernel's (h, w, c) order, split into 4 row blocks of 200 (one per
    # pooled row), pad 500 -> 512 output columns with zeros.
    w3p = np.zeros((P2, P2 * C2, FC3_PAD), np.float32)
    for h in range(P2):
        for w in range(P2):
            for c in range(C2):
                w3p[h, w * C2 + c, :FC3_OUT] = w3[:, c * (P2 * P2) + h * P2 + w]
    b3p = np.zeros((1, FC3_PAD), np.float32)
    b3p[0, :FC3_OUT] = b3

    # fc4: pad 500 -> 512 input rows (zeros) and 10 -> 128 class lanes
    # (padded classes get a -1e30 bias so the log-softmax ignores them).
    w4p = np.zeros((FC3_PAD, NCLASS_PAD), np.float32)
    w4p[:FC3_OUT, :NCLASS] = w4.T
    b4p = np.full((1, NCLASS_PAD), NEG_INF, np.float32)
    b4p[0, :NCLASS] = b4

    cd = compute_dtype
    return (jnp.asarray(w1f, cd), jnp.asarray(b1row),
            jnp.asarray(w2band, cd), jnp.asarray(b2row),
            jnp.asarray(w3p, cd), jnp.asarray(b3p),
            jnp.asarray(w4p, cd), jnp.asarray(b4p))


def _round_up(n, m):
    return ((n + m - 1) // m) * m


@functools.partial(jax.jit, static_argnames=("tile_b",))
def lenet5_caffe_forward(x, packed, *, tile_b=128):
    """x: (B, 1, 28, 28) (or anything reshapeable to (B, 28, 28)), NCHW."""
    (w1f, b1row, w2band, b2row, w3p, b3p, w4p, b4p) = packed
    assert tile_b % 8 == 0 and tile_b >= 8

    x3 = x.reshape(-1, IN_H, IN_W)
    B = x3.shape[0]

    # Adapt the batch tile: never pad a tiny batch up to a huge tile, and keep
    # >= 2 grid steps when the batch allows it so dimension_semantics=
    # ("parallel",) can feed both TensorCores on v7x.
    tb = min(tile_b, _round_up(B, 8))
    if B > 8 and _round_up(B, tb) // tb < 2:
        tb = max(8, _round_up(_round_up(B, 16) // 2, 8))
    b_pad = _round_up(B, tb)

    # (B,28,28) f32 -> (28,B,28) bf16: cast+transpose fuse into one small XLA
    # op feeding the kernel; the kernel then streams only bf16.
    # TODO(synk): store inputs pre-transposed as (H, B, W) bf16 outside the hot
    # loop to drop this preamble op entirely.
    xt = jnp.transpose(x3.astype(jnp.bfloat16), (1, 0, 2))    # (28, B, 28)
    if b_pad != B:
        xt = jnp.pad(xt, ((0, 0), (0, b_pad - B), (0, 0)))    # (28, B_pad, 28)

    grid = (b_pad // tb,)
    in_specs = [
        pl.BlockSpec((IN_H, tb, IN_W), lambda i: (0, i, 0)),  # streamed x tile
        pl.BlockSpec(w1f.shape, lambda i: (0, 0)),            # resident weights
        pl.BlockSpec(b1row.shape, lambda i: (0, 0)),
        pl.BlockSpec(w2band.shape, lambda i: (0, 0, 0)),
        pl.BlockSpec(b2row.shape, lambda i: (0, 0)),
        pl.BlockSpec(w3p.shape, lambda i: (0, 0, 0)),
        pl.BlockSpec(b3p.shape, lambda i: (0, 0)),
        pl.BlockSpec(w4p.shape, lambda i: (0, 0)),
        pl.BlockSpec(b4p.shape, lambda i: (0, 0)),
    ]
    out_specs = pl.BlockSpec((tb, NCLASS_PAD), lambda i: (i, 0))

    flops_per_img = 2 * (H1 * (K * IN_W) * CONV_PAD
                         + H2 * K * (P1 * C1) * CONV_PAD
                         + FC3_IN * FC3_PAD + FC3_PAD * NCLASS_PAD)
    bytes_params = sum(int(np.prod(a.shape)) * a.dtype.itemsize for a in packed)
    cost = pl.CostEstimate(
        flops=int(flops_per_img * b_pad),
        transcendentals=int(b_pad * (NCLASS_PAD + 1)),
        bytes_accessed=int(xt.size * xt.dtype.itemsize + bytes_params
                           + b_pad * NCLASS_PAD * 4),
    )

    out = pl.pallas_call(
        lenet5_kernel,
        out_shape=jax.ShapeDtypeStruct((b_pad, NCLASS_PAD), jnp.float32),
        grid=grid,
        in_specs=in_specs,
        out_specs=out_specs,
        compiler_params=pltpu.CompilerParams(
            dimension_semantics=("parallel",),
            vmem_limit_bytes=48 * 1024 * 1024,
        ),
        cost_estimate=cost,
    )(xt, w1f, b1row, w2band, b2row, w3p, b3p, w4p, b4p)

    return out[:B, :NCLASS]


def lenet5_caffe_reference(x, params):
    """Plain-JAX replica of the PyTorch forward (for correctness checking)."""
    w1, b1, w2, b2, w3, b3, w4, b4 = params
    with jax.default_matmul_precision("highest"):
        y = x.reshape(-1, 1, IN_H, IN_W).astype(jnp.float32)
        y = lax.conv_general_dilated(y, w1, (1, 1), "VALID",
                                     dimension_numbers=("NCHW", "OIHW", "NCHW"))
        y = jax.nn.relu(y + b1.reshape(1, -1, 1, 1))
        y = lax.reduce_window(y, -jnp.inf, lax.max, (1, 1, 2, 2), (1, 1, 2, 2), "VALID")
        y = lax.conv_general_dilated(y, w2, (1, 1), "VALID",
                                     dimension_numbers=("NCHW", "OIHW", "NCHW"))
        y = jax.nn.relu(y + b2.reshape(1, -1, 1, 1))
        y = lax.reduce_window(y, -jnp.inf, lax.max, (1, 1, 2, 2), (1, 1, 2, 2), "VALID")
        y = y.reshape(y.shape[0], -1)                   # (B, 800) NCHW flatten
        y = jax.nn.relu(y @ w3.T + b3)
        y = y @ w4.T + b4
        return jax.nn.log_softmax(y, axis=-1)


if __name__ == "__main__":
    key = jax.random.PRNGKey(0)
    pkey, xkey, xkey2 = jax.random.split(key, 3)

    params = init_params(pkey)
    packed = prepare_params(params)                  # bf16 matmul operands, f32 accum

    # MNIST-like NCHW input (the architecture hard-codes 28x28 -> 50*4*4).
    x = jax.random.normal(xkey, (2, 1, IN_H, IN_W), jnp.float32)

    out = jax.block_until_ready(lenet5_caffe_forward(x, packed))
    assert out.shape == (2, NCLASS)
    # log_softmax rows must exp-sum to 1 (padded class lanes contribute 0).
    assert jnp.allclose(jnp.sum(jnp.exp(out), axis=1), 1.0, atol=1e-3)
    ref = lenet5_caffe_reference(x, params)
    assert jnp.max(jnp.abs(out - ref)) < 0.1, float(jnp.max(jnp.abs(out - ref)))

    # A second, slightly larger batch exercises the multi-tile (grid >= 2) path
    # and batch padding.
    x2 = jax.random.normal(xkey2, (18, 1, IN_H, IN_W), jnp.float32)
    out2 = jax.block_until_ready(lenet5_caffe_forward(x2, packed))
    assert out2.shape == (18, NCLASS)
    assert jnp.allclose(jnp.sum(jnp.exp(out2), axis=1), 1.0, atol=1e-3)
    ref2 = lenet5_caffe_reference(x2, params)
    assert jnp.max(jnp.abs(out2 - ref2)) < 0.1, float(jnp.max(jnp.abs(out2 - ref2)))

    print("KERNEL_OK")
</pallas_src>

<mosaic_0001>
module attributes {stable_mosaic.version = 11 : i64} {
  func.func @lenet5_kernel(%arg0: i32, %arg1: memref<28x8x28xbf16, #tpu.memory_space<vmem>>, %arg2: memref<140x512xbf16, #tpu.memory_space<vmem>>, %arg3: memref<1x512xf32, #tpu.memory_space<vmem>>, %arg4: memref<5x240x512xbf16, #tpu.memory_space<vmem>>, %arg5: memref<1x512xf32, #tpu.memory_space<vmem>>, %arg6: memref<4x200x512xbf16, #tpu.memory_space<vmem>>, %arg7: memref<1x512xf32, #tpu.memory_space<vmem>>, %arg8: memref<512x128xbf16, #tpu.memory_space<vmem>>, %arg9: memref<1x128xf32, #tpu.memory_space<vmem>>, %arg10: memref<8x128xf32, #tpu.memory_space<vmem>>) attributes {dimension_semantics = [#tpu.dimension_semantics<parallel>], iteration_bounds = array<i64: 1>, scalar_prefetch = 0 : i64, scratch_operands = 0 : i64, tpu.core_type = #tpu.core_type<tc>, window_params = [{transform_indices = @transform_0, window_bounds = array<i64: 28, 8, 28>}, {pipeline_mode = #tpu.pipeline_mode<synchronous>, transform_indices = @transform_1, window_bounds = array<i64: 140, 512>}, {pipeline_mode = #tpu.pipeline_mode<synchronous>, transform_indices = @transform_2, window_bounds = array<i64: 1, 512>}, {pipeline_mode = #tpu.pipeline_mode<synchronous>, transform_indices = @transform_3, window_bounds = array<i64: 5, 240, 512>}, {pipeline_mode = #tpu.pipeline_mode<synchronous>, transform_indices = @transform_4, window_bounds = array<i64: 1, 512>}, {pipeline_mode = #tpu.pipeline_mode<synchronous>, transform_indices = @transform_5, window_bounds = array<i64: 4, 200, 512>}, {pipeline_mode = #tpu.pipeline_mode<synchronous>, transform_indices = @transform_6, window_bounds = array<i64: 1, 512>}, {pipeline_mode = #tpu.pipeline_mode<synchronous>, transform_indices = @transform_7, window_bounds = array<i64: 512, 128>}, {pipeline_mode = #tpu.pipeline_mode<synchronous>, transform_indices = @transform_8, window_bounds = array<i64: 1, 128>}, {transform_indices = @transform_9, window_bounds = array<i64: 8, 128>}]} {
    %c0 = arith.constant 0 : index
    %c0_0 = arith.constant 0 : index
    %c0_1 = arith.constant 0 : index
    %0 = vector.load %arg1[%c0, %c0_0, %c0_1] : memref<28x8x28xbf16, #tpu.memory_space<vmem>>, vector<28x8x28xbf16>
    %1 = vector.extract_strided_slice %0 {offsets = [0, 0, 0], sizes = [24, 8, 28], strides = [1, 1, 1]} : vector<28x8x28xbf16> to vector<24x8x28xbf16>
    %2 = vector.extract_strided_slice %0 {offsets = [1, 0, 0], sizes = [24, 8, 28], strides = [1, 1, 1]} : vector<28x8x28xbf16> to vector<24x8x28xbf16>
    %3 = vector.extract_strided_slice %0 {offsets = [2, 0, 0], sizes = [24, 8, 28], strides = [1, 1, 1]} : vector<28x8x28xbf16> to vector<24x8x28xbf16>
    %4 = vector.extract_strided_slice %0 {offsets = [3, 0, 0], sizes = [24, 8, 28], strides = [1, 1, 1]} : vector<28x8x28xbf16> to vector<24x8x28xbf16>
    %5 = vector.extract_strided_slice %0 {offsets = [4, 0, 0], sizes = [24, 8, 28], strides = [1, 1, 1]} : vector<28x8x28xbf16> to vector<24x8x28xbf16>
    %6 = tpu.concatenate %1, %2, %3, %4, %5 in 2 : vector<24x8x28xbf16>, vector<24x8x28xbf16>, vector<24x8x28xbf16>, vector<24x8x28xbf16>, vector<24x8x28xbf16> -> vector<24x8x140xbf16>
    %7 = vector.shape_cast %6 : vector<24x8x140xbf16> to vector<192x140xbf16>
    %c0_2 = arith.constant 0 : index
    %c0_3 = arith.constant 0 : index
    %8 = vector.load %arg2[%c0_2, %c0_3] : memref<140x512xbf16, #tpu.memory_space<vmem>>, vector<140x512xbf16>
    %cst = arith.constant dense<0.000000e+00> : vector<192x512xf32>
    %9 = tpu.matmul %7, %8, %cst {dimension_numbers = #tpu.dot_dimension_numbers<[1], [0], [0], [1], [0, 0, 1, 1], [], []>} : vector<192x140xbf16>, vector<140x512xbf16>, vector<192x512xf32> -> vector<192x512xf32>
    %c0_4 = arith.constant 0 : index
    %c0_5 = arith.constant 0 : index
    %10 = vector.load %arg3[%c0_4, %c0_5] : memref<1x512xf32, #tpu.memory_space<vmem>>, vector<1x512xf32>
    %11 = vector.broadcast %10 : vector<1x512xf32> to vector<192x512xf32>
    %12 = arith.addf %9, %11 : vector<192x512xf32>
    %cst_6 = arith.constant 0.000000e+00 : f32
    %13 = vector.broadcast %cst_6 : f32 to vector<192x512xf32>
    %14 = arith.maximumf %12, %13 : vector<192x512xf32>
    %15 = arith.truncf %14 : vector<192x512xf32> to vector<192x512xbf16>
    %16 = vector.shape_cast %15 : vector<192x512xbf16> to vector<24x8x512xbf16>
    %17 = vector.extract_strided_slice %16 {offsets = [0, 0, 0], sizes = [24, 8, 240], strides = [1, 1, 1]} : vector<24x8x512xbf16> to vector<24x8x240xbf16>
    %18 = vector.extract_strided_slice %16 {offsets = [0, 0, 256], sizes = [24, 8, 240], strides = [1, 1, 1]} : vector<24x8x512xbf16> to vector<24x8x240xbf16>
    %19 = arith.maximumf %17, %18 : vector<24x8x240xbf16>
    %20 = vector.shape_cast %19 : vector<24x8x240xbf16> to vector<12x2x8x240xbf16>
    %cst_7 = arith.constant dense<0xFF80> : vector<12x8x240xbf16>
    %21 = vector.multi_reduction <maximumf>, %20, %cst_7 [1] : vector<12x2x8x240xbf16> to vector<12x8x240xbf16>
    %22 = vector.extract_strided_slice %21 {offsets = [0, 0, 0], sizes = [8, 8, 240], strides = [1, 1, 1]} : vector<12x8x240xbf16> to vector<8x8x240xbf16>
    %23 = vector.shape_cast %22 : vector<8x8x240xbf16> to vector<64x240xbf16>
    %c0_8 = arith.constant 0 : index
    %c0_9 = arith.constant 0 : index
    %c0_10 = arith.constant 0 : index
    %24 = vector.load %arg4[%c0_8, %c0_9, %c0_10] : memref<5x240x512xbf16, #tpu.memory_space<vmem>>, vector<1x240x512xbf16>
    %25 = vector.shape_cast %24 : vector<1x240x512xbf16> to vector<240x512xbf16>
    %cst_11 = arith.constant dense<0.000000e+00> : vector<64x512xf32>
    %26 = tpu.matmul %23, %25, %cst_11 {dimension_numbers = #tpu.dot_dimension_numbers<[1], [0], [0], [1], [0, 0, 1, 1], [], []>} : vector<64x240xbf16>, vector<240x512xbf16>, vector<64x512xf32> -> vector<64x512xf32>
    %27 = vector.extract_strided_slice %21 {offsets = [1, 0, 0], sizes = [8, 8, 240], strides = [1, 1, 1]} : vector<12x8x240xbf16> to vector<8x8x240xbf16>
    %28 = vector.shape_cast %27 : vector<8x8x240xbf16> to vector<64x240xbf16>
    %c1 = arith.constant 1 : index
    %c0_12 = arith.constant 0 : index
    %c0_13 = arith.constant 0 : index
    %29 = vector.load %arg4[%c1, %c0_12, %c0_13] : memref<5x240x512xbf16, #tpu.memory_space<vmem>>, vector<1x240x512xbf16>
    %30 = vector.shape_cast %29 : vector<1x240x512xbf16> to vector<240x512xbf16>
    %cst_14 = arith.constant dense<0.000000e+00> : vector<64x512xf32>
    %31 = tpu.matmul %28, %30, %cst_14 {dimension_numbers = #tpu.dot_dimension_numbers<[1], [0], [0], [1], [0, 0, 1, 1], [], []>} : vector<64x240xbf16>, vector<240x512xbf16>, vector<64x512xf32> -> vector<64x512xf32>
    %32 = arith.addf %26, %31 : vector<64x512xf32>
    %33 = vector.extract_strided_slice %21 {offsets = [2, 0, 0], sizes = [8, 8, 240], strides = [1, 1, 1]} : vector<12x8x240xbf16> to vector<8x8x240xbf16>
    %34 = vector.shape_cast %33 : vector<8x8x240xbf16> to vector<64x240xbf16>
    %c2 = arith.constant 2 : index
    %c0_15 = arith.constant 0 : index
    %c0_16 = arith.constant 0 : index
    %35 = vector.load %arg4[%c2, %c0_15, %c0_16] : memref<5x240x512xbf16, #tpu.memory_space<vmem>>, vector<1x240x512xbf16>
    %36 = vector.shape_cast %35 : vector<1x240x512xbf16> to vector<240x512xbf16>
    %cst_17 = arith.constant dense<0.000000e+00> : vector<64x512xf32>
    %37 = tpu.matmul %34, %36, %cst_17 {dimension_numbers = #tpu.dot_dimension_numbers<[1], [0], [0], [1], [0, 0, 1, 1], [], []>} : vector<64x240xbf16>, vector<240x512xbf16>, vector<64x512xf32> -> vector<64x512xf32>
    %38 = arith.addf %32, %37 : vector<64x512xf32>
    %39 = vector.extract_strided_slice %21 {offsets = [3, 0, 0], sizes = [8, 8, 240], strides = [1, 1, 1]} : vector<12x8x240xbf16> to vector<8x8x240xbf16>
    %40 = vector.shape_cast %39 : vector<8x8x240xbf16> to vector<64x240xbf16>
    %c3 = arith.constant 3 : index
    %c0_18 = arith.constant 0 : index
    %c0_19 = arith.constant 0 : index
    %41 = vector.load %arg4[%c3, %c0_18, %c0_19] : memref<5x240x512xbf16, #tpu.memory_space<vmem>>, vector<1x240x512xbf16>
    %42 = vector.shape_cast %41 : vector<1x240x512xbf16> to vector<240x512xbf16>
    %cst_20 = arith.constant dense<0.000000e+00> : vector<64x512xf32>
    %43 = tpu.matmul %40, %42, %cst_20 {dimension_numbers = #tpu.dot_dimension_numbers<[1], [0], [0], [1], [0, 0, 1, 1], [], []>} : vector<64x240xbf16>, vector<240x512xbf16>, vector<64x512xf32> -> vector<64x512xf32>
    %44 = arith.addf %38, %43 : vector<64x512xf32>
    %45 = vector.extract_strided_slice %21 {offsets = [4, 0, 0], sizes = [8, 8, 240], strides = [1, 1, 1]} : vector<12x8x240xbf16> to vector<8x8x240xbf16>
    %46 = vector.shape_cast %45 : vector<8x8x240xbf16> to vector<64x240xbf16>
    %c4 = arith.constant 4 : index
    %c0_21 = arith.constant 0 : index
    %c0_22 = arith.constant 0 : index
    %47 = vector.load %arg4[%c4, %c0_21, %c0_22] : memref<5x240x512xbf16, #tpu.memory_space<vmem>>, vector<1x240x512xbf16>
    %48 = vector.shape_cast %47 : vector<1x240x512xbf16> to vector<240x512xbf16>
    %cst_23 = arith.constant dense<0.000000e+00> : vector<64x512xf32>
    %49 = tpu.matmul %46, %48, %cst_23 {dimension_numbers = #tpu.dot_dimension_numbers<[1], [0], [0], [1], [0, 0, 1, 1], [], []>} : vector<64x240xbf16>, vector<240x512xbf16>, vector<64x512xf32> -> vector<64x512xf32>
    %50 = arith.addf %44, %49 : vector<64x512xf32>
    %c0_24 = arith.constant 0 : index
    %c0_25 = arith.constant 0 : index
    %51 = vector.load %arg5[%c0_24, %c0_25] : memref<1x512xf32, #tpu.memory_space<vmem>>, vector<1x512xf32>
    %52 = vector.broadcast %51 : vector<1x512xf32> to vector<64x512xf32>
    %53 = arith.addf %50, %52 : vector<64x512xf32>
    %cst_26 = arith.constant 0.000000e+00 : f32
    %54 = vector.broadcast %cst_26 : f32 to vector<64x512xf32>
    %55 = arith.maximumf %53, %54 : vector<64x512xf32>
    %56 = arith.truncf %55 : vector<64x512xf32> to vector<64x512xbf16>
    %57 = vector.shape_cast %56 : vector<64x512xbf16> to vector<8x8x512xbf16>
    %58 = vector.extract_strided_slice %57 {offsets = [0, 0, 0], sizes = [8, 8, 200], strides = [1, 1, 1]} : vector<8x8x512xbf16> to vector<8x8x200xbf16>
    %59 = vector.extract_strided_slice %57 {offsets = [0, 0, 256], sizes = [8, 8, 200], strides = [1, 1, 1]} : vector<8x8x512xbf16> to vector<8x8x200xbf16>
    %60 = arith.maximumf %58, %59 : vector<8x8x200xbf16>
    %61 = vector.shape_cast %60 : vector<8x8x200xbf16> to vector<4x2x8x200xbf16>
    %cst_27 = arith.constant dense<0xFF80> : vector<4x8x200xbf16>
    %62 = vector.multi_reduction <maximumf>, %61, %cst_27 [1] : vector<4x2x8x200xbf16> to vector<4x8x200xbf16>
    %63 = vector.extract_strided_slice %62 {offsets = [0, 0, 0], sizes = [1, 8, 200], strides = [1, 1, 1]} : vector<4x8x200xbf16> to vector<1x8x200xbf16>
    %64 = vector.shape_cast %63 : vector<1x8x200xbf16> to vector<8x200xbf16>
    %c0_28 = arith.constant 0 : index
    %c0_29 = arith.constant 0 : index
    %c0_30 = arith.constant 0 : index
    %65 = vector.load %arg6[%c0_28, %c0_29, %c0_30] : memref<4x200x512xbf16, #tpu.memory_space<vmem>>, vector<1x200x512xbf16>
    %66 = vector.shape_cast %65 : vector<1x200x512xbf16> to vector<200x512xbf16>
    %cst_31 = arith.constant dense<0.000000e+00> : vector<8x512xf32>
    %67 = tpu.matmul %64, %66, %cst_31 {dimension_numbers = #tpu.dot_dimension_numbers<[1], [0], [0], [1], [0, 0, 1, 1], [], []>} : vector<8x200xbf16>, vector<200x512xbf16>, vector<8x512xf32> -> vector<8x512xf32>
    %68 = vector.extract_strided_slice %62 {offsets = [1, 0, 0], sizes = [1, 8, 200], strides = [1, 1, 1]} : vector<4x8x200xbf16> to vector<1x8x200xbf16>
    %69 = vector.shape_cast %68 : vector<1x8x200xbf16> to vector<8x200xbf16>
    %c1_32 = arith.constant 1 : index
    %c0_33 = arith.constant 0 : index
    %c0_34 = arith.constant 0 : index
    %70 = vector.load %arg6[%c1_32, %c0_33, %c0_34] : memref<4x200x512xbf16, #tpu.memory_space<vmem>>, vector<1x200x512xbf16>
    %71 = vector.shape_cast %70 : vector<1x200x512xbf16> to vector<200x512xbf16>
    %cst_35 = arith.constant dense<0.000000e+00> : vector<8x512xf32>
    %72 = tpu.matmul %69, %71, %cst_35 {dimension_numbers = #tpu.dot_dimension_numbers<[1], [0], [0], [1], [0, 0, 1, 1], [], []>} : vector<8x200xbf16>, vector<200x512xbf16>, vector<8x512xf32> -> vector<8x512xf32>
    %73 = arith.addf %67, %72 : vector<8x512xf32>
    %74 = vector.extract_strided_slice %62 {offsets = [2, 0, 0], sizes = [1, 8, 200], strides = [1, 1, 1]} : vector<4x8x200xbf16> to vector<1x8x200xbf16>
    %75 = vector.shape_cast %74 : vector<1x8x200xbf16> to vector<8x200xbf16>
    %c2_36 = arith.constant 2 : index
    %c0_37 = arith.constant 0 : index
    %c0_38 = arith.constant 0 : index
    %76 = vector.load %arg6[%c2_36, %c0_37, %c0_38] : memref<4x200x512xbf16, #tpu.memory_space<vmem>>, vector<1x200x512xbf16>
    %77 = vector.shape_cast %76 : vector<1x200x512xbf16> to vector<200x512xbf16>
    %cst_39 = arith.constant dense<0.000000e+00> : vector<8x512xf32>
    %78 = tpu.matmul %75, %77, %cst_39 {dimension_numbers = #tpu.dot_dimension_numbers<[1], [0], [0], [1], [0, 0, 1, 1], [], []>} : vector<8x200xbf16>, vector<200x512xbf16>, vector<8x512xf32> -> vector<8x512xf32>
    %79 = arith.addf %73, %78 : vector<8x512xf32>
    %80 = vector.extract_strided_slice %62 {offsets = [3, 0, 0], sizes = [1, 8, 200], strides = [1, 1, 1]} : vector<4x8x200xbf16> to vector<1x8x200xbf16>
    %81 = vector.shape_cast %80 : vector<1x8x200xbf16> to vector<8x200xbf16>
    %c3_40 = arith.constant 3 : index
    %c0_41 = arith.constant 0 : index
    %c0_42 = arith.constant 0 : index
    %82 = vector.load %arg6[%c3_40, %c0_41, %c0_42] : memref<4x200x512xbf16, #tpu.memory_space<vmem>>, vector<1x200x512xbf16>
    %83 = vector.shape_cast %82 : vector<1x200x512xbf16> to vector<200x512xbf16>
    %cst_43 = arith.constant dense<0.000000e+00> : vector<8x512xf32>
    %84 = tpu.matmul %81, %83, %cst_43 {dimension_numbers = #tpu.dot_dimension_numbers<[1], [0], [0], [1], [0, 0, 1, 1], [], []>} : vector<8x200xbf16>, vector<200x512xbf16>, vector<8x512xf32> -> vector<8x512xf32>
    %85 = arith.addf %79, %84 : vector<8x512xf32>
    %c0_44 = arith.constant 0 : index
    %c0_45 = arith.constant 0 : index
    %86 = vector.load %arg7[%c0_44, %c0_45] : memref<1x512xf32, #tpu.memory_space<vmem>>, vector<1x512xf32>
    %87 = vector.broadcast %86 : vector<1x512xf32> to vector<8x512xf32>
    %88 = arith.addf %85, %87 : vector<8x512xf32>
    %cst_46 = arith.constant 0.000000e+00 : f32
    %89 = vector.broadcast %cst_46 : f32 to vector<8x512xf32>
    %90 = arith.maximumf %88, %89 : vector<8x512xf32>
    %91 = arith.truncf %90 : vector<8x512xf32> to vector<8x512xbf16>
    %c0_47 = arith.constant 0 : index
    %c0_48 = arith.constant 0 : index
    %92 = vector.load %arg8[%c0_47, %c0_48] : memref<512x128xbf16, #tpu.memory_space<vmem>>, vector<512x128xbf16>
    %cst_49 = arith.constant dense<0.000000e+00> : vector<8x128xf32>
    %93 = tpu.matmul %91, %92, %cst_49 {dimension_numbers = #tpu.dot_dimension_numbers<[1], [0], [0], [1], [0, 0, 1, 1], [], []>} : vector<8x512xbf16>, vector<512x128xbf16>, vector<8x128xf32> -> vector<8x128xf32>
    %c0_50 = arith.constant 0 : index
    %c0_51 = arith.constant 0 : index
    %94 = vector.load %arg9[%c0_50, %c0_51] : memref<1x128xf32, #tpu.memory_space<vmem>>, vector<1x128xf32>
    %95 = vector.broadcast %94 : vector<1x128xf32> to vector<8x128xf32>
    %96 = arith.addf %93, %95 : vector<8x128xf32>
    %cst_52 = arith.constant dense<0xFF800000> : vector<8xf32>
    %97 = vector.multi_reduction <maximumf>, %96, %cst_52 [1] : vector<8x128xf32> to vector<8xf32>
    %98 = vector.shape_cast %97 : vector<8xf32> to vector<8x1xf32>
    %99 = vector.broadcast %98 : vector<8x1xf32> to vector<8x128xf32>
    %100 = arith.subf %96, %99 : vector<8x128xf32>
    %101 = math.exp %100 : vector<8x128xf32>
    %cst_53 = arith.constant dense<0.000000e+00> : vector<8xf32>
    %102 = vector.multi_reduction <add>, %101, %cst_53 [1] : vector<8x128xf32> to vector<8xf32>
    %103 = vector.shape_cast %102 : vector<8xf32> to vector<8x1xf32>
    %104 = math.log %103 : vector<8x1xf32>
    %105 = vector.broadcast %104 : vector<8x1xf32> to vector<8x128xf32>
    %106 = arith.subf %100, %105 : vector<8x128xf32>
    %c0_54 = arith.constant 0 : index
    %c0_55 = arith.constant 0 : index
    %107 = vector.load %arg10[%c0_54, %c0_55] : memref<8x128xf32, #tpu.memory_space<vmem>>, vector<8x128xf32>
    tpu.vector_store %arg10[%c0_54, %c0_55], %106 {strides = array<i32>} : memref<8x128xf32, #tpu.memory_space<vmem>>, vector<8x128xf32>,
    return
  }
  func.func @transform_0(%arg0: i32) -> (i32, i32, i32) {
    %c0_i32 = arith.constant 0 : i32
    %c0_i32_0 = arith.constant 0 : i32
    %c0_i32_1 = arith.constant 0 : i32
    return %c0_i32, %arg0, %c0_i32_0 : i32, i32, i32
  }
  func.func @transform_1(%arg0: i32) -> (i32, i32) {
    %c0_i32 = arith.constant 0 : i32
    %c0_i32_0 = arith.constant 0 : i32
    %c0_i32_1 = arith.constant 0 : i32
    return %c0_i32, %c0_i32_0 : i32, i32
  }
  func.func @transform_2(%arg0: i32) -> (i32, i32) {
    %c0_i32 = arith.constant 0 : i32
    %c0_i32_0 = arith.constant 0 : i32
    %c0_i32_1 = arith.constant 0 : i32
    return %c0_i32, %c0_i32_0 : i32, i32
  }
  func.func @transform_3(%arg0: i32) -> (i32, i32, i32) {
    %c0_i32 = arith.constant 0 : i32
    %c0_i32_0 = arith.constant 0 : i32
    %c0_i32_1 = arith.constant 0 : i32
    %c0_i32_2 = arith.constant 0 : i32
    return %c0_i32, %c0_i32_0, %c0_i32_1 : i32, i32, i32
  }
  func.func @transform_4(%arg0: i32) -> (i32, i32) {
    %c0_i32 = arith.constant 0 : i32
    %c0_i32_0 = arith.constant 0 : i32
    %c0_i32_1 = arith.constant 0 : i32
    return %c0_i32, %c0_i32_0 : i32, i32
  }
  func.func @transform_5(%arg0: i32) -> (i32, i32, i32) {
    %c0_i32 = arith.constant 0 : i32
    %c0_i32_0 = arith.constant 0 : i32
    %c0_i32_1 = arith.constant 0 : i32
    %c0_i32_2 = arith.constant 0 : i32
    return %c0_i32, %c0_i32_0, %c0_i32_1 : i32, i32, i32
  }
  func.func @transform_6(%arg0: i32) -> (i32, i32) {
    %c0_i32 = arith.constant 0 : i32
    %c0_i32_0 = arith.constant 0 : i32
    %c0_i32_1 = arith.constant 0 : i32
    return %c0_i32, %c0_i32_0 : i32, i32
  }
  func.func @transform_7(%arg0: i32) -> (i32, i32) {
    %c0_i32 = arith.constant 0 : i32
    %c0_i32_0 = arith.constant 0 : i32
    %c0_i32_1 = arith.constant 0 : i32
    return %c0_i32, %c0_i32_0 : i32, i32
  }
  func.func @transform_8(%arg0: i32) -> (i32, i32) {
    %c0_i32 = arith.constant 0 : i32
    %c0_i32_0 = arith.constant 0 : i32
    %c0_i32_1 = arith.constant 0 : i32
    return %c0_i32, %c0_i32_0 : i32, i32
  }
  func.func @transform_9(%arg0: i32) -> (i32, i32) {
    %c0_i32 = arith.constant 0 : i32
    %c0_i32_0 = arith.constant 0 : i32
    return %arg0, %c0_i32 : i32, i32
  }
}

</mosaic_0001>

<bundles_post_ra>
// kernel: lenet5_caffe_forward.1
= control target key start
LH: loop header
LB: loop body
LE: loop exit
PB: predicated region body
PF: predicated region fallthrough
CT: control target
= control target key end

     0   :  { %14 = vsyncpa [#allocation3], 0  ;;  %s10125_s0 = inlined_call_operand.vmem [shape: bf16[28,8,28], index: 0, kind: input, shape index: {}]   ;;  %s10126_s1 = inlined_call_operand.hbm [shape: bf16[140,512], index: 1, kind: input, shape index: {}]   ;;  %s10127_s2 = inlined_call_operand.hbm [shape: f32[1,512], index: 2, kind: input, shape index: {}]   ;;  %s10128_s3 = inlined_call_operand.hbm [shape: bf16[5,240,512], index: 3, kind: input, shape index: {}]   ;;  %s10129_s4 = inlined_call_operand.hbm [shape: f32[1,512], index: 4, kind: input, shape index: {}]   ;;  %s10130_s5 = inlined_call_operand.hbm [shape: bf16[4,200,512], index: 5, kind: input, shape index: {}]   ;;  %s10131_s6 = inlined_call_operand.hbm [shape: f32[1,512], index: 6, kind: input, shape index: {}]   ;;  %s10132_s7 = inlined_call_operand.hbm [shape: bf16[512,128], index: 7, kind: input, shape index: {}]   ;;  %s10133_s8 = inlined_call_operand.hbm [shape: f32[1,128], index: 8, kind: input, shape index: {}]   ;;  %s10134_s9 = inlined_call_operand.vmem [shape: f32[8,128], index: 9, kind: output, shape index: {}]  }
   0x1   :  { %15 = vsyncpa [#allocation5], 0 }
   0x2   :  { %16 = vsyncpa [#allocation8], 0 }
   0x3   :  { %17 = vsyncpa [#allocation11], 0 }
   0x4   :  { %18 = vsyncpa [#allocation14], 0  ;;  %s8814_s30 = smov [#allocation4]   ;;  %s8815_s11 = smov [#allocation7]  }
   0x5   :  { %s39_s10 = sshll.u32 %s8814_s30, 4  ;;  %s61_s12 = sshll.u32 %s8815_s11, 4  ;;  %s40_s10 = int_to_ptr.vmem [resolvable:$true] %s39_s10  ;;  %s62_s12 = int_to_ptr.vmem [resolvable:$true] %s61_s12 }
   0x6   :  { %s8652_s13 = scalar_lea.vmem %s40_s10, 64  ;;  %p8657_p1 = scmp.lt.s32.totalorder %s40_s10, %s40_s10 }
   0x7   :  { %p8653_p0 = scmp.ne.s32.totalorder %s40_s10, %s8652_s13  ;;  %p8658_p2 = scmp.lt.s32.totalorder %s8652_s13, %s8652_s13 }
   0x9   :  { %p8659_p3 = por %p8658_p2, %p8657_p1 }
   0xb   :  { %p8660_p4 = pnand %p8659_p3, %p8653_p0 }
   0xd   :  { %8663 = shalt.err (!%p8660_p4)
}
   0xe   :  { %42 = dma.hbm_to_vmem [thread:$0]  %s10127_s2, 64, %s40_s10, [#allocation5]  }
   0xf   :  { %s8672_s16 = scalar_lea.vmem %s62_s12, 64  ;;  %p8677_p6 = scmp.lt.s32.totalorder %s62_s12, %s62_s12 }
  0x10   :  { %p8673_p5 = scmp.ne.s32.totalorder %s62_s12, %s8672_s16  ;;  %p8678_p7 = scmp.lt.s32.totalorder %s8672_s16, %s8672_s16 }
  0x12   :  { %p8679_p8 = por %p8678_p7, %p8677_p6 }
  0x14   :  { %p8680_p9 = pnand %p8679_p8, %p8673_p5 }
  0x16   :  { %8683 = shalt.err (!%p8680_p9)
}
  0x17   :  { %64 = dma.hbm_to_vmem [thread:$0]  %s10129_s4, 64, %s62_s12, [#allocation8]  }
  0x18   :  { %s8816_s19 = smov [#allocation10]   ;;  %s8817_s21 = smov [#allocation2]  }
  0x19   :  { %s83_s20 = sshll.u32 %s8816_s19, 4  ;;  %s26_s22 = sshll.u32 %s8817_s21, 4  ;;  %s84_s20 = int_to_ptr.vmem [resolvable:$true] %s83_s20  ;;  %s27_s22 = int_to_ptr.vmem [resolvable:$true] %s26_s22 }
  0x1a   :  { %s8692_s23 = scalar_lea.vmem %s84_s20, 64  ;;  %p8697_p11 = scmp.lt.s32.totalorder %s84_s20, %s84_s20 }
  0x1b   :  { %p8693_p10 = scmp.ne.s32.totalorder %s84_s20, %s8692_s23  ;;  %p8698_p12 = scmp.lt.s32.totalorder %s8692_s23, %s8692_s23 }
  0x1d   :  { %p8699_p13 = por %p8698_p12, %p8697_p11 }
  0x1f   :  { %p8700_p0 = pnand %p8699_p13, %p8693_p10 }
  0x21   :  { %8703 = shalt.err (!%p8700_p0)
}
  0x22   :  { %86 = dma.hbm_to_vmem [thread:$0]  %s10131_s6, 64, %s84_s20, [#allocation11]  }
  0x23   :  { %s8712_s25 = scalar_lea.vmem %s27_s22, 4608  ;;  %p8717_p2 = scmp.lt.s32.totalorder %s27_s22, %s27_s22 }
  0x24   :  { %p8713_p1 = scmp.ne.s32.totalorder %s27_s22, %s8712_s25  ;;  %p8718_p3 = scmp.lt.s32.totalorder %s8712_s25, %s8712_s25 }
  0x26   :  { %p8719_p4 = por %p8718_p3, %p8717_p2 }
  0x28   :  { %p8720_p5 = pnand %p8719_p4, %p8713_p1 }
  0x2a   :  { %8723 = shalt.err (!%p8720_p5)
}
  0x2b   :  { %s8818_s4 = smov 256   ;;  %s8819_s26 = smov 16  }
  0x2c   :  { %32 = dma.hbm_to_vmem [thread:$0]  %s10126_s1, 4608, %s27_s22, [#allocation3], %s8818_s4, %s8818_s4, %s8819_s26  }
  0x2d   :  { %s8820_s29 = smov [#allocation6]   ;;  %s8821_s10 = smov [#allocation9]  }
  0x2e   :  { %s48_s30 = sshll.u32 %s8820_s29, 4  ;;  %s70_s11 = sshll.u32 %s8821_s10, 4  ;;  %s49_s30 = int_to_ptr.vmem [resolvable:$true] %s48_s30  ;;  %s71_s11 = int_to_ptr.vmem [resolvable:$true] %s70_s11 }
  0x2f   :  { %s8732_s6 = scalar_lea.vmem %s49_s30, 38400  ;;  %p8737_p7 = scmp.lt.s32.totalorder %s49_s30, %s49_s30 }
  0x30   :  { %p8733_p6 = scmp.ne.s32.totalorder %s49_s30, %s8732_s6  ;;  %p8738_p8 = scmp.lt.s32.totalorder %s8732_s6, %s8732_s6 }
  0x32   :  { %p8739_p9 = por %p8738_p8, %p8737_p7 }
  0x34   :  { %p8740_p10 = pnand %p8739_p9, %p8733_p6 }
  0x36   :  { %8743 = shalt.err (!%p8740_p10)
}
  0x37   :  { %54 = dma.hbm_to_vmem [thread:$0]  %s10128_s3, 38400, %s49_s30, [#allocation5], %s8818_s4, %s8818_s4, %s8819_s26  }
  0x38   :  { %s8752_s14 = scalar_lea.vmem %s71_s11, 25600  ;;  %p8757_p12 = scmp.lt.s32.totalorder %s71_s11, %s71_s11 }
  0x39   :  { %p8753_p11 = scmp.ne.s32.totalorder %s71_s11, %s8752_s14  ;;  %p8758_p13 = scmp.lt.s32.totalorder %s8752_s14, %s8752_s14 }
  0x3b   :  { %p8759_p0 = por %p8758_p13, %p8757_p12 }
  0x3d   :  { %p8760_p1 = pnand %p8759_p0, %p8753_p11 }
  0x3f   :  { %8763 = shalt.err (!%p8760_p1)
}
  0x40   :  { %76 = dma.hbm_to_vmem [thread:$0]  %s10130_s5, 25600, %s71_s11, [#allocation8], %s8818_s4, %s8818_s4, %s8819_s26  }
  0x41   :  { %s8822_s16 = smov [#allocation12]  }
  0x42   :  { %s92_s17 = sshll.u32 %s8822_s16, 4  ;;  %s93_s17 = int_to_ptr.vmem [resolvable:$true] %s92_s17 }
  0x43   :  { %s8772_s18 = scalar_lea.vmem %s93_s17, 4096  ;;  %p8777_p3 = scmp.lt.s32.totalorder %s93_s17, %s93_s17 }
  0x44   :  { %p8773_p2 = scmp.ne.s32.totalorder %s93_s17, %s8772_s18  ;;  %p8778_p4 = scmp.lt.s32.totalorder %s8772_s18, %s8772_s18 }
  0x46   :  { %p8779_p5 = por %p8778_p4, %p8777_p3 }
  0x48   :  { %p8780_p6 = pnand %p8779_p5, %p8773_p2 }
  0x4a   :  { %8783 = shalt.err (!%p8780_p6)
}
  0x4b   :  { %s8823_s3 = smov 64   ;;  %s8824_s19 = smov 4  }
  0x4c   :  { %98 = dma.hbm_to_vmem [thread:$0]  %s10132_s7, 4096, %s93_s17, [#allocation11], %s8823_s3, %s8823_s3, %s8824_s19  }
  0x4d   :  { %s8825_s22 = smov [#allocation13]  }
  0x4e   :  { %s105_s23 = sshll.u32 %s8825_s22, 4  ;;  %s106_s23 = int_to_ptr.vmem [resolvable:$true] %s105_s23 }
  0x4f   :  { %s8792_s5 = scalar_lea.vmem %s106_s23, 16  ;;  %s8796_s2 = scalar_lea.vmem %s106_s23, 32 }
  0x50   :  { %p8793_p7 = scmp.ne.s32.totalorder %s106_s23, %s8792_s5  ;;  %p8797_p8 = scmp.lt.s32.totalorder %s106_s23, %s106_s23 }
  0x51   :  { %p8798_p9 = scmp.lt.s32.totalorder %s8796_s2, %s8792_s5 }
  0x53   :  { %p8799_p10 = por %p8798_p9, %p8797_p8 }
  0x55   :  { %p8800_p11 = pnand %p8799_p10, %p8793_p7 }
  0x57   :  { %8803 = shalt.err (!%p8800_p11)
}
  0x58   :  { %108 = dma.hbm_to_vmem [thread:$0]  %s10133_s8, 16, %s106_s23, [#allocation14]  }
  0x59   :  { %8804 = dma.done.wait [#allocation3], 4608  }
  0x5a   :  { %8805 = vsyncadd [#allocation3], 4294962688 }
  0x5b   :  { %8806 = dma.done.wait [#allocation5], 38464  }
  0x5c   :  { %8807 = vsyncadd [#allocation5], 4294928832 }
  0x5d   :  { %8808 = dma.done.wait [#allocation8], 25664  }
  0x5e   :  { %8809 = vsyncadd [#allocation8], 4294941632 }
  0x5f   :  { %8810 = dma.done.wait [#allocation11], 4160  }
  0x60   :  { %8811 = vsyncadd [#allocation11], 4294963136 }
  0x61   :  { %8812 = dma.done.wait [#allocation14], 16  }
  0x62   :  { %8813 = vsyncadd [#allocation14], 4294967280  ;;  %v137_v0 = vld [vmem:[%s10125_s0 + $0x8] sm:$0xf]  ;;  %v8910_v1 = vld [vmem:[%s10125_s0 + $0x4] sm:$0xf] }
  0x63   :  { %v138_v2 = vld [vmem:[%s10125_s0 + $0xc] sm:$0xf]  ;;  %v6824_v3 = vcombine.low %v137_v0, %v137_v0  ;;  %v6823_v4 = vcombine.low %v8910_v1, %v8910_v1  ;;  %s8826_s29 = smov 56   ;;  %s8827_s30 = smov 28   ;;  %v139_v6 = vld [vmem:[%s10125_s0 + $0x10] sm:$0xf] }
  0x64   :  { %v6825_v5 = vcombine.low %v138_v2, %v138_v2  ;;  %v7766_v7 = vld [vmem:[#allocation2 + $0xe4] ss:$16 sps:$4 sm:$0xff]   ;;  %v7768_v9 = vld [vmem:[#allocation2 + $0xec] ss:$16 sps:$4 sm:$0xff]   ;;  %v6826_v10 = vcombine.low %v139_v6, %v139_v6  ;;  %v7770_v11 = vld [vmem:[#allocation2 + $0xe0] ss:$16 sps:$4 sm:$0xff]  }
  0x65   :  { %286 = vrot.lane.b32.xlu1 %v6824_v3, %s8826_s29  ;;  %235 = vrot.lane.b32.xlu0 %v6823_v4, %s8827_s30  ;;  %v140_v8 = vld [vmem:[%s10125_s0 + $0x14] sm:$0xf]  ;;  %v7771_v12 = vld [vmem:[#allocation2 + $0xe8] ss:$16 sps:$4 sm:$0xff]   ;;  %v7774_v14 = vld [vmem:[#allocation2 + $0xcc] ss:$16 sps:$4 sm:$0xff]  }
  0x66   :  { %1048 = vmatprep.subr.bf16.mxu0 %v7766_v7  ;;  %1201 = vmatprep.subr.bf16.mxu1 %v7768_v9  ;;  %v7772_v13 = vld [vmem:[#allocation2 + $0xc4] ss:$16 sps:$4 sm:$0xff]   ;;  %v7776_v15 = vld [vmem:[#allocation2 + $0xc0] ss:$16 sps:$4 sm:$0xff]   ;;  %v7777_v16 = vld [vmem:[#allocation2 + $0xc8] ss:$16 sps:$4 sm:$0xff]   ;;  %v8929_v17 = vcombine.low %v140_v8, %v140_v8 }
  0x67   :  { %1049 = vmatpush1.bf16.msra.mxu0 %v7770_v11  ;;  %1202 = vmatpush1.bf16.msra.mxu1 %v7771_v12  ;;  %s8828_s13 = smov 84   ;;  %v7778_v18 = vld [vmem:[#allocation2 + $0xa4] ss:$16 sps:$4 sm:$0xff]   ;;  %v7780_v19 = vld [vmem:[#allocation2 + $0xac] ss:$16 sps:$4 sm:$0xff]   ;;  %s8829_s14 = smov 112  }
  0x68   :  { %1050 = vmatprep.subr.bf16.mxu0 %v7772_v13  ;;  %1203 = vmatprep.subr.bf16.mxu1 %v7774_v14  ;;  %v7782_v20 = vld [vmem:[#allocation2 + $0xa0] ss:$16 sps:$4 sm:$0xff]   ;;  %v7783_v21 = vld [vmem:[#allocation2 + $0xa8] ss:$16 sps:$4 sm:$0xff]   ;;  %v7785_v22 = vld [vmem:[#allocation2 + $0x84] ss:$16 sps:$4 sm:$0xff]  }
  0x69   :  { %288 = vrot.lane.b32.xlu1 %v6825_v5, %s8826_s29  ;;  %237 = vrot.lane.b32.xlu0 %v6824_v3, %s8827_s30  ;;  %v7787_v23 = vld [vmem:[#allocation2 + $0x8c] ss:$16 sps:$4 sm:$0xff]   ;;  %v7789_v24 = vld [vmem:[#allocation2 + $0x80] ss:$16 sps:$4 sm:$0xff]   ;;  %v7790_v25 = vld [vmem:[#allocation2 + $0x88] ss:$16 sps:$4 sm:$0xff]  }
  0x6a   :  { %v7792_v26 = vld [vmem:[#allocation2 + $0x64] ss:$16 sps:$4 sm:$0xff]   ;;  %v7794_v27 = vld [vmem:[#allocation2 + $0x6c] ss:$16 sps:$4 sm:$0xff]   ;;  %v141_v28 = vld [vmem:[%s10125_s0 + $0x18] sm:$0xf] }
  0x6b   :  { %1051 = vmatpush1.bf16.msra.mxu0 %v7776_v15  ;;  %1204 = vmatpush1.bf16.msra.mxu1 %v7777_v16  ;;  %v7796_v29 = vld [vmem:[#allocation2 + $0x60] ss:$16 sps:$4 sm:$0xff]   ;;  %v7797_v30 = vld [vmem:[#allocation2 + $0x68] ss:$16 sps:$4 sm:$0xff]   ;;  %v7798_v31 = vld [vmem:[#allocation2 + $0x44] ss:$16 sps:$4 sm:$0xff]   ;;  %v6828_v33 = vcombine.low %v141_v28, %v141_v28 }
  0x6c   :  { %1052 = vmatprep.subr.bf16.mxu0 %v7778_v18  ;;  %1205 = vmatprep.subr.bf16.mxu1 %v7780_v19  ;;  %v7800_v32 = vld [vmem:[#allocation2 + $0x4c] ss:$16 sps:$4 sm:$0xff]   ;;  %v7802_v35 = vld [vmem:[#allocation2 + $0x40] ss:$16 sps:$4 sm:$0xff]   ;;  %v7803_v36 = vld [vmem:[#allocation2 + $0x48] ss:$16 sps:$4 sm:$0xff]  }
  0x6d   :  { %339 = vrot.lane.b32.xlu1 %v6826_v10, %s8828_s13  ;;  %337 = vrot.lane.b32.xlu0 %v6825_v5, %s8828_s13  ;;  %v142_v34 = vld [vmem:[%s10125_s0 + $0x1c] sm:$0xf]  ;;  %v7804_v37 = vld [vmem:[#allocation2 + $0x24] ss:$16 sps:$4 sm:$0xff]   ;;  %v7808_v40 = vld [vmem:[#allocation2 + $0x20] ss:$16 sps:$4 sm:$0xff]  }
  0x6e   :  { %v7806_v38 = vld [vmem:[#allocation2 + $0x2c] ss:$16 sps:$4 sm:$0xff]   ;;  %v6829_v39 = vcombine.low %v142_v34, %v142_v34  ;;  %v7809_v41 = vld [vmem:[#allocation2 + $0x28] ss:$16 sps:$4 sm:$0xff]   ;;  %v7811_v42 = vld [vmem:[#allocation2 + $0x4] ss:$16 sps:$4 sm:$0xff]  }
  0x6f   :  { %1053 = vmatpush1.bf16.msra.mxu0 %v7782_v20  ;;  %1206 = vmatpush1.bf16.msra.mxu1 %v7783_v21  ;;  %v7813_v43 = vld [vmem:[#allocation2 + $0xc] ss:$16 sps:$4 sm:$0xff]   ;;  %v7815_v44 = vld [vmem:[#allocation2] ss:$16 sps:$4 sm:$0xff]   ;;  %v7816_v45 = vld [vmem:[#allocation2 + $0x8] ss:$16 sps:$4 sm:$0xff]  }
  0x70   :  { %1054 = vmatprep.subr.bf16.mxu0 %v7785_v22  ;;  %1207 = vmatprep.subr.bf16.mxu1 %v7787_v23  ;;  %v7818_v46 = vld [vmem:[#allocation2 + $0x104] ss:$16 sps:$4 sm:$0x3f]   ;;  %v7820_v47 = vld [vmem:[#allocation2 + $0x10c] ss:$16 sps:$4 sm:$0x3f]  }
  0x71   :  { %390 = vrot.lane.b32.xlu1 %v8929_v17, %s8829_s14  ;;  %388 = vrot.lane.b32.xlu0 %v6826_v10, %s8829_s14  ;;  %v7822_v48 = vld [vmem:[#allocation2 + $0x100] ss:$16 sps:$4 sm:$0x3f]   ;;  %v7823_v49 = vld [vmem:[#allocation2 + $0x108] ss:$16 sps:$4 sm:$0x3f]  }
  0x72   :  { %v143_v50 = vld [vmem:[%s10125_s0 + $0x20] sm:$0xf]  ;;  %vm1035_vm0 = vcmask 1045504   ;;  %v144_v51 = vld [vmem:[%s10125_s0 + $0x24] sm:$0xf]  ;;  %vm436_vm1 = vcmask 228352  }
  0x73   :  { %1055 = vmatpush1.bf16.msra.mxu0 %v7789_v24  ;;  %1208 = vmatpush1.bf16.msra.mxu1 %v7790_v25  ;;  %v1037_v52 = vsel %vm1035_vm0, %v7822_v48, 0  ;;  %v1043_v53 = vsel %vm1035_vm0, %v7823_v49, 0  ;;  %v6830_v54 = vcombine.low %v143_v50, %v143_v50  ;;  %v6831_v55 = vcombine.low %v144_v51, %v144_v51  ;;  %v145_v56 = vld [vmem:[%s10125_s0 + $0x28] sm:$0xf]  ;;  %v146_v57 = vld [vmem:[%s10125_s0 + $0x2c] sm:$0xf] }
  0x74   :  { %1056 = vmatprep.subr.bf16.mxu0 %v7792_v26  ;;  %1209 = vmatprep.subr.bf16.mxu1 %v7794_v27  ;;  %v6832_v58 = vcombine.low %v145_v56, %v145_v56  ;;  %v6833_v59 = vcombine.low %v146_v57, %v146_v57  ;;  %v147_v60 = vld [vmem:[%s10125_s0 + $0x30] sm:$0xf]  ;;  %v148_v61 = vld [vmem:[%s10125_s0 + $0x34] sm:$0xf]  ;;  %v149_v0 = vld [vmem:[%s10125_s0 + $0x38] sm:$0xf] }
  0x75   :  { %241 = vrot.lane.b32.xlu1 %v6826_v10, %s8827_s30  ;;  %239 = vrot.lane.b32.xlu0 %v6825_v5, %s8827_s30  ;;  %v6834_v62 = vcombine.low %v147_v60, %v147_v60  ;;  %v6835_v63 = vcombine.low %v148_v61, %v148_v61  ;;  %v150_v2 = vld [vmem:[%s10125_s0 + $0x3c] sm:$0xf]  ;;  %v6836_v3 = vcombine.low %v149_v0, %v149_v0  ;;  %v151_v5 = vld [vmem:[%s10125_s0 + $0x40] sm:$0xf]  ;;  %vm509_vm2 = vcmask 457728  }
  0x76   :  { %v6837_v4 = vcombine.low %v150_v2, %v150_v2  ;;  %v152_v6 = vld [vmem:[%s10125_s0 + $0x44] sm:$0xf]  ;;  %v6838_v7 = vcombine.low %v151_v5, %v151_v5  ;;  %v153_v9 = vld [vmem:[%s10125_s0 + $0x48] sm:$0xf]  ;;  %v154_v12 = vld [vmem:[%s10125_s0 + $0x4c] sm:$0xf] }
  0x77   :  { %1057 = vmatpush1.bf16.msra.mxu0 %v7796_v29  ;;  %1210 = vmatpush1.bf16.msra.mxu1 %v7797_v30  ;;  %v6839_v8 = vcombine.low %v152_v6, %v152_v6  ;;  %v6840_v13 = vcombine.low %v153_v9, %v153_v9  ;;  %v135_v16 = vld [vmem:[%s10125_s0] sm:$0xf]  ;;  %vm558_vm3 = vcmask 687104   ;;  %vm607_vm4 = vcmask 916480   ;;  %v155_v30 = vld [vmem:[%s10125_s0 + $0x50] sm:$0xf] }
  0x78   :  { %1058 = vmatprep.subr.bf16.mxu0 %v7798_v31  ;;  %1211 = vmatprep.subr.bf16.mxu1 %v7800_v32  ;;  %vm998_vm5 = vcmask 97280   ;;  %v156_v34 = vld [vmem:[%s10125_s0 + $0x54] sm:$0xf]  ;;  %v7835_v60 = vld [vmem:[#allocation6 + $0x2c8] ss:$16 sps:$4 sm:$0xff]   ;;  %vm1762_vm6 = vcmask 1043456  }
  0x79   :  { %292 = vrot.lane.b32.xlu1 %v8929_v17, %s8826_s29  ;;  %290 = vrot.lane.b32.xlu0 %v6826_v10, %s8826_s29  ;;  %v158_v61 = vld [vmem:[%s10125_s0 + $0x5c] sm:$0xf]  ;;  %v7838_v2 = vld [vmem:[#allocation6 + $0x2a0] ss:$16 sps:$4 sm:$0xff]   ;;  %vm1763_vm7 = vcmask 916484   ;;  %vm4772_vm9 = vcmask 588804  }
  0x7a   :  { %vm9316_vm8 = vmor %vm1763_vm7, %vm1762_vm6  ;;  %vm5159_vm11 = vcmask 588800  }
  0x7b   :  { %1059 = vmatpush1.bf16.msra.mxu0 %v7802_v35  ;;  %1212 = vmatpush1.bf16.msra.mxu1 %v7803_v36  ;;  %v6842_v35 = vcombine.low %v155_v30, %v155_v30  ;;  %vm10012_vm10 = vmor %vm4772_vm9, %vm1762_vm6 }
  0x7c   :  { %1060 = vmatprep.subr.bf16.mxu0 %v7804_v37  ;;  %1213 = vmatprep.subr.bf16.mxu1 %v7806_v38  ;;  %v9061_v38 = vcombine.low %v156_v34, %v156_v34 }
  0x7d   :  { %343 = vrot.lane.b32.xlu1 %v6828_v33, %s8828_s13  ;;  %341 = vrot.lane.b32.xlu0 %v8929_v17, %s8828_s13 }
  0x7f   :  { %1061 = vmatpush1.bf16.msra.mxu0 %v7808_v40  ;;  %1214 = vmatpush1.bf16.msra.mxu1 %v7809_v41  ;;  %v8622_v41 = vld [vmem:[%s10125_s0 + $0xc] sm:$0xf] }
  0x80   :  { %1062 = vmatprep.subr.bf16.mxu0 %v7811_v42  ;;  %1215 = vmatprep.subr.bf16.mxu1 %v7813_v43  ;;  %v8623_v43 = vld [vmem:[%s10125_s0 + $0x8] sm:$0xf] }
  0x81   :  { %394 = vrot.lane.b32.xlu1 %v6829_v39, %s8829_s14  ;;  %392 = vrot.lane.b32.xlu0 %v6828_v33, %s8829_s14 }
  0x83   :  { %1063 = vmatpush1.bf16.msra.mxu0 %v7815_v44  ;;  %1216 = vmatpush1.bf16.msra.mxu1 %v7816_v45 }
  0x84   :  { %6910 = vmatprep.subr.msk.bf16.mxu0 %vm1035_vm0, %v7818_v46  ;;  %6923 = vmatprep.subr.msk.bf16.mxu1 %vm1035_vm0, %v7820_v47 }
  0x85   :  { %245 = vrot.lane.b32.xlu1 %v6828_v33, %s8827_s30  ;;  %243 = vrot.lane.b32.xlu0 %v8929_v17, %s8827_s30  ;;  %v6841_v17 = vcombine.low %v154_v12, %v154_v12  ;;  %v8625_v12 = vld [vmem:[%s10125_s0 + $0x10] sm:$0xf] }
  0x87   :  { %1079 = vmatpush2.bf16.msra.mxu0 %v1037_v52  ;;  %1232 = vmatpush2.bf16.msra.mxu1 %v1043_v53 }
  0x89   :  { %296 = vrot.lane.b32.xlu1 %v6829_v39, %s8826_s29  ;;  %294 = vrot.lane.b32.xlu0 %v6828_v33, %s8826_s29 }
  0x8d   :  { %347 = vrot.lane.b32.xlu1 %v6830_v54, %s8828_s13  ;;  %345 = vrot.lane.b32.xlu0 %v6829_v39, %s8828_s13 }
  0x91   :  { %398 = vrot.lane.b32.xlu1 %v6831_v55, %s8829_s14  ;;  %396 = vrot.lane.b32.xlu0 %v6830_v54, %s8829_s14 }
  0x95   :  { %249 = vrot.lane.b32.xlu1 %v6830_v54, %s8827_s30  ;;  %247 = vrot.lane.b32.xlu0 %v6829_v39, %s8827_s30 }
  0x99   :  { %300 = vrot.lane.b32.xlu1 %v6831_v55, %s8826_s29  ;;  %298 = vrot.lane.b32.xlu0 %v6830_v54, %s8826_s29  ;;  %v157_v54 = vld [vmem:[%s10125_s0 + $0x58] sm:$0xf] }
  0x9a   :  { %v6844_v0 = vcombine.low %v157_v54, %v157_v54 }
  0x9d   :  { %351 = vrot.lane.b32.xlu1 %v6832_v58, %s8828_s13  ;;  %349 = vrot.lane.b32.xlu0 %v6831_v55, %s8828_s13 }
  0xa1   :  { %402 = vrot.lane.b32.xlu1 %v6833_v59, %s8829_s14  ;;  %400 = vrot.lane.b32.xlu0 %v6832_v58, %s8829_s14 }
  0xa5   :  { %253 = vrot.lane.b32.xlu1 %v6832_v58, %s8827_s30  ;;  %251 = vrot.lane.b32.xlu0 %v6831_v55, %s8827_s30 }
  0xa9   :  { %304 = vrot.lane.b32.xlu1 %v6833_v59, %s8826_s29  ;;  %302 = vrot.lane.b32.xlu0 %v6832_v58, %s8826_s29  ;;  %v7832_v58 = vld [vmem:[#allocation6 + $0x2c0] ss:$16 sps:$4 sm:$0xff]  }
  0xad   :  { %355 = vrot.lane.b32.xlu1 %v6834_v62, %s8828_s13  ;;  %353 = vrot.lane.b32.xlu0 %v6833_v59, %s8828_s13 }
  0xb1   :  { %406 = vrot.lane.b32.xlu1 %v6835_v63, %s8829_s14  ;;  %404 = vrot.lane.b32.xlu0 %v6834_v62, %s8829_s14 }
  0xb5   :  { %257 = vrot.lane.b32.xlu1 %v6834_v62, %s8827_s30  ;;  %255 = vrot.lane.b32.xlu0 %v6833_v59, %s8827_s30  ;;  %v7834_v59 = vld [vmem:[#allocation6 + $0x2c4] ss:$16 sps:$4 sm:$0xff]  }
  0xb6   :  { %2319 = vmatprep.subr.bf16.mxu0 %v7834_v59 }
  0xb9   :  { %308 = vrot.lane.b32.xlu1 %v6835_v63, %s8826_s29  ;;  %306 = vrot.lane.b32.xlu0 %v6834_v62, %s8826_s29  ;;  %v7837_v62 = vld [vmem:[#allocation6 + $0x2cc] ss:$16 sps:$4 sm:$0xff]  }
  0xba   :  { %2392 = vmatprep.subr.bf16.mxu1 %v7837_v62 }
  0xbd   :  { %359 = vrot.lane.b32.xlu1 %v6836_v3, %s8828_s13  ;;  %357 = vrot.lane.b32.xlu0 %v6835_v63, %s8828_s13 }
  0xc1   :  { %410 = vrot.lane.b32.xlu1 %v6837_v4, %s8829_s14  ;;  %408 = vrot.lane.b32.xlu0 %v6836_v3, %s8829_s14 }
  0xc5   :  { %261 = vrot.lane.b32.xlu1 %v6836_v3, %s8827_s30  ;;  %259 = vrot.lane.b32.xlu0 %v6835_v63, %s8827_s30  ;;  %v7840_v63 = vld [vmem:[#allocation6 + $0x2a4] ss:$16 sps:$4 sm:$0xff]  }
  0xc9   :  { %312 = vrot.lane.b32.xlu1 %v6837_v4, %s8826_s29  ;;  %310 = vrot.lane.b32.xlu0 %v6836_v3, %s8826_s29  ;;  %v7841_v3 = vld [vmem:[#allocation6 + $0x2a8] ss:$16 sps:$4 sm:$0xff]  }
  0xcd   :  { %363 = vrot.lane.b32.xlu1 %v6838_v7, %s8828_s13  ;;  %361 = vrot.lane.b32.xlu0 %v6837_v4, %s8828_s13 }
  0xd1   :  { %414 = vrot.lane.b32.xlu1 %v6839_v8, %s8829_s14  ;;  %412 = vrot.lane.b32.xlu0 %v6838_v7, %s8829_s14 }
  0xd5   :  { %265 = vrot.lane.b32.xlu1 %v6838_v7, %s8827_s30  ;;  %263 = vrot.lane.b32.xlu0 %v6837_v4, %s8827_s30  ;;  %v7843_v4 = vld [vmem:[#allocation6 + $0x2ac] ss:$16 sps:$4 sm:$0xff]  }
  0xd7   :  { %v287_v10 = vpop.permute.xlu1 %286  ;;  %v236_v11 = vpop.permute.xlu0 %235 }
  0xd8   :  { %v439_v18 = vsel %vm436_vm1, %v135_v16, %v236_v11 }
  0xd9   :  { %316 = vrot.lane.b32.xlu1 %v6839_v8, %s8826_s29  ;;  %314 = vrot.lane.b32.xlu0 %v6838_v7, %s8826_s29  ;;  %v511_v23 = vsel %vm509_vm2, %v439_v18, %v287_v10  ;;  %v6845_v7 = vcombine.low %v158_v61, %v158_v61  ;;  %v8624_v10 = vld [vmem:[%s10125_s0 + $0x14] sm:$0xf] }
  0xdb   :  { %v289_v14 = vpop.permute.xlu1 %288  ;;  %v238_v15 = vpop.permute.xlu0 %237 }
  0xdc   :  { %v442_v19 = vsel %vm436_vm1, %v8910_v1, %v238_v15 }
  0xdd   :  { %367 = vrot.lane.b32.xlu1 %v6840_v13, %s8828_s13  ;;  %365 = vrot.lane.b32.xlu0 %v6839_v8, %s8828_s13  ;;  %v513_v22 = vsel %vm509_vm2, %v442_v19, %v289_v14 }
  0xdf   :  { %v340_v20 = vpop.permute.xlu1 %339  ;;  %v338_v21 = vpop.permute.xlu0 %337 }
  0xe0   :  { %v562_v24 = vsel %vm558_vm3, %v513_v22, %v340_v20  ;;  %v560_v25 = vsel %vm558_vm3, %v511_v23, %v338_v21 }
  0xe1   :  { %418 = vrot.lane.b32.xlu1 %v6841_v17, %s8829_s14  ;;  %416 = vrot.lane.b32.xlu0 %v6840_v13, %s8829_s14 }
  0xe3   :  { %v391_v26 = vpop.permute.xlu1 %390  ;;  %v389_v27 = vpop.permute.xlu0 %388 }
  0xe4   :  { %v611_v1 = vsel %vm607_vm4, %v562_v24, %v391_v26  ;;  %v609_v28 = vsel %vm607_vm4, %v560_v25, %v389_v27  ;;  %v6851_v29 = vcombine.low %v389_v27, %v391_v26  ;;  %v7828_v26 = vld [vmem:[%s10125_s0 + $0x60] ss:$0 sps:$4 sm:$0xff]  }
  0xe5   :  { %v6850_v31 = vcombine.low %v609_v28, %v611_v1  ;;  %269 = vrot.lane.b32.xlu1 %v6840_v13, %s8827_s30  ;;  %267 = vrot.lane.b32.xlu0 %v6839_v8, %s8827_s30  ;;  %v7829_v28 = vld [vmem:[%s10125_s0 + $0x64] ss:$0 sps:$4 sm:$0xff]  }
  0xe6   :  { %6911 = vmatprep.mubr.msk.bf16.mxu0 %vm998_vm5, %v6851_v29  ;;  %6924 = vmatprep.mubr.msk.bf16.mxu1 %vm998_vm5, %v6851_v29 }
  0xe7   :  { %v242_v32 = vpop.permute.xlu1 %241  ;;  %v240_v33 = vpop.permute.xlu0 %239  ;;  %1081 = vmatmul.mubr.bf16.vlgmr.msra.gmra.mxu0 %v6850_v31  ;;  %1234 = vmatmul.mubr.bf16.vlgmr.msra.gmra.mxu1 %v6850_v31  ;;  %v8626_v31 = vld [vmem:[%s10125_s0 + $0x1c] sm:$0xf] }
  0xe8   :  { %v448_v42 = vsel %vm436_vm1, %v8622_v41, %v242_v32  ;;  %v445_v44 = vsel %vm436_vm1, %v8623_v43, %v240_v33  ;;  %2320 = vmatpush1.bf16.msra.mxu0 %v7832_v58  ;;  %2393 = vmatpush1.bf16.msra.mxu1 %v7835_v60  ;;  %v8627_v33 = vld [vmem:[%s10125_s0 + $0x18] sm:$0xf] }
  0xe9   :  { %320 = vrot.lane.b32.xlu1 %v6841_v17, %s8826_s29  ;;  %318 = vrot.lane.b32.xlu0 %v6840_v13, %s8826_s29 }
  0xea   :  { %2321 = vmatprep.subr.bf16.mxu0 %v7840_v63  ;;  %2394 = vmatprep.subr.bf16.mxu1 %v7843_v4  ;;  %v7846_v4 = vld [vmem:[#allocation6 + $0x284] ss:$16 sps:$4 sm:$0xff]  }
  0xeb   :  { %v293_v36 = vpop.permute.xlu1 %292  ;;  %v291_v37 = vpop.permute.xlu0 %290 }
  0xec   :  { %v517_v45 = vsel %vm509_vm2, %v448_v42, %v293_v36  ;;  %v515_v46 = vsel %vm509_vm2, %v445_v44, %v291_v37  ;;  %2322 = vmatpush1.bf16.msra.mxu0 %v7838_v2  ;;  %2395 = vmatpush1.bf16.msra.mxu1 %v7841_v3 }
  0xed   :  { %371 = vrot.lane.b32.xlu1 %v6842_v35, %s8828_s13  ;;  %369 = vrot.lane.b32.xlu0 %v6841_v17, %s8828_s13 }
  0xee   :  { %2323 = vmatprep.subr.bf16.mxu0 %v7846_v4  ;;  %v7888_v4 = vld [vmem:[#allocation6 + $0x384] ss:$16 sps:$4 sm:$0xff]  }
  0xef   :  { %v344_v39 = vpop.permute.xlu1 %343  ;;  %v342_v40 = vpop.permute.xlu0 %341 }
  0xf0   :  { %v566_v47 = vsel %vm558_vm3, %v517_v45, %v344_v39  ;;  %v564_v48 = vsel %vm558_vm3, %v515_v46, %v342_v40 }
  0xf1   :  { %422 = vrot.lane.b32.xlu1 %v9061_v38, %s8829_s14  ;;  %420 = vrot.lane.b32.xlu0 %v6842_v35, %s8829_s14 }
  0xf3   :  { %v395_v49 = vpop.permute.xlu1 %394  ;;  %v393_v50 = vpop.permute.xlu0 %392 }
  0xf4   :  { %v615_v51 = vsel %vm607_vm4, %v566_v47, %v395_v49  ;;  %v613_v52 = vsel %vm607_vm4, %v564_v48, %v393_v50  ;;  %v6853_v53 = vcombine.low %v393_v50, %v395_v49  ;;  %v7830_v47 = vld [vmem:[%s10125_s0 + $0x68] ss:$0 sps:$4 sm:$0xff]   ;;  %v7831_v50 = vld [vmem:[%s10125_s0 + $0x6c] ss:$0 sps:$4 sm:$0xff]  }
  0xf5   :  { %v6852_v55 = vcombine.low %v613_v52, %v615_v51  ;;  %273 = vrot.lane.b32.xlu1 %v6842_v35, %s8827_s30  ;;  %271 = vrot.lane.b32.xlu0 %v6841_v17, %s8827_s30 }
  0xf6   :  { %6912 = vmatprep.mubr.msk.bf16.mxu0 %vm998_vm5, %v6853_v53  ;;  %6925 = vmatprep.mubr.msk.bf16.mxu1 %vm998_vm5, %v6853_v53  ;;  %v8628_v53 = vld [vmem:[%s10125_s0 + $0x24] sm:$0xf] }
  0xf7   :  { %v246_v56 = vpop.permute.xlu1 %245  ;;  %v244_v57 = vpop.permute.xlu0 %243  ;;  %1091 = vmatmul.mubr.bf16.gmra.mxu0 %v6852_v55  ;;  %1244 = vmatmul.mubr.bf16.gmra.mxu1 %v6852_v55  ;;  %v8629_v55 = vld [vmem:[%s10125_s0 + $0x20] sm:$0xf] }
  0xf8   :  { %v454_v11 = vsel %vm436_vm1, %v8624_v10, %v246_v56  ;;  %v451_v13 = vsel %vm436_vm1, %v8625_v12, %v244_v57  ;;  %v7852_v10 = vld [vmem:[#allocation6 + $0x264] ss:$16 sps:$4 sm:$0xff]  }
  0xf9   :  { %324 = vrot.lane.b32.xlu1 %v9061_v38, %s8826_s29  ;;  %322 = vrot.lane.b32.xlu0 %v6842_v35, %s8826_s29 }
  0xfb   :  { %v297_v5 = vpop.permute.xlu1 %296  ;;  %v295_v6 = vpop.permute.xlu0 %294 }
  0xfc   :  { %v521_v14 = vsel %vm509_vm2, %v454_v11, %v297_v5  ;;  %v519_v15 = vsel %vm509_vm2, %v451_v13, %v295_v6  ;;  %v7849_v5 = vld [vmem:[#allocation6 + $0x28c] ss:$16 sps:$4 sm:$0xff]  }
  0xfd   :  { %375 = vrot.lane.b32.xlu1 %v6844_v0, %s8828_s13  ;;  %373 = vrot.lane.b32.xlu0 %v9061_v38, %s8828_s13  ;;  %v7855_v11 = vld [vmem:[#allocation6 + $0x26c] ss:$16 sps:$4 sm:$0xff]  }
  0xfe   :  { %2396 = vmatprep.subr.bf16.mxu1 %v7849_v5  ;;  %v7891_v5 = vld [vmem:[#allocation6 + $0x38c] ss:$16 sps:$4 sm:$0xff]  }
  0xff   :  { %v348_v8 = vpop.permute.xlu1 %347  ;;  %v346_v9 = vpop.permute.xlu0 %345 }
 0x100   :  { %v570_v16 = vsel %vm558_vm3, %v521_v14, %v348_v8  ;;  %v568_v17 = vsel %vm558_vm3, %v519_v15, %v346_v9  ;;  %v7844_v8 = vld [vmem:[#allocation6 + $0x280] ss:$16 sps:$4 sm:$0xff]   ;;  %v7847_v9 = vld [vmem:[#allocation6 + $0x288] ss:$16 sps:$4 sm:$0xff]  }
 0x101   :  { %426 = vrot.lane.b32.xlu1 %v6845_v7, %s8829_s14  ;;  %424 = vrot.lane.b32.xlu0 %v6844_v0, %s8829_s14  ;;  %v7850_v14 = vld [vmem:[#allocation6 + $0x260] ss:$16 sps:$4 sm:$0xff]   ;;  %v7853_v15 = vld [vmem:[#allocation6 + $0x268] ss:$16 sps:$4 sm:$0xff]  }
 0x102   :  { %2324 = vmatpush1.bf16.msra.mxu0 %v7844_v8  ;;  %2397 = vmatpush1.bf16.msra.mxu1 %v7847_v9  ;;  %v7886_v9 = vld [vmem:[#allocation6 + $0x380] ss:$16 sps:$4 sm:$0xff]  }
 0x103   :  { %v399_v18 = vpop.permute.xlu1 %398  ;;  %v397_v19 = vpop.permute.xlu0 %396  ;;  %2325 = vmatprep.subr.bf16.mxu0 %v7852_v10  ;;  %2398 = vmatprep.subr.bf16.mxu1 %v7855_v11  ;;  %v7889_v10 = vld [vmem:[#allocation6 + $0x388] ss:$16 sps:$4 sm:$0xff]  }
 0x104   :  { %v619_v20 = vsel %vm607_vm4, %v570_v16, %v399_v18  ;;  %v617_v21 = vsel %vm607_vm4, %v568_v17, %v397_v19  ;;  %v6855_v22 = vcombine.low %v397_v19, %v399_v18  ;;  %v7858_v18 = vld [vmem:[#allocation6 + $0x244] ss:$16 sps:$4 sm:$0xff]   ;;  %v7861_v19 = vld [vmem:[#allocation6 + $0x24c] ss:$16 sps:$4 sm:$0xff]  }
 0x105   :  { %v6854_v23 = vcombine.low %v617_v21, %v619_v20  ;;  %277 = vrot.lane.b32.xlu1 %v6844_v0, %s8827_s30  ;;  %275 = vrot.lane.b32.xlu0 %v9061_v38, %s8827_s30  ;;  %v7856_v20 = vld [vmem:[#allocation6 + $0x240] ss:$16 sps:$4 sm:$0xff]   ;;  %v7859_v21 = vld [vmem:[#allocation6 + $0x248] ss:$16 sps:$4 sm:$0xff]  }
 0x106   :  { %6913 = vmatprep.mubr.msk.bf16.mxu0 %vm998_vm5, %v6855_v22  ;;  %6926 = vmatprep.mubr.msk.bf16.mxu1 %vm998_vm5, %v6855_v22  ;;  %v8630_v22 = vld [vmem:[%s10125_s0 + $0x2c] sm:$0xf] }
 0x107   :  { %v250_v24 = vpop.permute.xlu1 %249  ;;  %v248_v25 = vpop.permute.xlu0 %247  ;;  %1101 = vmatmul.mubr.bf16.gmra.mxu0 %v6854_v23  ;;  %1254 = vmatmul.mubr.bf16.gmra.mxu1 %v6854_v23 }
 0x108   :  { %v460_v32 = vsel %vm436_vm1, %v8626_v31, %v250_v24  ;;  %v457_v34 = vsel %vm436_vm1, %v8627_v33, %v248_v25  ;;  %2326 = vmatpush1.bf16.msra.mxu0 %v7850_v14  ;;  %2399 = vmatpush1.bf16.msra.mxu1 %v7853_v15  ;;  %v8631_v24 = vld [vmem:[%s10125_s0 + $0x28] sm:$0xf]  ;;  %v7897_v15 = vld [vmem:[#allocation6 + $0x36c] ss:$16 sps:$4 sm:$0xff]  }
 0x109   :  { %328 = vrot.lane.b32.xlu1 %v6845_v7, %s8826_s29  ;;  %326 = vrot.lane.b32.xlu0 %v6844_v0, %s8826_s29  ;;  %v7864_v31 = vld [vmem:[#allocation6 + $0x224] ss:$16 sps:$4 sm:$0xff]  }
 0x10a   :  { %2327 = vmatprep.subr.bf16.mxu0 %v7858_v18  ;;  %2400 = vmatprep.subr.bf16.mxu1 %v7861_v19  ;;  %v7894_v14 = vld [vmem:[#allocation6 + $0x364] ss:$16 sps:$4 sm:$0xff]  }
 0x10b   :  { %v301_v27 = vpop.permute.xlu1 %300  ;;  %v299_v1 = vpop.permute.xlu0 %298 }
 0x10c   :  { %v525_v35 = vsel %vm509_vm2, %v460_v32, %v301_v27  ;;  %v523_v36 = vsel %vm509_vm2, %v457_v34, %v299_v1  ;;  %2328 = vmatpush1.bf16.msra.mxu0 %v7856_v20  ;;  %2401 = vmatpush1.bf16.msra.mxu1 %v7859_v21  ;;  %v7867_v32 = vld [vmem:[#allocation6 + $0x22c] ss:$16 sps:$4 sm:$0xff]   ;;  %v7900_v20 = vld [vmem:[#allocation6 + $0x344] ss:$16 sps:$4 sm:$0xff]  }
 0x10d   :  { %379 = vrot.lane.b32.xlu1 %v7828_v26, %s8828_s13  ;;  %377 = vrot.lane.b32.xlu0 %v6845_v7, %s8828_s13  ;;  %v7903_v21 = vld [vmem:[#allocation6 + $0x34c] ss:$16 sps:$4 sm:$0xff]  }
 0x10e   :  { %2329 = vmatprep.subr.bf16.mxu0 %v7864_v31  ;;  %2402 = vmatprep.subr.bf16.mxu1 %v7867_v32  ;;  %v8635_v31 = vld [vmem:[%s10125_s0 + $0x38] sm:$0xf] }
 0x10f   :  { %v352_v29 = vpop.permute.xlu1 %351  ;;  %v350_v30 = vpop.permute.xlu0 %349 }
 0x110   :  { %v574_v37 = vsel %vm558_vm3, %v525_v35, %v352_v29  ;;  %v572_v38 = vsel %vm558_vm3, %v523_v36, %v350_v30  ;;  %v7862_v36 = vld [vmem:[#allocation6 + $0x220] ss:$16 sps:$4 sm:$0xff]  }
 0x111   :  { %430 = vrot.lane.b32.xlu1 %v7829_v28, %s8829_s14  ;;  %428 = vrot.lane.b32.xlu0 %v7828_v26, %s8829_s14 }
 0x112   :  { %2330 = vmatpush1.bf16.msra.mxu0 %v7862_v36 }
 0x113   :  { %v403_v39 = vpop.permute.xlu1 %402  ;;  %v401_v40 = vpop.permute.xlu0 %400 }
 0x114   :  { %v623_v41 = vsel %vm607_vm4, %v574_v37, %v403_v39  ;;  %v621_v42 = vsel %vm607_vm4, %v572_v38, %v401_v40  ;;  %v6857_v43 = vcombine.low %v401_v40, %v403_v39  ;;  %v7865_v37 = vld [vmem:[#allocation6 + $0x228] ss:$16 sps:$4 sm:$0xff]  }
 0x115   :  { %v6856_v44 = vcombine.low %v621_v42, %v623_v41  ;;  %281 = vrot.lane.b32.xlu1 %v7828_v26, %s8827_s30  ;;  %279 = vrot.lane.b32.xlu0 %v6845_v7, %s8827_s30  ;;  %v7870_v41 = vld [vmem:[#allocation6 + $0x204] ss:$16 sps:$4 sm:$0xff]   ;;  %v7873_v42 = vld [vmem:[#allocation6 + $0x20c] ss:$16 sps:$4 sm:$0xff]  }
 0x116   :  { %6914 = vmatprep.mubr.msk.bf16.mxu0 %vm998_vm5, %v6857_v43  ;;  %6927 = vmatprep.mubr.msk.bf16.mxu1 %vm998_vm5, %v6857_v43  ;;  %v7868_v43 = vld [vmem:[#allocation6 + $0x200] ss:$16 sps:$4 sm:$0xff]  }
 0x117   :  { %v254_v45 = vpop.permute.xlu1 %253  ;;  %v252_v46 = vpop.permute.xlu0 %251  ;;  %1111 = vmatmul.mubr.bf16.gmra.mxu0 %v6856_v44  ;;  %1264 = vmatmul.mubr.bf16.gmra.mxu1 %v6856_v44  ;;  %v7871_v44 = vld [vmem:[#allocation6 + $0x208] ss:$16 sps:$4 sm:$0xff]  }
 0x118   :  { %v466_v54 = vsel %vm436_vm1, %v8628_v53, %v254_v45  ;;  %v463_v56 = vsel %vm436_vm1, %v8629_v55, %v252_v46  ;;  %2403 = vmatpush1.bf16.msra.mxu1 %v7865_v37  ;;  %2331 = vmatprep.subr.bf16.mxu0 %v7870_v41  ;;  %v7882_v53 = vld [vmem:[#allocation6 + $0x3a4] ss:$16 sps:$4 sm:$0xff]   ;;  %v7880_v55 = vld [vmem:[#allocation6 + $0x3a0] ss:$16 sps:$4 sm:$0xff]  }
 0x119   :  { %332 = vrot.lane.b32.xlu1 %v7829_v28, %s8826_s29  ;;  %330 = vrot.lane.b32.xlu0 %v7828_v26, %s8826_s29 }
 0x11a   :  { %2404 = vmatprep.subr.bf16.mxu1 %v7873_v42  ;;  %2332 = vmatpush1.bf16.msra.mxu0 %v7868_v43 }
 0x11b   :  { %v305_v48 = vpop.permute.xlu1 %304  ;;  %v303_v49 = vpop.permute.xlu0 %302 }
 0x11c   :  { %v529_v57 = vsel %vm509_vm2, %v466_v54, %v305_v48  ;;  %v527_v58 = vsel %vm509_vm2, %v463_v56, %v303_v49  ;;  %v7879_v48 = vld [vmem:[#allocation6 + $0x1ec] ss:$16 sps:$4 sm:$0xff]   ;;  %2405 = vmatpush1.bf16.msra.mxu1 %v7871_v44  ;;  %v7874_v49 = vld [vmem:[#allocation6 + $0x1e0] ss:$16 sps:$4 sm:$0xff]   ;;  %v7883_v56 = vld [vmem:[#allocation6 + $0x3a8] ss:$16 sps:$4 sm:$0xff]  }
 0x11d   :  { %383 = vrot.lane.b32.xlu1 %v7830_v47, %s8828_s13  ;;  %381 = vrot.lane.b32.xlu0 %v7829_v28, %s8828_s13  ;;  %v7885_v54 = vld [vmem:[#allocation6 + $0x3ac] ss:$16 sps:$4 sm:$0xff]   ;;  %v7910_v44 = vld [vmem:[#allocation6 + $0x300] ss:$16 sps:$4 sm:$0xff]  }
 0x11e   :  { %2406 = vmatprep.subr.bf16.mxu1 %v7879_v48 }
 0x11f   :  { %v356_v51 = vpop.permute.xlu1 %355  ;;  %v354_v52 = vpop.permute.xlu0 %353 }
 0x120   :  { %v578_v59 = vsel %vm558_vm3, %v529_v57, %v356_v51  ;;  %v576_v60 = vsel %vm558_vm3, %v527_v58, %v354_v52  ;;  %v8632_v57 = vld [vmem:[%s10125_s0 + $0x34] sm:$0xf] }
 0x121   :  { %434 = vrot.lane.b32.xlu1 %v7831_v50, %s8829_s14  ;;  %432 = vrot.lane.b32.xlu0 %v7830_v47, %s8829_s14  ;;  %v7876_v47 = vld [vmem:[#allocation6 + $0x1e4] ss:$16 sps:$4 sm:$0xff]   ;;  %v7877_v50 = vld [vmem:[#allocation6 + $0x1e8] ss:$16 sps:$4 sm:$0xff]  }
 0x122   :  { %2333 = vmatprep.subr.bf16.mxu0 %v7876_v47  ;;  %2407 = vmatpush1.bf16.msra.mxu1 %v7877_v50  ;;  %v7921_v50 = vld [vmem:[#allocation6 + $0x2ec] ss:$16 sps:$4 sm:$0xff]  }
 0x123   :  { %v407_v61 = vpop.permute.xlu1 %406  ;;  %v405_v62 = vpop.permute.xlu0 %404  ;;  %2334 = vmatpush1.bf16.msra.mxu0 %v7874_v49  ;;  %2410 = vmatprep.subr.bf16.mxu1 %v7885_v54  ;;  %v7918_v49 = vld [vmem:[#allocation6 + $0x2e4] ss:$16 sps:$4 sm:$0xff]  }
 0x124   :  { %v627_v63 = vsel %vm607_vm4, %v578_v59, %v407_v61  ;;  %v625_v0 = vsel %vm607_vm4, %v576_v60, %v405_v62  ;;  %v6859_v2 = vcombine.low %v405_v62, %v407_v61  ;;  %v8633_v59 = vld [vmem:[%s10125_s0 + $0x30] sm:$0xf]  ;;  %2337 = vmatprep.subr.bf16.mxu0 %v7882_v53 }
 0x125   :  { %v6858_v3 = vcombine.low %v625_v0, %v627_v63 }
 0x126   :  { %6915 = vmatprep.mubr.msk.bf16.mxu0 %vm998_vm5, %v6859_v2  ;;  %6928 = vmatprep.mubr.msk.bf16.mxu1 %vm998_vm5, %v6859_v2 }
 0x127   :  { %v258_v6 = vpop.permute.xlu1 %257  ;;  %v256_v7 = vpop.permute.xlu0 %255  ;;  %1121 = vmatmul.mubr.bf16.gmra.mxu0 %v6858_v3  ;;  %1274 = vmatmul.mubr.bf16.gmra.mxu1 %v6858_v3 }
 0x128   :  { %v472_v23 = vsel %vm436_vm1, %v8630_v22, %v258_v6  ;;  %v469_v25 = vsel %vm436_vm1, %v8631_v24, %v256_v7  ;;  %2338 = vmatpush2.bf16.msra.mxu0 %v7880_v55  ;;  %2411 = vmatpush2.bf16.msra.mxu1 %v7883_v56  ;;  %v7898_v22 = vld [vmem:[#allocation6 + $0x340] ss:$16 sps:$4 sm:$0xff]  }
 0x129   :  { %2339 = vmatprep.subr.bf16.mxu0 %v7888_v4  ;;  %2412 = vmatprep.subr.bf16.mxu1 %v7891_v5 }
 0x12b   :  { %v309_v12 = vpop.permute.xlu1 %308  ;;  %v307_v13 = vpop.permute.xlu0 %306 }
 0x12c   :  { %v533_v26 = vsel %vm509_vm2, %v472_v23, %v309_v12  ;;  %v531_v27 = vsel %vm509_vm2, %v469_v25, %v307_v13  ;;  %2340 = vmatpush2.bf16.msra.mxu0 %v7886_v9  ;;  %2413 = vmatpush2.bf16.msra.mxu1 %v7889_v10  ;;  %v7901_v23 = vld [vmem:[#allocation6 + $0x348] ss:$16 sps:$4 sm:$0xff]  }
 0x12d   :  { %2341 = vmatprep.subr.bf16.mxu0 %v7894_v14  ;;  %2414 = vmatprep.subr.bf16.mxu1 %v7897_v15  ;;  %v8638_v10 = vld [vmem:[%s10125_s0 + $0x4c] sm:$0xf] }
 0x12f   :  { %v360_v16 = vpop.permute.xlu1 %359  ;;  %v358_v17 = vpop.permute.xlu0 %357 }
 0x130   :  { %v582_v1 = vsel %vm558_vm3, %v533_v26, %v360_v16  ;;  %v580_v28 = vsel %vm558_vm3, %v531_v27, %v358_v17  ;;  %v7892_v16 = vld [vmem:[#allocation6 + $0x360] ss:$16 sps:$4 sm:$0xff]   ;;  %v7895_v17 = vld [vmem:[#allocation6 + $0x368] ss:$16 sps:$4 sm:$0xff]   ;;  %v7906_v26 = vld [vmem:[#allocation6 + $0x324] ss:$16 sps:$4 sm:$0xff]  }
 0x131   :  { %2342 = vmatpush2.bf16.msra.mxu0 %v7892_v16  ;;  %2415 = vmatpush2.bf16.msra.mxu1 %v7895_v17  ;;  %v7909_v27 = vld [vmem:[#allocation6 + $0x32c] ss:$16 sps:$4 sm:$0xff]  }
 0x132   :  { %2343 = vmatprep.subr.bf16.mxu0 %v7900_v20  ;;  %2416 = vmatprep.subr.bf16.mxu1 %v7903_v21 }
 0x133   :  { %v411_v29 = vpop.permute.xlu1 %410  ;;  %v409_v30 = vpop.permute.xlu0 %408 }
 0x134   :  { %v631_v33 = vsel %vm607_vm4, %v582_v1, %v411_v29  ;;  %v629_v34 = vsel %vm607_vm4, %v580_v28, %v409_v30  ;;  %v6861_v35 = vcombine.low %v409_v30, %v411_v29  ;;  %v7904_v1 = vld [vmem:[#allocation6 + $0x320] ss:$16 sps:$4 sm:$0xff]   ;;  %v7907_v28 = vld [vmem:[#allocation6 + $0x328] ss:$16 sps:$4 sm:$0xff]  }
 0x135   :  { %v6860_v38 = vcombine.low %v629_v34, %v631_v33  ;;  %2344 = vmatpush2.bf16.msra.mxu0 %v7898_v22  ;;  %2417 = vmatpush2.bf16.msra.mxu1 %v7901_v23  ;;  %v8634_v29 = vld [vmem:[%s10125_s0 + $0x3c] sm:$0xf] }
 0x136   :  { %6916 = vmatprep.mubr.msk.bf16.mxu0 %vm998_vm5, %v6861_v35  ;;  %6929 = vmatprep.mubr.msk.bf16.mxu1 %vm998_vm5, %v6861_v35 }
 0x137   :  { %v262_v39 = vpop.permute.xlu1 %261  ;;  %v260_v40 = vpop.permute.xlu0 %259  ;;  %1131 = vmatmul.mubr.bf16.gmra.mxu0 %v6860_v38  ;;  %1284 = vmatmul.mubr.bf16.gmra.mxu1 %v6860_v38 }
 0x138   :  { %v478_v58 = vsel %vm436_vm1, %v8632_v57, %v262_v39  ;;  %v475_v60 = vsel %vm436_vm1, %v8633_v59, %v260_v40  ;;  %2345 = vmatprep.subr.bf16.mxu0 %v7906_v26  ;;  %2418 = vmatprep.subr.bf16.mxu1 %v7909_v27  ;;  %v7912_v39 = vld [vmem:[#allocation6 + $0x304] ss:$16 sps:$4 sm:$0xff]   ;;  %v7915_v40 = vld [vmem:[#allocation6 + $0x30c] ss:$16 sps:$4 sm:$0xff]   ;;  %v8636_v57 = vld [vmem:[%s10125_s0 + $0x44] sm:$0xf] }
 0x139   :  { %2346 = vmatpush2.bf16.msra.mxu0 %v7904_v1  ;;  %2419 = vmatpush2.bf16.msra.mxu1 %v7907_v28  ;;  %v8637_v59 = vld [vmem:[%s10125_s0 + $0x40] sm:$0xf] }
 0x13a   :  { %2347 = vmatprep.subr.bf16.mxu0 %v7912_v39  ;;  %2420 = vmatprep.subr.bf16.mxu1 %v7915_v40 }
 0x13b   :  { %v313_v45 = vpop.permute.xlu1 %312  ;;  %v311_v46 = vpop.permute.xlu0 %310 }
 0x13c   :  { %v537_v61 = vsel %vm509_vm2, %v478_v58, %v313_v45  ;;  %v535_v62 = vsel %vm509_vm2, %v475_v60, %v311_v46  ;;  %v7913_v45 = vld [vmem:[#allocation6 + $0x308] ss:$16 sps:$4 sm:$0xff]  }
 0x13d   :  { %2348 = vmatpush2.bf16.msra.mxu0 %v7910_v44  ;;  %2421 = vmatpush2.bf16.msra.mxu1 %v7913_v45 }
 0x13e   :  { %2349 = vmatprep.subr.bf16.mxu0 %v7918_v49  ;;  %2422 = vmatprep.subr.bf16.mxu1 %v7921_v50  ;;  %v7924_v49 = vld [vmem:[#allocation6 + $0xe4] ss:$16 sps:$4 sm:$0xff]   ;;  %v7927_v50 = vld [vmem:[#allocation6 + $0xec] ss:$16 sps:$4 sm:$0xff]  }
 0x13f   :  { %v364_v51 = vpop.permute.xlu1 %363  ;;  %v362_v52 = vpop.permute.xlu0 %361 }
 0x140   :  { %v586_v63 = vsel %vm558_vm3, %v537_v61, %v364_v51  ;;  %v584_v0 = vsel %vm558_vm3, %v535_v62, %v362_v52  ;;  %v7916_v51 = vld [vmem:[#allocation6 + $0x2e0] ss:$16 sps:$4 sm:$0xff]   ;;  %v7919_v52 = vld [vmem:[#allocation6 + $0x2e8] ss:$16 sps:$4 sm:$0xff]  }
 0x141   :  { %2350 = vmatpush2.bf16.msra.mxu0 %v7916_v51  ;;  %2423 = vmatpush2.bf16.msra.mxu1 %v7919_v52  ;;  %v8642_v51 = vld [vmem:[%s10125_s0 + $0x5c] sm:$0xf] }
 0x142   :  { %2792 = vmatprep.subr.bf16.mxu0 %v7924_v49  ;;  %2865 = vmatprep.subr.bf16.mxu1 %v7927_v50 }
 0x143   :  { %v415_v2 = vpop.permute.xlu1 %414  ;;  %v413_v3 = vpop.permute.xlu0 %412 }
 0x144   :  { %v635_v6 = vsel %vm607_vm4, %v586_v63, %v415_v2  ;;  %v633_v7 = vsel %vm607_vm4, %v584_v0, %v413_v3  ;;  %v6863_v8 = vcombine.low %v413_v3, %v415_v2 }
 0x145   :  { %v6862_v11 = vcombine.low %v633_v7, %v635_v6 }
 0x146   :  { %6917 = vmatprep.mubr.msk.bf16.mxu0 %vm998_vm5, %v6863_v8  ;;  %6930 = vmatprep.mubr.msk.bf16.mxu1 %vm998_vm5, %v6863_v8 }
 0x147   :  { %v266_v12 = vpop.permute.xlu1 %265  ;;  %v264_v13 = vpop.permute.xlu0 %263  ;;  %1141 = vmatmul.mubr.bf16.gmra.mxu0 %v6862_v11  ;;  %1294 = vmatmul.mubr.bf16.gmra.mxu1 %v6862_v11 }
 0x148   :  { %v484_v30 = vsel %vm436_vm1, %v8634_v29, %v266_v12  ;;  %v481_v32 = vsel %vm436_vm1, %v8635_v31, %v264_v13  ;;  %v8639_v12 = vld [vmem:[%s10125_s0 + $0x48] sm:$0xf]  ;;  %v8640_v29 = vld [vmem:[%s10125_s0 + $0x54] sm:$0xf]  ;;  %v8641_v31 = vld [vmem:[%s10125_s0 + $0x50] sm:$0xf] }
 0x14b   :  { %v317_v18 = vpop.permute.xlu1 %316  ;;  %v315_v19 = vpop.permute.xlu0 %314 }
 0x14c   :  { %v541_v33 = vsel %vm509_vm2, %v484_v30, %v317_v18  ;;  %v539_v34 = vsel %vm509_vm2, %v481_v32, %v315_v19 }
 0x14f   :  { %v368_v24 = vpop.permute.xlu1 %367  ;;  %v366_v25 = vpop.permute.xlu0 %365 }
 0x150   :  { %v590_v35 = vsel %vm558_vm3, %v541_v33, %v368_v24  ;;  %v588_v36 = vsel %vm558_vm3, %v539_v34, %v366_v25 }
 0x153   :  { %v419_v37 = vpop.permute.xlu1 %418  ;;  %v417_v38 = vpop.permute.xlu0 %416 }
 0x154   :  { %v639_v41 = vsel %vm607_vm4, %v590_v35, %v419_v37  ;;  %v637_v42 = vsel %vm607_vm4, %v588_v36, %v417_v38  ;;  %v6865_v43 = vcombine.low %v417_v38, %v419_v37 }
 0x155   :  { %v6864_v46 = vcombine.low %v637_v42, %v639_v41 }
 0x156   :  { %6918 = vmatprep.mubr.msk.bf16.mxu0 %vm998_vm5, %v6865_v43  ;;  %6931 = vmatprep.mubr.msk.bf16.mxu1 %vm998_vm5, %v6865_v43 }
 0x157   :  { %v270_v47 = vpop.permute.xlu1 %269  ;;  %v268_v48 = vpop.permute.xlu0 %267  ;;  %1151 = vmatmul.mubr.bf16.gmra.mxu0 %v6864_v46  ;;  %1304 = vmatmul.mubr.bf16.gmra.mxu1 %v6864_v46 }
 0x158   :  { %v490_v58 = vsel %vm436_vm1, %v8636_v57, %v270_v47  ;;  %v487_v60 = vsel %vm436_vm1, %v8637_v59, %v268_v48 }
 0x15b   :  { %v321_v53 = vpop.permute.xlu1 %320  ;;  %v319_v54 = vpop.permute.xlu0 %318 }
 0x15c   :  { %v545_v61 = vsel %vm509_vm2, %v490_v58, %v321_v53  ;;  %v543_v62 = vsel %vm509_vm2, %v487_v60, %v319_v54  ;;  %v8643_v53 = vld [vmem:[%s10125_s0 + $0x58] sm:$0xf] }
 0x15f   :  { %v372_v55 = vpop.permute.xlu1 %371  ;;  %v370_v56 = vpop.permute.xlu0 %369 }
 0x160   :  { %v594_v63 = vsel %vm558_vm3, %v545_v61, %v372_v55  ;;  %v592_v0 = vsel %vm558_vm3, %v543_v62, %v370_v56 }
 0x163   :  { %v423_v2 = vpop.permute.xlu1 %422  ;;  %v421_v3 = vpop.permute.xlu0 %420 }
 0x164   :  { %v643_v4 = vsel %vm607_vm4, %v594_v63, %v423_v2  ;;  %v641_v5 = vsel %vm607_vm4, %v592_v0, %v421_v3  ;;  %v6867_v6 = vcombine.low %v421_v3, %v423_v2 }
 0x165   :  { %v6866_v7 = vcombine.low %v641_v5, %v643_v4 }
 0x166   :  { %6919 = vmatprep.mubr.msk.bf16.mxu0 %vm998_vm5, %v6867_v6  ;;  %6932 = vmatprep.mubr.msk.bf16.mxu1 %vm998_vm5, %v6867_v6  ;;  %v766_v6 = vlaneseq }
 0x167   :  { %v274_v8 = vpop.permute.xlu1 %273  ;;  %v272_v9 = vpop.permute.xlu0 %271  ;;  %1161 = vmatmul.mubr.bf16.gmra.mxu0 %v6866_v7  ;;  %1314 = vmatmul.mubr.bf16.gmra.mxu1 %v6866_v7 }
 0x168   :  { %v496_v11 = vsel %vm436_vm1, %v8638_v10, %v274_v8  ;;  %v493_v13 = vsel %vm436_vm1, %v8639_v12, %v272_v9  ;;  %v767_v7 = vshrl.u32 %v766_v6, 7  ;;  %v764_v10 = vld [vmem:[#allocation4] sm:$0xf] }
 0x16a   :  { %v9287_v8 = vsub.s32 0, %v767_v7  ;;  %v9289_v9 = vsub.s32 2, %v767_v7  ;;  %v9293_v12 = vsub.s32 3, %v767_v7 }
 0x16b   :  { %v325_v14 = vpop.permute.xlu1 %324  ;;  %v323_v15 = vpop.permute.xlu0 %322 }
 0x16c   :  { %v549_v16 = vsel %vm509_vm2, %v496_v11, %v325_v14  ;;  %v547_v17 = vsel %vm509_vm2, %v493_v13, %v323_v15  ;;  %v9291_v11 = vsub.s32 1, %v767_v7  ;;  %v9296_v13 = vrot.slane %v764_v10, %v9287_v8 }
 0x16d   :  { %v9299_v14 = vrot.slane %v764_v10, %v9289_v9 }
 0x16e   :  { %v9302_v15 = vrot.slane %v764_v10, %v9291_v11 }
 0x16f   :  { %v376_v18 = vpop.permute.xlu1 %375  ;;  %v374_v19 = vpop.permute.xlu0 %373 }
 0x170   :  { %v598_v20 = vsel %vm558_vm3, %v549_v16, %v376_v18  ;;  %v596_v21 = vsel %vm558_vm3, %v547_v17, %v374_v19  ;;  %v9305_v16 = vrot.slane %v764_v10, %v9293_v12 }
 0x173   :  { %v427_v22 = vpop.permute.xlu1 %426  ;;  %v425_v23 = vpop.permute.xlu0 %424 }
 0x174   :  { %v647_v24 = vsel %vm607_vm4, %v598_v20, %v427_v22  ;;  %v645_v25 = vsel %vm607_vm4, %v596_v21, %v425_v23  ;;  %v6869_v26 = vcombine.low %v425_v23, %v427_v22 }
 0x175   :  { %v6868_v27 = vcombine.low %v645_v25, %v647_v24 }
 0x176   :  { %6920 = vmatprep.mubr.msk.bf16.mxu0 %vm998_vm5, %v6869_v26  ;;  %6933 = vmatprep.mubr.msk.bf16.mxu1 %vm998_vm5, %v6869_v26 }
 0x177   :  { %1171 = vmatmul.mubr.bf16.gmra.mxu0 %v6868_v27  ;;  %1324 = vmatmul.mubr.bf16.gmra.mxu1 %v6868_v27  ;;  %v278_v1 = vpop.permute.xlu1 %277  ;;  %v276_v28 = vpop.permute.xlu0 %275 }
 0x178   :  { %v502_v30 = vsel %vm436_vm1, %v8640_v29, %v278_v1  ;;  %v499_v32 = vsel %vm436_vm1, %v8641_v31, %v276_v28 }
 0x17b   :  { %v329_v33 = vpop.permute.xlu1 %328  ;;  %v327_v34 = vpop.permute.xlu0 %326 }
 0x17c   :  { %v553_v35 = vsel %vm509_vm2, %v502_v30, %v329_v33  ;;  %v551_v36 = vsel %vm509_vm2, %v499_v32, %v327_v34 }
 0x17f   :  { %v380_v37 = vpop.permute.xlu1 %379  ;;  %v378_v38 = vpop.permute.xlu0 %377 }
 0x180   :  { %v602_v39 = vsel %vm558_vm3, %v553_v35, %v380_v37  ;;  %v600_v40 = vsel %vm558_vm3, %v551_v36, %v378_v38 }
 0x183   :  { %v431_v41 = vpop.permute.xlu1 %430  ;;  %v429_v42 = vpop.permute.xlu0 %428 }
 0x184   :  { %v651_v43 = vsel %vm607_vm4, %v602_v39, %v431_v41  ;;  %v649_v44 = vsel %vm607_vm4, %v600_v40, %v429_v42  ;;  %v6871_v45 = vcombine.low %v429_v42, %v431_v41 }
 0x185   :  { %v6870_v46 = vcombine.low %v649_v44, %v651_v43 }
 0x186   :  { %6921 = vmatprep.mubr.msk.bf16.mxu0 %vm998_vm5, %v6871_v45  ;;  %6934 = vmatprep.mubr.msk.bf16.mxu1 %vm998_vm5, %v6871_v45 }
 0x187   :  { %v282_v47 = vpop.permute.xlu1 %281  ;;  %v280_v48 = vpop.permute.xlu0 %279  ;;  %1181 = vmatmul.mubr.bf16.gmra.mxu0 %v6870_v46  ;;  %1334 = vmatmul.mubr.bf16.gmra.mxu1 %v6870_v46 }
 0x188   :  { %v508_v52 = vsel %vm436_vm1, %v8642_v51, %v282_v47  ;;  %v505_v54 = vsel %vm436_vm1, %v8643_v53, %v280_v48 }
 0x18b   :  { %v333_v55 = vpop.permute.xlu1 %332  ;;  %v331_v56 = vpop.permute.xlu0 %330 }
 0x18c   :  { %v557_v57 = vsel %vm509_vm2, %v508_v52, %v333_v55  ;;  %v555_v58 = vsel %vm509_vm2, %v505_v54, %v331_v56 }
 0x18f   :  { %v384_v59 = vpop.permute.xlu1 %383  ;;  %v382_v60 = vpop.permute.xlu0 %381 }
 0x190   :  { %v606_v61 = vsel %vm558_vm3, %v557_v57, %v384_v59  ;;  %v604_v62 = vsel %vm558_vm3, %v555_v58, %v382_v60 }
 0x193   :  { %v435_v63 = vpop.permute.xlu1 %434  ;;  %v433_v0 = vpop.permute.xlu0 %432 }
 0x194   :  { %v655_v2 = vsel %vm607_vm4, %v606_v61, %v435_v63  ;;  %v653_v3 = vsel %vm607_vm4, %v604_v62, %v433_v0  ;;  %v6873_v4 = vcombine.low %v433_v0, %v435_v63 }
 0x195   :  { %v6872_v5 = vcombine.low %v653_v3, %v655_v2 }
 0x196   :  { %6922 = vmatprep.mubr.msk.bf16.mxu0 %vm998_vm5, %v6873_v4  ;;  %6935 = vmatprep.mubr.msk.bf16.mxu1 %vm998_vm5, %v6873_v4 }
 0x197   :  { %1191 = vmatmul.mubr.bf16.gmra.mxu0 %v6872_v5  ;;  %1344 = vmatmul.mubr.bf16.gmra.mxu1 %v6872_v5 }
 0x1a7   :  { %v1082_v17 = vpop.f32.mrf.mxu0  ;;  %v1235_v18 = vpop.f32.mrf.mxu1 }
 0x1a8   :  { %v1083_v19 = vadd.f32 %v1082_v17, %v9296_v13  ;;  %v1236_v20 = vadd.f32 %v1235_v18, %v9299_v14 }
 0x1a9   :  { %v1084_v21 = vpop.f32.mrf.mxu0  ;;  %v1237_v22 = vpop.f32.mrf.mxu1 }
 0x1aa   :  { %v1085_v23 = vadd.f32 %v1084_v21, %v9302_v15  ;;  %v1238_v24 = vadd.f32 %v1237_v22, %v9305_v16  ;;  %v1354_v27 = vmax.f32 %v1083_v19, 0.0  ;;  %v1356_v1 = vmax.f32 %v1236_v20, 0.0 }
 0x1ab   :  { %v1086_v25 = vpop.f32.mrf.mxu0  ;;  %v1239_v26 = vpop.f32.mrf.mxu1 }
 0x1ac   :  { %v1355_v28 = vmax.f32 %v1085_v23, 0.0  ;;  %v1357_v29 = vmax.f32 %v1238_v24, 0.0  ;;  %v1087_v30 = vadd.f32 %v1086_v25, %v9296_v13  ;;  %v1240_v31 = vadd.f32 %v1239_v26, %v9299_v14 }
 0x1ad   :  { %v1088_v32 = vpop.f32.mrf.mxu0  ;;  %v1241_v33 = vpop.f32.mrf.mxu1 }
 0x1ae   :  { %v7627_v34 = vpack.c.bf16 %v1355_v28, %v1354_v27  ;;  %v7628_v35 = vpack.c.bf16 %v1357_v29, %v1356_v1  ;;  %v1089_v36 = vadd.f32 %v1088_v32, %v9302_v15  ;;  %v1242_v37 = vadd.f32 %v1241_v33, %v9305_v16 }
 0x1af   :  { %v1358_v39 = vmax.f32 %v1087_v30, 0.0  ;;  %v1360_v40 = vmax.f32 %v1240_v31, 0.0 }
 0x1b0   :  { %v1738_v38 = vmax.bf16 %v7628_v35, %v7627_v34  ;;  %v1359_v41 = vmax.f32 %v1089_v36, 0.0  ;;  %v1361_v42 = vmax.f32 %v1242_v37, 0.0 }
 0x1b2   :  { %v7629_v43 = vpack.c.bf16 %v1359_v41, %v1358_v39  ;;  %v7630_v44 = vpack.c.bf16 %v1361_v42, %v1360_v40  ;;  %v1767_v47 = vsel %vm9316_vm8, %v1738_v38, 4286644096 }
 0x1b4   :  { %v1739_v46 = vmax.bf16 %v7630_v44, %v7629_v43 }
 0x1b6   :  { %v1770_v48 = vsel %vm9316_vm8, %v1739_v46, 4286644096 }
 0x1b7   :  { %v1092_v49 = vpop.f32.mrf.mxu0  ;;  %v1245_v50 = vpop.f32.mrf.mxu1  ;;  %v1772_v51 = vmax.bf16 %v1770_v48, %v1767_v47 }
 0x1b8   :  { %v1093_v52 = vadd.f32 %v1092_v49, %v9296_v13  ;;  %v1246_v53 = vadd.f32 %v1245_v50, %v9299_v14 }
 0x1b9   :  { %v1094_v54 = vpop.f32.mrf.mxu0  ;;  %v1247_v55 = vpop.f32.mrf.mxu1 }
 0x1ba   :  { %v1095_v56 = vadd.f32 %v1094_v54, %v9302_v15  ;;  %v1248_v57 = vadd.f32 %v1247_v55, %v9305_v16  ;;  %v1362_v62 = vmax.f32 %v1093_v52, 0.0  ;;  %v1364_v63 = vmax.f32 %v1246_v53, 0.0 }
 0x1bb   :  { %v1096_v58 = vpop.f32.mrf.mxu0  ;;  %v1249_v59 = vpop.f32.mrf.mxu1 }
 0x1bc   :  { %v1363_v60 = vmax.f32 %v1095_v56, 0.0  ;;  %v1365_v61 = vmax.f32 %v1248_v57, 0.0  ;;  %v1097_v0 = vadd.f32 %v1096_v58, %v9296_v13  ;;  %v1250_v2 = vadd.f32 %v1249_v59, %v9299_v14 }
 0x1bd   :  { %v1098_v3 = vpop.f32.mrf.mxu0  ;;  %v1251_v4 = vpop.f32.mrf.mxu1 }
 0x1be   :  { %v7631_v5 = vpack.c.bf16 %v1363_v60, %v1362_v62  ;;  %v7632_v6 = vpack.c.bf16 %v1365_v61, %v1364_v63  ;;  %v1099_v7 = vadd.f32 %v1098_v3, %v9302_v15  ;;  %v1252_v10 = vadd.f32 %v1251_v4, %v9305_v16 }
 0x1bf   :  { %v1366_v17 = vmax.f32 %v1097_v0, 0.0  ;;  %v1368_v18 = vmax.f32 %v1250_v2, 0.0 }
 0x1c0   :  { %v1367_v19 = vmax.f32 %v1099_v7, 0.0  ;;  %v1369_v20 = vmax.f32 %v1252_v10, 0.0  ;;  %v1740_v21 = vmax.bf16 %v7632_v6, %v7631_v5 }
 0x1c2   :  { %v7633_v22 = vpack.c.bf16 %v1367_v19, %v1366_v17  ;;  %v7634_v23 = vpack.c.bf16 %v1369_v20, %v1368_v18  ;;  %v1774_v25 = vsel %vm9316_vm8, %v1740_v21, 4286644096  ;;  %v7922_v20 = vld [vmem:[#allocation6 + $0xe0] ss:$16 sps:$4 sm:$0xff]   ;;  %v7925_v21 = vld [vmem:[#allocation6 + $0xe8] ss:$16 sps:$4 sm:$0xff]  }
 0x1c4   :  { %v1741_v24 = vmax.bf16 %v7634_v23, %v7633_v22  ;;  %v7930_v22 = vld [vmem:[#allocation6 + $0xc4] ss:$16 sps:$4 sm:$0xff]  }
 0x1c6   :  { %v1777_v26 = vsel %vm9316_vm8, %v1741_v24, 4286644096 }
 0x1c7   :  { %v1102_v27 = vpop.f32.mrf.mxu0  ;;  %v1255_v1 = vpop.f32.mrf.mxu1  ;;  %v1779_v28 = vmax.bf16 %v1777_v26, %v1774_v25  ;;  %v7933_v26 = vld [vmem:[#allocation6 + $0xcc] ss:$16 sps:$4 sm:$0xff]  }
 0x1c8   :  { %v1103_v29 = vadd.f32 %v1102_v27, %v9296_v13  ;;  %v1256_v30 = vadd.f32 %v1255_v1, %v9299_v14 }
 0x1c9   :  { %v1104_v31 = vpop.f32.mrf.mxu0  ;;  %v1257_v32 = vpop.f32.mrf.mxu1  ;;  %v9340_v37 = vcombine.high %v1772_v51, %v1779_v28  ;;  %v9342_v38 = vcombine.low %v1772_v51, %v1779_v28 }
 0x1ca   :  { %v1105_v33 = vadd.f32 %v1104_v31, %v9302_v15  ;;  %v1258_v34 = vadd.f32 %v1257_v32, %v9305_v16  ;;  %v1370_v41 = vmax.f32 %v1103_v29, 0.0  ;;  %v1372_v42 = vmax.f32 %v1256_v30, 0.0 }
 0x1cb   :  { %v1106_v35 = vpop.f32.mrf.mxu0  ;;  %v1259_v36 = vpop.f32.mrf.mxu1 }
 0x1cc   :  { %v1371_v39 = vmax.f32 %v1105_v33, 0.0  ;;  %v1373_v40 = vmax.f32 %v1258_v34, 0.0  ;;  %v1107_v43 = vadd.f32 %v1106_v35, %v9296_v13  ;;  %v1260_v44 = vadd.f32 %v1259_v36, %v9299_v14  ;;  %v7928_v35 = vld [vmem:[#allocation6 + $0xc0] ss:$16 sps:$4 sm:$0xff]   ;;  %v7931_v36 = vld [vmem:[#allocation6 + $0xc8] ss:$16 sps:$4 sm:$0xff]  }
 0x1cd   :  { %v1108_v46 = vpop.f32.mrf.mxu0  ;;  %v1261_v47 = vpop.f32.mrf.mxu1 }
 0x1ce   :  { %v7635_v48 = vpack.c.bf16 %v1371_v39, %v1370_v41  ;;  %v7636_v49 = vpack.c.bf16 %v1373_v40, %v1372_v42  ;;  %v1109_v50 = vadd.f32 %v1108_v46, %v9302_v15  ;;  %v1262_v52 = vadd.f32 %v1261_v47, %v9305_v16  ;;  %v7936_v39 = vld [vmem:[#allocation6 + $0xa4] ss:$16 sps:$4 sm:$0xff]   ;;  %v7939_v40 = vld [vmem:[#allocation6 + $0xac] ss:$16 sps:$4 sm:$0xff]  }
 0x1cf   :  { %v1374_v53 = vmax.f32 %v1107_v43, 0.0  ;;  %v1376_v54 = vmax.f32 %v1260_v44, 0.0 }
 0x1d0   :  { %v1375_v51 = vmax.f32 %v1109_v50, 0.0  ;;  %v1377_v55 = vmax.f32 %v1262_v52, 0.0  ;;  %v1742_v56 = vmax.bf16 %v7636_v49, %v7635_v48  ;;  %v7934_v49 = vld [vmem:[#allocation6 + $0xa0] ss:$16 sps:$4 sm:$0xff]   ;;  %v7937_v50 = vld [vmem:[#allocation6 + $0xa8] ss:$16 sps:$4 sm:$0xff]  }
 0x1d1   :  { %v7942_v52 = vld [vmem:[#allocation6 + $0x84] ss:$16 sps:$4 sm:$0xff]  }
 0x1d2   :  { %v7637_v57 = vpack.c.bf16 %v1375_v51, %v1374_v53  ;;  %v7638_v58 = vpack.c.bf16 %v1377_v55, %v1376_v54  ;;  %v1781_v60 = vsel %vm9316_vm8, %v1742_v56, 4286644096  ;;  %v7945_v53 = vld [vmem:[#allocation6 + $0x8c] ss:$16 sps:$4 sm:$0xff]   ;;  %v7940_v51 = vld [vmem:[#allocation6 + $0x80] ss:$16 sps:$4 sm:$0xff]  }
 0x1d4   :  { %v1743_v59 = vmax.bf16 %v7638_v58, %v7637_v57 }
 0x1d6   :  { %v1784_v61 = vsel %vm9316_vm8, %v1743_v59, 4286644096  ;;  %v7943_v59 = vld [vmem:[#allocation6 + $0x88] ss:$16 sps:$4 sm:$0xff]  }
 0x1d7   :  { %v1112_v62 = vpop.f32.mrf.mxu0  ;;  %v1265_v63 = vpop.f32.mrf.mxu1  ;;  %v9352_v0 = vmax.bf16 %v1784_v61, %v1781_v60 }
 0x1d8   :  { %v1113_v2 = vadd.f32 %v1112_v62, %v9296_v13  ;;  %v1266_v3 = vadd.f32 %v1265_v63, %v9299_v14  ;;  %v7948_v62 = vld [vmem:[#allocation6 + $0x64] ss:$16 sps:$4 sm:$0xff]   ;;  %v7951_v63 = vld [vmem:[#allocation6 + $0x6c] ss:$16 sps:$4 sm:$0xff]  }
 0x1d9   :  { %v1114_v4 = vpop.f32.mrf.mxu0  ;;  %v1267_v5 = vpop.f32.mrf.mxu1  ;;  %v6985_v18 = vcombine.high %v1779_v28, %v9352_v0  ;;  %v6984_v19 = vcombine.low %v1779_v28, %v9352_v0 }
 0x1da   :  { %v1115_v6 = vadd.f32 %v1114_v4, %v9302_v15  ;;  %v1268_v7 = vadd.f32 %v1267_v5, %v9305_v16  ;;  %v1378_v23 = vmax.f32 %v1113_v2, 0.0  ;;  %v1380_v27 = vmax.f32 %v1266_v3, 0.0 }
 0x1db   :  { %v1116_v10 = vpop.f32.mrf.mxu0  ;;  %v1269_v17 = vpop.f32.mrf.mxu1  ;;  %7052 = vmatprep.mubr.msk.bf16.mxu0 %vm607_vm4, %v6985_v18  ;;  %7056 = vmatprep.mubr.msk.bf16.mxu1 %vm607_vm4, %v6985_v18  ;;  %v7949_v18 = vld [vmem:[#allocation6 + $0x68] ss:$16 sps:$4 sm:$0xff]  }
 0x1dc   :  { %v1379_v24 = vmax.f32 %v1115_v6, 0.0  ;;  %v1381_v25 = vmax.f32 %v1268_v7, 0.0  ;;  %v1117_v1 = vadd.f32 %v1116_v10, %v9296_v13  ;;  %v1270_v29 = vadd.f32 %v1269_v17, %v9299_v14  ;;  %2352 = vmatmul.mubr.bf16.vlgmr.msra.gmra.mxu0 %v6984_v19  ;;  %2425 = vmatmul.mubr.bf16.vlgmr.msra.gmra.mxu1 %v6984_v19  ;;  %v7946_v17 = vld [vmem:[#allocation6 + $0x60] ss:$16 sps:$4 sm:$0xff]   ;;  %v7954_v19 = vld [vmem:[#allocation6 + $0x44] ss:$16 sps:$4 sm:$0xff]  }
 0x1dd   :  { %v1118_v30 = vpop.f32.mrf.mxu0  ;;  %v1271_v31 = vpop.f32.mrf.mxu1  ;;  %2793 = vmatpush1.bf16.msra.mxu0 %v7922_v20  ;;  %2866 = vmatpush1.bf16.msra.mxu1 %v7925_v21 }
 0x1de   :  { %v7639_v32 = vpack.c.bf16 %v1379_v24, %v1378_v23  ;;  %v7640_v28 = vpack.c.bf16 %v1381_v25, %v1380_v27  ;;  %v1119_v33 = vadd.f32 %v1118_v30, %v9302_v15  ;;  %v1272_v34 = vadd.f32 %v1271_v31, %v9305_v16  ;;  %2794 = vmatprep.subr.bf16.mxu0 %v7930_v22  ;;  %v7957_v25 = vld [vmem:[#allocation6 + $0x4c] ss:$16 sps:$4 sm:$0xff]  }
 0x1df   :  { %2867 = vmatprep.subr.bf16.mxu1 %v7933_v26  ;;  %v1382_v41 = vmax.f32 %v1117_v1, 0.0  ;;  %v1384_v42 = vmax.f32 %v1270_v29, 0.0 }
 0x1e0   :  { %v1383_v43 = vmax.f32 %v1119_v33, 0.0  ;;  %v1385_v44 = vmax.f32 %v1272_v34, 0.0  ;;  %v1744_v46 = vmax.bf16 %v7640_v28, %v7639_v32  ;;  %v7952_v33 = vld [vmem:[#allocation6 + $0x40] ss:$16 sps:$4 sm:$0xff]   ;;  %v7955_v34 = vld [vmem:[#allocation6 + $0x48] ss:$16 sps:$4 sm:$0xff]  }
 0x1e1   :  { %2795 = vmatpush1.bf16.msra.mxu0 %v7928_v35  ;;  %2868 = vmatpush1.bf16.msra.mxu1 %v7931_v36  ;;  %v7960_v35 = vld [vmem:[#allocation6 + $0x24] ss:$16 sps:$4 sm:$0xff]   ;;  %v7963_v36 = vld [vmem:[#allocation6 + $0x2c] ss:$16 sps:$4 sm:$0xff]  }
 0x1e2   :  { %v7641_v47 = vpack.c.bf16 %v1383_v43, %v1382_v41  ;;  %v7642_v48 = vpack.c.bf16 %v1385_v44, %v1384_v42  ;;  %2796 = vmatprep.subr.bf16.mxu0 %v7936_v39  ;;  %2869 = vmatprep.subr.bf16.mxu1 %v7939_v40  ;;  %v1788_v55 = vsel %vm9316_vm8, %v1744_v46, 4286644096 }
 0x1e4   :  { %v1745_v54 = vmax.bf16 %v7642_v48, %v7641_v47  ;;  %v7958_v47 = vld [vmem:[#allocation6 + $0x20] ss:$16 sps:$4 sm:$0xff]   ;;  %v7961_v48 = vld [vmem:[#allocation6 + $0x28] ss:$16 sps:$4 sm:$0xff]  }
 0x1e5   :  { %2797 = vmatpush1.bf16.msra.mxu0 %v7934_v49  ;;  %2870 = vmatpush1.bf16.msra.mxu1 %v7937_v50  ;;  %v7966_v49 = vld [vmem:[#allocation6 + $0x4] ss:$16 sps:$4 sm:$0xff]   ;;  %v7969_v50 = vld [vmem:[#allocation6 + $0xc] ss:$16 sps:$4 sm:$0xff]  }
 0x1e6   :  { %v1791_v56 = vsel %vm9316_vm8, %v1745_v54, 4286644096  ;;  %2798 = vmatprep.subr.bf16.mxu0 %v7942_v52  ;;  %2871 = vmatprep.subr.bf16.mxu1 %v7945_v53  ;;  %v7964_v53 = vld [vmem:[#allocation6] ss:$16 sps:$4 sm:$0xff]  }
 0x1e7   :  { %v1122_v57 = vpop.f32.mrf.mxu0  ;;  %v1275_v58 = vpop.f32.mrf.mxu1  ;;  %v9370_v60 = vmax.bf16 %v1791_v56, %v1788_v55 }
 0x1e8   :  { %v1123_v61 = vadd.f32 %v1122_v57, %v9296_v13  ;;  %v1276_v2 = vadd.f32 %v1275_v58, %v9299_v14  ;;  %v7967_v57 = vld [vmem:[#allocation6 + $0x8] ss:$16 sps:$4 sm:$0xff]  }
 0x1e9   :  { %v1124_v3 = vpop.f32.mrf.mxu0  ;;  %v1277_v4 = vpop.f32.mrf.mxu1  ;;  %2799 = vmatpush1.bf16.msra.mxu0 %v7940_v51  ;;  %2872 = vmatpush1.bf16.msra.mxu1 %v7943_v59  ;;  %v9378_v20 = vcombine.high %v9352_v0, %v9370_v60  ;;  %v9382_v21 = vcombine.low %v9352_v0, %v9370_v60  ;;  %v7972_v59 = vld [vmem:[#allocation6 + $0x1c4] ss:$16 sps:$4 sm:$0xff]  }
 0x1ea   :  { %v1125_v5 = vadd.f32 %v1124_v3, %v9302_v15  ;;  %v1278_v6 = vadd.f32 %v1277_v4, %v9305_v16  ;;  %v1386_v22 = vmax.f32 %v1123_v61, 0.0  ;;  %2800 = vmatprep.subr.bf16.mxu0 %v7948_v62  ;;  %2873 = vmatprep.subr.bf16.mxu1 %v7951_v63  ;;  %v1388_v26 = vmax.f32 %v1276_v2, 0.0  ;;  %v7975_v61 = vld [vmem:[#allocation6 + $0x1cc] ss:$16 sps:$4 sm:$0xff]  }
 0x1eb   :  { %v1126_v7 = vpop.f32.mrf.mxu0  ;;  %v1279_v10 = vpop.f32.mrf.mxu1 }
 0x1ec   :  { %v1387_v23 = vmax.f32 %v1125_v5, 0.0  ;;  %v1389_v24 = vmax.f32 %v1278_v6, 0.0  ;;  %v1127_v27 = vadd.f32 %v1126_v7, %v9296_v13  ;;  %v1280_v1 = vadd.f32 %v1279_v10, %v9299_v14  ;;  %v7970_v5 = vld [vmem:[#allocation6 + $0x1c0] ss:$16 sps:$4 sm:$0xff]   ;;  %v7973_v6 = vld [vmem:[#allocation6 + $0x1c8] ss:$16 sps:$4 sm:$0xff]  }
 0x1ed   :  { %v1128_v29 = vpop.f32.mrf.mxu0  ;;  %v1281_v30 = vpop.f32.mrf.mxu1  ;;  %2801 = vmatpush1.bf16.msra.mxu0 %v7946_v17  ;;  %2874 = vmatpush1.bf16.msra.mxu1 %v7949_v18  ;;  %v7978_v10 = vld [vmem:[#allocation6 + $0x1a4] ss:$16 sps:$4 sm:$0xff]   ;;  %v7981_v17 = vld [vmem:[#allocation6 + $0x1ac] ss:$16 sps:$4 sm:$0xff]   ;;  %v7976_v18 = vld [vmem:[#allocation6 + $0x1a0] ss:$16 sps:$4 sm:$0xff]  }
 0x1ee   :  { %v7643_v31 = vpack.c.bf16 %v1387_v23, %v1386_v22  ;;  %v7644_v32 = vpack.c.bf16 %v1389_v24, %v1388_v26  ;;  %v1129_v28 = vadd.f32 %v1128_v29, %v9302_v15  ;;  %v1282_v0 = vadd.f32 %v1281_v30, %v9305_v16  ;;  %2802 = vmatprep.subr.bf16.mxu0 %v7954_v19  ;;  %v7979_v19 = vld [vmem:[#allocation6 + $0x1a8] ss:$16 sps:$4 sm:$0xff]   ;;  %v7984_v23 = vld [vmem:[#allocation6 + $0x184] ss:$16 sps:$4 sm:$0xff]   ;;  %v7987_v24 = vld [vmem:[#allocation6 + $0x18c] ss:$16 sps:$4 sm:$0xff]  }
 0x1ef   :  { %2875 = vmatprep.subr.bf16.mxu1 %v7957_v25  ;;  %v1390_v39 = vmax.f32 %v1127_v27, 0.0  ;;  %v1392_v40 = vmax.f32 %v1280_v1, 0.0  ;;  %v7982_v27 = vld [vmem:[#allocation6 + $0x180] ss:$16 sps:$4 sm:$0xff]   ;;  %v7985_v1 = vld [vmem:[#allocation6 + $0x188] ss:$16 sps:$4 sm:$0xff]  }
 0x1f0   :  { %v1391_v41 = vmax.f32 %v1129_v28, 0.0  ;;  %v1393_v42 = vmax.f32 %v1282_v0, 0.0  ;;  %v1746_v43 = vmax.bf16 %v7644_v32, %v7643_v31  ;;  %v7990_v30 = vld [vmem:[#allocation6 + $0x164] ss:$16 sps:$4 sm:$0xff]   ;;  %v7993_v31 = vld [vmem:[#allocation6 + $0x16c] ss:$16 sps:$4 sm:$0xff]  }
 0x1f1   :  { %2803 = vmatpush1.bf16.msra.mxu0 %v7952_v33  ;;  %2876 = vmatpush1.bf16.msra.mxu1 %v7955_v34 }
 0x1f2   :  { %v7645_v44 = vpack.c.bf16 %v1391_v41, %v1390_v39  ;;  %v7646_v46 = vpack.c.bf16 %v1393_v42, %v1392_v40  ;;  %2804 = vmatprep.subr.bf16.mxu0 %v7960_v35  ;;  %2877 = vmatprep.subr.bf16.mxu1 %v7963_v36  ;;  %v1795_v54 = vsel %vm9316_vm8, %v1746_v43, 4286644096  ;;  %v7988_v39 = vld [vmem:[#allocation6 + $0x160] ss:$16 sps:$4 sm:$0xff]   ;;  %v7991_v40 = vld [vmem:[#allocation6 + $0x168] ss:$16 sps:$4 sm:$0xff]  }
 0x1f4   :  { %v1747_v52 = vmax.bf16 %v7646_v46, %v7645_v44  ;;  %v7996_v44 = vld [vmem:[#allocation6 + $0x144] ss:$16 sps:$4 sm:$0xff]   ;;  %v7999_v46 = vld [vmem:[#allocation6 + $0x14c] ss:$16 sps:$4 sm:$0xff]  }
 0x1f5   :  { %2805 = vmatpush1.bf16.msra.mxu0 %v7958_v47  ;;  %2878 = vmatpush1.bf16.msra.mxu1 %v7961_v48 }
 0x1f6   :  { %v1798_v51 = vsel %vm9316_vm8, %v1747_v52, 4286644096  ;;  %2806 = vmatprep.subr.bf16.mxu0 %v7966_v49  ;;  %2879 = vmatprep.subr.bf16.mxu1 %v7969_v50 }
 0x1f7   :  { %v1132_v55 = vpop.f32.mrf.mxu0  ;;  %v1285_v56 = vpop.f32.mrf.mxu1  ;;  %v9392_v58 = vmax.bf16 %v1798_v51, %v1795_v54 }
 0x1f8   :  { %v1133_v41 = vadd.f32 %v1132_v55, %v9296_v13  ;;  %v1286_v42 = vadd.f32 %v1285_v56, %v9299_v14 }
 0x1f9   :  { %v1134_v62 = vpop.f32.mrf.mxu0  ;;  %v1287_v63 = vpop.f32.mrf.mxu1  ;;  %v9396_v3 = vcombine.high %v9370_v60, %v9392_v58  ;;  %v9400_v4 = vcombine.low %v9370_v60, %v9392_v58  ;;  %2807 = vmatpush1.bf16.msra.mxu0 %v7964_v53  ;;  %2880 = vmatpush1.bf16.msra.mxu1 %v7967_v57 }
 0x1fa   :  { %2810 = vmatprep.subr.bf16.mxu0 %v7972_v59  ;;  %2883 = vmatprep.subr.bf16.mxu1 %v7975_v61  ;;  %v1135_v28 = vadd.f32 %v1134_v62, %v9302_v15  ;;  %v1288_v0 = vadd.f32 %v1287_v63, %v9305_v16  ;;  %v7994_v62 = vld [vmem:[#allocation6 + $0x140] ss:$16 sps:$4 sm:$0xff]   ;;  %v7997_v63 = vld [vmem:[#allocation6 + $0x148] ss:$16 sps:$4 sm:$0xff]  }
 0x1fb   :  { %v1136_v2 = vpop.f32.mrf.mxu0  ;;  %v1289_v7 = vpop.f32.mrf.mxu1  ;;  %7053 = vmatprep.mubr.msk.bf16.mxu0 %vm607_vm4, %v9396_v3  ;;  %7057 = vmatprep.mubr.msk.bf16.mxu1 %vm607_vm4, %v9396_v3 }
 0x1fc   :  { %2362 = vmatmul.mubr.bf16.gmra.mxu0 %v9400_v4  ;;  %2435 = vmatmul.mubr.bf16.gmra.mxu1 %v9400_v4  ;;  %v1137_v29 = vadd.f32 %v1136_v2, %v9296_v13  ;;  %v1290_v32 = vadd.f32 %v1289_v7, %v9299_v14  ;;  %v1395_v53 = vmax.f32 %v1135_v28, 0.0  ;;  %v1397_v54 = vmax.f32 %v1288_v0, 0.0  ;;  %v8003_v28 = vld [vmem:[#allocation6 + $0x128] ss:$16 sps:$4 sm:$0xff]   ;;  %v8008_v0 = vld [vmem:[#allocation6 + $0x104] ss:$16 sps:$4 sm:$0xff]  }
 0x1fd   :  { %v1138_v60 = vpop.f32.mrf.mxu0  ;;  %2811 = vmatpush2.bf16.msra.mxu0 %v7970_v5  ;;  %2884 = vmatpush2.bf16.msra.mxu1 %v7973_v6  ;;  %v1291_v22 = vpop.f32.mrf.mxu1  ;;  %v1394_v2 = vmax.f32 %v1133_v41, 0.0  ;;  %v1396_v5 = vmax.f32 %v1286_v42, 0.0 }
 0x1fe   :  { %2812 = vmatprep.subr.bf16.mxu0 %v7978_v10  ;;  %2885 = vmatprep.subr.bf16.mxu1 %v7981_v17  ;;  %v1139_v25 = vadd.f32 %v1138_v60, %v9302_v15  ;;  %v1292_v26 = vadd.f32 %v1291_v22, %v9305_v16  ;;  %v1398_v43 = vmax.f32 %v1137_v29, 0.0  ;;  %v1400_v47 = vmax.f32 %v1290_v32, 0.0  ;;  %v8002_v10 = vld [vmem:[#allocation6 + $0x124] ss:$16 sps:$4 sm:$0xff]   ;;  %v8005_v17 = vld [vmem:[#allocation6 + $0x12c] ss:$16 sps:$4 sm:$0xff]  }
 0x1ff   :  { %v8000_v32 = vld [vmem:[#allocation6 + $0x120] ss:$16 sps:$4 sm:$0xff]  }
 0x200   :  { %v1399_v33 = vmax.f32 %v1139_v25, 0.0  ;;  %v1401_v34 = vmax.f32 %v1292_v26, 0.0  ;;  %v7647_v25 = vpack.c.bf16 %v1395_v53, %v1394_v2  ;;  %v7648_v26 = vpack.c.bf16 %v1397_v54, %v1396_v5 }
 0x201   :  { %2813 = vmatpush2.bf16.msra.mxu0 %v7976_v18  ;;  %2886 = vmatpush2.bf16.msra.mxu1 %v7979_v19 }
 0x202   :  { %2814 = vmatprep.subr.bf16.mxu0 %v7984_v23  ;;  %2887 = vmatprep.subr.bf16.mxu1 %v7987_v24  ;;  %v7649_v51 = vpack.c.bf16 %v1399_v33, %v1398_v43  ;;  %v7650_v57 = vpack.c.bf16 %v1401_v34, %v1400_v47 }
 0x204   :  { %v1749_v29 = vmax.bf16 %v7650_v57, %v7649_v51 }
 0x205   :  { %2815 = vmatpush2.bf16.msra.mxu0 %v7982_v27  ;;  %2888 = vmatpush2.bf16.msra.mxu1 %v7985_v1 }
 0x206   :  { %2816 = vmatprep.subr.bf16.mxu0 %v7990_v30  ;;  %2889 = vmatprep.subr.bf16.mxu1 %v7993_v31  ;;  %v1805_v47 = vsel %vm9316_vm8, %v1749_v29, 4286644096 }
 0x207   :  { %v1142_v35 = vpop.f32.mrf.mxu0  ;;  %v1295_v36 = vpop.f32.mrf.mxu1 }
 0x208   :  { %v1143_v48 = vadd.f32 %v1142_v35, %v9296_v13  ;;  %v1296_v49 = vadd.f32 %v1295_v36, %v9299_v14 }
 0x209   :  { %v1144_v50 = vpop.f32.mrf.mxu0  ;;  %v1297_v52 = vpop.f32.mrf.mxu1  ;;  %2817 = vmatpush2.bf16.msra.mxu0 %v7988_v39  ;;  %2890 = vmatpush2.bf16.msra.mxu1 %v7991_v40  ;;  %v8011_v39 = vld [vmem:[#allocation6 + $0x10c] ss:$16 sps:$4 sm:$0xff]   ;;  %v1748_v40 = vmax.bf16 %v7648_v26, %v7647_v25 }
 0x20a   :  { %v1145_v55 = vadd.f32 %v1144_v50, %v9302_v15  ;;  %v1298_v56 = vadd.f32 %v1297_v52, %v9305_v16  ;;  %2818 = vmatprep.subr.bf16.mxu0 %v7996_v44  ;;  %2891 = vmatprep.subr.bf16.mxu1 %v7999_v46  ;;  %v1402_v60 = vmax.f32 %v1143_v48, 0.0  ;;  %v1404_v18 = vmax.f32 %v1296_v49, 0.0  ;;  %v8006_v44 = vld [vmem:[#allocation6 + $0x100] ss:$16 sps:$4 sm:$0xff]   ;;  %v8009_v46 = vld [vmem:[#allocation6 + $0x108] ss:$16 sps:$4 sm:$0xff]  }
 0x20b   :  { %v1146_v59 = vpop.f32.mrf.mxu0  ;;  %v1299_v61 = vpop.f32.mrf.mxu1  ;;  %v8014_v49 = vld [vmem:[#allocation6 + $0x4a4] ss:$16 sps:$4 sm:$0xff]   ;;  %v8017_v50 = vld [vmem:[#allocation6 + $0x4ac] ss:$16 sps:$4 sm:$0xff]   ;;  %v1802_v52 = vsel %vm9316_vm8, %v1748_v40, 4286644096 }
 0x20c   :  { %v1147_v6 = vadd.f32 %v1146_v59, %v9296_v13  ;;  %v1300_v7 = vadd.f32 %v1299_v61, %v9299_v14  ;;  %v1403_v19 = vmax.f32 %v1145_v55, 0.0  ;;  %v1405_v22 = vmax.f32 %v1298_v56, 0.0 }
 0x20d   :  { %v1148_v23 = vpop.f32.mrf.mxu0  ;;  %v1301_v24 = vpop.f32.mrf.mxu1  ;;  %2819 = vmatpush2.bf16.msra.mxu0 %v7994_v62  ;;  %2892 = vmatpush2.bf16.msra.mxu1 %v7997_v63  ;;  %v9432_v51 = vmax.bf16 %v1805_v47, %v1802_v52 }
 0x20e   :  { %v1149_v27 = vadd.f32 %v1148_v23, %v9302_v15  ;;  %v1302_v1 = vadd.f32 %v1301_v24, %v9305_v16  ;;  %v7651_v30 = vpack.c.bf16 %v1403_v19, %v1402_v60  ;;  %v7652_v31 = vpack.c.bf16 %v1405_v22, %v1404_v18  ;;  %2820 = vmatprep.subr.bf16.mxu0 %v8002_v10 }
 0x20f   :  { %v1406_v33 = vmax.f32 %v1147_v6, 0.0  ;;  %v1408_v34 = vmax.f32 %v1300_v7, 0.0  ;;  %2893 = vmatprep.subr.bf16.mxu1 %v8005_v17 }
 0x210   :  { %v1407_v35 = vmax.f32 %v1149_v27, 0.0  ;;  %v1409_v36 = vmax.f32 %v1302_v1, 0.0  ;;  %v1750_v41 = vmax.bf16 %v7652_v31, %v7651_v30 }
 0x211   :  { %2821 = vmatpush2.bf16.msra.mxu0 %v8000_v32  ;;  %2894 = vmatpush2.bf16.msra.mxu1 %v8003_v28 }
 0x212   :  { %v7653_v42 = vpack.c.bf16 %v1407_v35, %v1406_v33  ;;  %v7654_v43 = vpack.c.bf16 %v1409_v36, %v1408_v34  ;;  %2822 = vmatprep.subr.bf16.mxu0 %v8008_v0  ;;  %2895 = vmatprep.subr.bf16.mxu1 %v8011_v39  ;;  %v1809_v53 = vsel %vm9316_vm8, %v1750_v41, 4286644096 }
 0x214   :  { %v1751_v48 = vmax.bf16 %v7654_v43, %v7653_v42 }
 0x215   :  { %2823 = vmatpush2.bf16.msra.mxu0 %v8006_v44  ;;  %2896 = vmatpush2.bf16.msra.mxu1 %v8009_v46 }
 0x216   :  { %v1812_v54 = vsel %vm9316_vm8, %v1751_v48, 4286644096  ;;  %3308 = vmatprep.subr.bf16.mxu0 %v8014_v49  ;;  %3381 = vmatprep.subr.bf16.mxu1 %v8017_v50 }
 0x217   :  { %v9434_v57 = vmax.bf16 %v1812_v54, %v1809_v53  ;;  %v1152_v55 = vpop.f32.mrf.mxu0  ;;  %v1305_v56 = vpop.f32.mrf.mxu1 }
 0x218   :  { %v1153_v27 = vadd.f32 %v1152_v55, %v9296_v13  ;;  %v1306_v1 = vadd.f32 %v1305_v56, %v9299_v14 }
 0x219   :  { %v1154_v59 = vpop.f32.mrf.mxu0  ;;  %v1307_v61 = vpop.f32.mrf.mxu1  ;;  %v9438_v62 = vcombine.high %v9432_v51, %v9434_v57  ;;  %v9442_v63 = vcombine.low %v9432_v51, %v9434_v57 }
 0x21a   :  { %v1155_v19 = vadd.f32 %v1154_v59, %v9302_v15  ;;  %v1308_v22 = vadd.f32 %v1307_v61, %v9305_v16  ;;  %v1410_v43 = vmax.f32 %v1153_v27, 0.0  ;;  %v1412_v44 = vmax.f32 %v1306_v1, 0.0 }
 0x21b   :  { %7054 = vmatprep.mubr.msk.bf16.mxu0 %vm607_vm4, %v9438_v62  ;;  %7058 = vmatprep.mubr.msk.bf16.mxu1 %vm607_vm4, %v9438_v62  ;;  %v1156_v2 = vpop.f32.mrf.mxu0  ;;  %v1309_v5 = vpop.f32.mrf.mxu1 }
 0x21c   :  { %2372 = vmatmul.mubr.bf16.gmra.mxu0 %v9442_v63  ;;  %2445 = vmatmul.mubr.bf16.gmra.mxu1 %v9442_v63  ;;  %v1157_v60 = vadd.f32 %v1156_v2, %v9296_v13  ;;  %v1310_v18 = vadd.f32 %v1309_v5, %v9299_v14  ;;  %v1411_v33 = vmax.f32 %v1155_v19, 0.0  ;;  %v1413_v34 = vmax.f32 %v1308_v22, 0.0 }
 0x21d   :  { %v1158_v6 = vpop.f32.mrf.mxu0  ;;  %v1311_v7 = vpop.f32.mrf.mxu1 }
 0x21e   :  { %v1159_v10 = vadd.f32 %v1158_v6, %v9302_v15  ;;  %v1312_v17 = vadd.f32 %v1311_v7, %v9305_v16  ;;  %v1414_v29 = vmax.f32 %v1157_v60, 0.0  ;;  %v1416_v30 = vmax.f32 %v1310_v18, 0.0 }
 0x21f   :  { %v7655_v55 = vpack.c.bf16 %v1411_v33, %v1410_v43  ;;  %v7656_v56 = vpack.c.bf16 %v1413_v34, %v1412_v44  ;;  %v8020_v33 = vld [vmem:[#allocation6 + $0x484] ss:$16 sps:$4 sm:$0xff]   ;;  %v8023_v34 = vld [vmem:[#allocation6 + $0x48c] ss:$16 sps:$4 sm:$0xff]   ;;  %v9504_v43 = vcombine.high %v9392_v58, %v9432_v51  ;;  %v8030_v44 = vld [vmem:[#allocation6 + $0x440] ss:$16 sps:$4 sm:$0xff]  }
 0x220   :  { %v1415_v23 = vmax.f32 %v1159_v10, 0.0  ;;  %v1417_v24 = vmax.f32 %v1312_v17, 0.0 }
 0x221   :  { %v1752_v18 = vmax.bf16 %v7656_v56, %v7655_v55  ;;  %v8042_v56 = vld [vmem:[#allocation6 + $0x400] ss:$16 sps:$4 sm:$0xff]  }
 0x222   :  { %v7657_v35 = vpack.c.bf16 %v1415_v23, %v1414_v29  ;;  %v7658_v36 = vpack.c.bf16 %v1417_v24, %v1416_v30 }
 0x224   :  { %v1753_v2 = vmax.bf16 %v7658_v36, %v7657_v35  ;;  %v8018_v35 = vld [vmem:[#allocation6 + $0x480] ss:$16 sps:$4 sm:$0xff]   ;;  %v8021_v36 = vld [vmem:[#allocation6 + $0x488] ss:$16 sps:$4 sm:$0xff]  }
 0x226   :  { %v1819_v24 = vsel %vm9316_vm8, %v1753_v2, 4286644096  ;;  %v8051_v2 = vld [vmem:[#allocation6 + $0x3e8] ss:$16 sps:$4 sm:$0xff]  }
 0x227   :  { %v1162_v25 = vpop.f32.mrf.mxu0  ;;  %v1315_v26 = vpop.f32.mrf.mxu1 }
 0x228   :  { %v1163_v31 = vadd.f32 %v1162_v25, %v9296_v13  ;;  %v1316_v32 = vadd.f32 %v1315_v26, %v9299_v14  ;;  %v1816_v26 = vsel %vm9316_vm8, %v1752_v18, 4286644096  ;;  %v8060_v18 = vld [vmem:[#allocation6 + $0x580] ss:$16 sps:$4 sm:$0xff]  }
 0x229   :  { %v1164_v28 = vpop.f32.mrf.mxu0  ;;  %v1317_v0 = vpop.f32.mrf.mxu1  ;;  %v9474_v29 = vmax.bf16 %v1819_v24, %v1816_v26  ;;  %v8066_v24 = vld [vmem:[#allocation6 + $0x560] ss:$16 sps:$4 sm:$0xff]   ;;  %v8074_v26 = vld [vmem:[#allocation6 + $0x544] ss:$16 sps:$4 sm:$0xff]  }
 0x22a   :  { %v1165_v39 = vadd.f32 %v1164_v28, %v9302_v15  ;;  %v1318_v40 = vadd.f32 %v1317_v0, %v9305_v16  ;;  %v1418_v48 = vmax.f32 %v1163_v31, 0.0  ;;  %v1420_v49 = vmax.f32 %v1316_v32, 0.0  ;;  %v8012_v28 = vld [vmem:[#allocation6 + $0x4a0] ss:$16 sps:$4 sm:$0xff]   ;;  %v8015_v0 = vld [vmem:[#allocation6 + $0x4a8] ss:$16 sps:$4 sm:$0xff]  }
 0x22b   :  { %v1166_v41 = vpop.f32.mrf.mxu0  ;;  %v1319_v42 = vpop.f32.mrf.mxu1  ;;  %v9518_v55 = vcombine.high %v9434_v57, %v9474_v29 }
 0x22c   :  { %v1167_v46 = vadd.f32 %v1166_v41, %v9296_v13  ;;  %v1320_v47 = vadd.f32 %v1319_v42, %v9299_v14  ;;  %v1419_v50 = vmax.f32 %v1165_v39, 0.0  ;;  %v1421_v52 = vmax.f32 %v1318_v40, 0.0  ;;  %v8026_v39 = vld [vmem:[#allocation6 + $0x464] ss:$16 sps:$4 sm:$0xff]   ;;  %v8024_v40 = vld [vmem:[#allocation6 + $0x460] ss:$16 sps:$4 sm:$0xff]  }
 0x22d   :  { %v1168_v53 = vpop.f32.mrf.mxu0  ;;  %v1321_v54 = vpop.f32.mrf.mxu1  ;;  %v8027_v41 = vld [vmem:[#allocation6 + $0x468] ss:$16 sps:$4 sm:$0xff]   ;;  %v8035_v42 = vld [vmem:[#allocation6 + $0x44c] ss:$16 sps:$4 sm:$0xff]  }
 0x22e   :  { %v1169_v59 = vadd.f32 %v1168_v53, %v9302_v15  ;;  %v1322_v61 = vadd.f32 %v1321_v54, %v9305_v16  ;;  %v7659_v5 = vpack.c.bf16 %v1419_v50, %v1418_v48  ;;  %v7660_v6 = vpack.c.bf16 %v1421_v52, %v1420_v49  ;;  %v8041_v48 = vld [vmem:[#allocation6 + $0x42c] ss:$16 sps:$4 sm:$0xff]   ;;  %v8036_v49 = vld [vmem:[#allocation6 + $0x420] ss:$16 sps:$4 sm:$0xff]   ;;  %v8039_v50 = vld [vmem:[#allocation6 + $0x428] ss:$16 sps:$4 sm:$0xff]  }
 0x22f   :  { %v1422_v7 = vmax.f32 %v1167_v46, 0.0  ;;  %v1424_v10 = vmax.f32 %v1320_v47, 0.0  ;;  %v8033_v46 = vld [vmem:[#allocation6 + $0x448] ss:$16 sps:$4 sm:$0xff]   ;;  %v8038_v47 = vld [vmem:[#allocation6 + $0x424] ss:$16 sps:$4 sm:$0xff]   ;;  %v9514_v52 = vcombine.low %v9392_v58, %v9432_v51 }
 0x230   :  { %v1423_v17 = vmax.f32 %v1169_v59, 0.0  ;;  %v1425_v60 = vmax.f32 %v1322_v61, 0.0  ;;  %v1754_v19 = vmax.bf16 %v7660_v6, %v7659_v5  ;;  %v8044_v53 = vld [vmem:[#allocation6 + $0x404] ss:$16 sps:$4 sm:$0xff]   ;;  %v8047_v54 = vld [vmem:[#allocation6 + $0x40c] ss:$16 sps:$4 sm:$0xff]   ;;  %v9528_v5 = vcombine.low %v9434_v57, %v9474_v29 }
 0x231   :  { %v8045_v59 = vld [vmem:[#allocation6 + $0x408] ss:$16 sps:$4 sm:$0xff]   ;;  %v8050_v58 = vld [vmem:[#allocation6 + $0x3e4] ss:$16 sps:$4 sm:$0xff]   ;;  %v8053_v51 = vld [vmem:[#allocation6 + $0x3ec] ss:$16 sps:$4 sm:$0xff]  }
 0x232   :  { %v7661_v22 = vpack.c.bf16 %v1423_v17, %v1422_v7  ;;  %v7662_v23 = vpack.c.bf16 %v1425_v60, %v1424_v10  ;;  %v1823_v27 = vsel %vm9316_vm8, %v1754_v19, 4286644096  ;;  %v8048_v61 = vld [vmem:[#allocation6 + $0x3e0] ss:$16 sps:$4 sm:$0xff]   ;;  %v8056_v6 = vld [vmem:[#allocation6 + $0x3c4] ss:$16 sps:$4 sm:$0xff]  }
 0x233   :  { %v8059_v7 = vld [vmem:[#allocation6 + $0x3cc] ss:$16 sps:$4 sm:$0xff]   ;;  %v8054_v10 = vld [vmem:[#allocation6 + $0x3c0] ss:$16 sps:$4 sm:$0xff]   ;;  %v8057_v17 = vld [vmem:[#allocation6 + $0x3c8] ss:$16 sps:$4 sm:$0xff]  }
 0x234   :  { %v1755_v25 = vmax.bf16 %v7662_v23, %v7661_v22  ;;  %v8062_v57 = vld [vmem:[#allocation6 + $0x584] ss:$16 sps:$4 sm:$0xff]   ;;  %v8065_v60 = vld [vmem:[#allocation6 + $0x58c] ss:$16 sps:$4 sm:$0xff]   ;;  %v8063_v19 = vld [vmem:[#allocation6 + $0x588] ss:$16 sps:$4 sm:$0xff]  }
 0x235   :  { %v8068_v22 = vld [vmem:[#allocation6 + $0x564] ss:$16 sps:$4 sm:$0xff]   ;;  %v8071_v23 = vld [vmem:[#allocation6 + $0x56c] ss:$16 sps:$4 sm:$0xff]  }
 0x236   :  { %v1826_v1 = vsel %vm9316_vm8, %v1755_v25, 4286644096  ;;  %v8069_v25 = vld [vmem:[#allocation6 + $0x568] ss:$16 sps:$4 sm:$0xff]  }
 0x237   :  { %v9476_v30 = vmax.bf16 %v1826_v1, %v1823_v27  ;;  %v1172_v27 = vpop.f32.mrf.mxu0  ;;  %v1325_v1 = vpop.f32.mrf.mxu1 }
 0x239   :  { %v9480_v31 = vcombine.high %v9474_v29, %v9476_v30  ;;  %v9484_v32 = vcombine.low %v9474_v29, %v9476_v30  ;;  %v8072_v29 = vld [vmem:[#allocation6 + $0x540] ss:$16 sps:$4 sm:$0xff]  }
 0x23b   :  { %7055 = vmatprep.mubr.msk.bf16.mxu0 %vm607_vm4, %v9480_v31  ;;  %7059 = vmatprep.mubr.msk.bf16.mxu1 %vm607_vm4, %v9480_v31 }
 0x23c   :  { %2382 = vmatmul.mubr.bf16.gmra.mxu0 %v9484_v32  ;;  %2455 = vmatmul.mubr.bf16.gmra.mxu1 %v9484_v32 }
 0x23d   :  { %7128 = vmatprep.mubr.msk.bf16.mxu0 %vm607_vm4, %v9340_v37  ;;  %7132 = vmatprep.mubr.msk.bf16.mxu1 %vm607_vm4, %v9340_v37  ;;  %v8029_v37 = vld [vmem:[#allocation6 + $0x46c] ss:$16 sps:$4 sm:$0xff]  }
 0x244   :  { %2825 = vmatmul.mubr.bf16.vlgmr.msra.gmra.mxu0 %v9342_v38  ;;  %2898 = vmatmul.mubr.bf16.vlgmr.msra.gmra.mxu1 %v9342_v38  ;;  %v8032_v38 = vld [vmem:[#allocation6 + $0x444] ss:$16 sps:$4 sm:$0xff]  }
 0x245   :  { %3309 = vmatpush1.bf16.msra.mxu0 %v8012_v28  ;;  %3382 = vmatpush1.bf16.msra.mxu1 %v8015_v0  ;;  %v8075_v28 = vld [vmem:[#allocation6 + $0x548] ss:$16 sps:$4 sm:$0xff]   ;;  %v8080_v0 = vld [vmem:[#allocation6 + $0x524] ss:$16 sps:$4 sm:$0xff]  }
 0x246   :  { %7129 = vmatprep.mubr.msk.bf16.mxu0 %vm607_vm4, %v9378_v20  ;;  %7133 = vmatprep.mubr.msk.bf16.mxu1 %vm607_vm4, %v9378_v20 }
 0x247   :  { %3310 = vmatprep.subr.bf16.mxu0 %v8020_v33  ;;  %3383 = vmatprep.subr.bf16.mxu1 %v8023_v34  ;;  %v8083_v33 = vld [vmem:[#allocation6 + $0x52c] ss:$16 sps:$4 sm:$0xff]   ;;  %v1174_v34 = vpop.f32.mrf.mxu0 }
 0x249   :  { %3311 = vmatpush1.bf16.msra.mxu0 %v8018_v35  ;;  %3384 = vmatpush1.bf16.msra.mxu1 %v8021_v36  ;;  %v1327_v35 = vpop.f32.mrf.mxu1  ;;  %v8078_v36 = vld [vmem:[#allocation6 + $0x520] ss:$16 sps:$4 sm:$0xff]  }
 0x24a   :  { %3312 = vmatprep.subr.bf16.mxu0 %v8026_v39  ;;  %3385 = vmatprep.subr.bf16.mxu1 %v8029_v37  ;;  %v8081_v39 = vld [vmem:[#allocation6 + $0x528] ss:$16 sps:$4 sm:$0xff]   ;;  %v8086_v37 = vld [vmem:[#allocation6 + $0x504] ss:$16 sps:$4 sm:$0xff]  }
 0x24c   :  { %2835 = vmatmul.mubr.bf16.gmra.mxu0 %v9382_v21  ;;  %2908 = vmatmul.mubr.bf16.gmra.mxu1 %v9382_v21 }
 0x24d   :  { %3313 = vmatpush1.bf16.msra.mxu0 %v8024_v40  ;;  %3386 = vmatpush1.bf16.msra.mxu1 %v8027_v41  ;;  %v8089_v40 = vld [vmem:[#allocation6 + $0x50c] ss:$16 sps:$4 sm:$0xff]   ;;  %v1176_v41 = vpop.f32.mrf.mxu0 }
 0x24e   :  { %7130 = vmatprep.mubr.msk.bf16.mxu0 %vm607_vm4, %v9504_v43  ;;  %7134 = vmatprep.mubr.msk.bf16.mxu1 %vm607_vm4, %v9504_v43 }
 0x24f   :  { %3314 = vmatprep.subr.bf16.mxu0 %v8032_v38  ;;  %3387 = vmatprep.subr.bf16.mxu1 %v8035_v42  ;;  %v1329_v38 = vpop.f32.mrf.mxu1  ;;  %v8084_v42 = vld [vmem:[#allocation6 + $0x500] ss:$16 sps:$4 sm:$0xff]  }
 0x251   :  { %3315 = vmatpush1.bf16.msra.mxu0 %v8030_v44  ;;  %3388 = vmatpush1.bf16.msra.mxu1 %v8033_v46  ;;  %v8087_v44 = vld [vmem:[#allocation6 + $0x508] ss:$16 sps:$4 sm:$0xff]   ;;  %v8092_v46 = vld [vmem:[#allocation6 + $0x4e4] ss:$16 sps:$4 sm:$0xff]  }
 0x252   :  { %3316 = vmatprep.subr.bf16.mxu0 %v8038_v47  ;;  %3389 = vmatprep.subr.bf16.mxu1 %v8041_v48  ;;  %v8095_v47 = vld [vmem:[#allocation6 + $0x4ec] ss:$16 sps:$4 sm:$0xff]   ;;  %v1178_v48 = vpop.f32.mrf.mxu0 }
 0x254   :  { %2845 = vmatmul.mubr.bf16.gmra.mxu0 %v9514_v52  ;;  %2918 = vmatmul.mubr.bf16.gmra.mxu1 %v9514_v52 }
 0x255   :  { %3317 = vmatpush1.bf16.msra.mxu0 %v8036_v49  ;;  %3390 = vmatpush1.bf16.msra.mxu1 %v8039_v50  ;;  %v1331_v49 = vpop.f32.mrf.mxu1  ;;  %v8090_v50 = vld [vmem:[#allocation6 + $0x4e0] ss:$16 sps:$4 sm:$0xff]  }
 0x256   :  { %7131 = vmatprep.mubr.msk.bf16.mxu0 %vm607_vm4, %v9518_v55  ;;  %7135 = vmatprep.mubr.msk.bf16.mxu1 %vm607_vm4, %v9518_v55 }
 0x257   :  { %3318 = vmatprep.subr.bf16.mxu0 %v8044_v53  ;;  %3391 = vmatprep.subr.bf16.mxu1 %v8047_v54  ;;  %v8093_v53 = vld [vmem:[#allocation6 + $0x4e8] ss:$16 sps:$4 sm:$0xff]   ;;  %v8098_v54 = vld [vmem:[#allocation6 + $0x4c4] ss:$16 sps:$4 sm:$0xff]  }
 0x259   :  { %3319 = vmatpush1.bf16.msra.mxu0 %v8042_v56  ;;  %3392 = vmatpush1.bf16.msra.mxu1 %v8045_v59  ;;  %v8101_v56 = vld [vmem:[#allocation6 + $0x4cc] ss:$16 sps:$4 sm:$0xff]   ;;  %v1173_v59 = vadd.f32 %v1172_v27, %v9296_v13 }
 0x25a   :  { %3320 = vmatprep.subr.bf16.mxu0 %v8050_v58  ;;  %3393 = vmatprep.subr.bf16.mxu1 %v8053_v51  ;;  %v1326_v58 = vadd.f32 %v1325_v1, %v9299_v14  ;;  %v1175_v51 = vadd.f32 %v1174_v34, %v9302_v15  ;;  %v8102_v1 = vld [vmem:[#allocation6 + $0x680] ss:$16 sps:$4 sm:$0xff]  }
 0x25c   :  { %2855 = vmatmul.mubr.bf16.gmra.mxu0 %v9528_v5  ;;  %2928 = vmatmul.mubr.bf16.gmra.mxu1 %v9528_v5 }
 0x25d   :  { %3321 = vmatpush1.bf16.msra.mxu0 %v8048_v61  ;;  %3394 = vmatpush1.bf16.msra.mxu1 %v8051_v2  ;;  %v1328_v61 = vadd.f32 %v1327_v35, %v9305_v16  ;;  %v1177_v2 = vadd.f32 %v1176_v41, %v9296_v13  ;;  %v8119_v41 = vld [vmem:[#allocation6 + $0x64c] ss:$16 sps:$4 sm:$0xff]  }
 0x25e   :  { %7198 = vmatprep.mubr.msk.bf16.mxu0 %vm607_vm4, %v9378_v20  ;;  %7202 = vmatprep.mubr.msk.bf16.mxu1 %vm607_vm4, %v9378_v20  ;;  %v8077_v20 = vld [vmem:[#allocation6 + $0x54c] ss:$16 sps:$4 sm:$0xff]  }
 0x25f   :  { %3322 = vmatprep.subr.bf16.mxu0 %v8056_v6  ;;  %3395 = vmatprep.subr.bf16.mxu1 %v8059_v7  ;;  %v1330_v6 = vadd.f32 %v1329_v38, %v9299_v14  ;;  %v1179_v7 = vadd.f32 %v1178_v48, %v9302_v15 }
 0x261   :  { %3323 = vmatpush1.bf16.msra.mxu0 %v8054_v10  ;;  %3396 = vmatpush1.bf16.msra.mxu1 %v8057_v17  ;;  %v1332_v10 = vadd.f32 %v1331_v49, %v9305_v16  ;;  %v8096_v17 = vld [vmem:[#allocation6 + $0x4c0] ss:$16 sps:$4 sm:$0xff]  }
 0x262   :  { %3326 = vmatprep.subr.bf16.mxu0 %v8062_v57  ;;  %3399 = vmatprep.subr.bf16.mxu1 %v8065_v60  ;;  %v8099_v57 = vld [vmem:[#allocation6 + $0x4c8] ss:$16 sps:$4 sm:$0xff]   ;;  %v8104_v60 = vld [vmem:[#allocation6 + $0x684] ss:$16 sps:$4 sm:$0xff]  }
 0x263   :  { %v1433_v27 = vmax.f32 %v1332_v10, 0.0  ;;  %v8135_v10 = vld [vmem:[#allocation6 + $0x5e8] ss:$16 sps:$4 sm:$0xff]  }
 0x265   :  { %3327 = vmatpush2.bf16.msra.mxu0 %v8060_v18  ;;  %3400 = vmatpush2.bf16.msra.mxu1 %v8063_v19  ;;  %v8107_v18 = vld [vmem:[#allocation6 + $0x68c] ss:$16 sps:$4 sm:$0xff]   ;;  %v1426_v19 = vmax.f32 %v1173_v59, 0.0 }
 0x266   :  { %3328 = vmatprep.subr.bf16.mxu0 %v8068_v22  ;;  %3401 = vmatprep.subr.bf16.mxu1 %v8071_v23  ;;  %v1428_v22 = vmax.f32 %v1326_v58, 0.0  ;;  %v1427_v23 = vmax.f32 %v1175_v51, 0.0  ;;  %v8131_v59 = vld [vmem:[#allocation6 + $0x60c] ss:$16 sps:$4 sm:$0xff]   ;;  %v8126_v58 = vld [vmem:[#allocation6 + $0x600] ss:$16 sps:$4 sm:$0xff]  }
 0x267   :  { %v8129_v51 = vld [vmem:[#allocation6 + $0x608] ss:$16 sps:$4 sm:$0xff]  }
 0x269   :  { %3329 = vmatpush2.bf16.msra.mxu0 %v8066_v24  ;;  %3402 = vmatpush2.bf16.msra.mxu1 %v8069_v25  ;;  %v1429_v24 = vmax.f32 %v1328_v61, 0.0  ;;  %v1430_v25 = vmax.f32 %v1177_v2, 0.0  ;;  %v8134_v2 = vld [vmem:[#allocation6 + $0x5e4] ss:$16 sps:$4 sm:$0xff]  }
 0x26a   :  { %3330 = vmatprep.subr.bf16.mxu0 %v8074_v26  ;;  %3403 = vmatprep.subr.bf16.mxu1 %v8077_v20  ;;  %v1432_v26 = vmax.f32 %v1330_v6, 0.0  ;;  %v1431_v20 = vmax.f32 %v1179_v7, 0.0  ;;  %v8137_v6 = vld [vmem:[#allocation6 + $0x5ec] ss:$16 sps:$4 sm:$0xff]   ;;  %v8132_v7 = vld [vmem:[#allocation6 + $0x5e0] ss:$16 sps:$4 sm:$0xff]  }
 0x26b   :  { %v7664_v34 = vpack.c.bf16 %v1429_v24, %v1428_v22  ;;  %v8146_v22 = vld [vmem:[#allocation6 + $0x5a4] ss:$16 sps:$4 sm:$0xff]   ;;  %v8147_v24 = vld [vmem:[#allocation6 + $0x5a8] ss:$16 sps:$4 sm:$0xff]  }
 0x26c   :  { %v7665_v35 = vpack.c.bf16 %v1431_v20, %v1430_v25  ;;  %v8152_v25 = vld [vmem:[#allocation6 + $0x764] ss:$16 sps:$4 sm:$0xff]   ;;  %v8150_v20 = vld [vmem:[#allocation6 + $0x760] ss:$16 sps:$4 sm:$0xff]  }
 0x26d   :  { %3331 = vmatpush2.bf16.msra.mxu0 %v8072_v29  ;;  %3404 = vmatpush2.bf16.msra.mxu1 %v8075_v28  ;;  %v8105_v29 = vld [vmem:[#allocation6 + $0x688] ss:$16 sps:$4 sm:$0xff]   ;;  %v7663_v28 = vpack.c.bf16 %v1427_v23, %v1426_v19  ;;  %v8149_v23 = vld [vmem:[#allocation6 + $0x5ac] ss:$16 sps:$4 sm:$0xff]  }
 0x26e   :  { %3332 = vmatprep.subr.bf16.mxu0 %v8080_v0  ;;  %3405 = vmatprep.subr.bf16.mxu1 %v8083_v33  ;;  %v8110_v0 = vld [vmem:[#allocation6 + $0x664] ss:$16 sps:$4 sm:$0xff]   ;;  %v8113_v33 = vld [vmem:[#allocation6 + $0x66c] ss:$16 sps:$4 sm:$0xff]   ;;  %v8141_v19 = vld [vmem:[#allocation6 + $0x5c8] ss:$16 sps:$4 sm:$0xff]  }
 0x26f   :  { %v1756_v38 = vmax.bf16 %v7664_v34, %v7663_v28  ;;  %v8156_v28 = vld [vmem:[#allocation6 + $0x740] ss:$16 sps:$4 sm:$0xff]  }
 0x270   :  { %v8162_v34 = vld [vmem:[#allocation6 + $0x720] ss:$16 sps:$4 sm:$0xff]  }
 0x271   :  { %3333 = vmatpush2.bf16.msra.mxu0 %v8078_v36  ;;  %3406 = vmatpush2.bf16.msra.mxu1 %v8081_v39  ;;  %v7666_v36 = vpack.c.bf16 %v1433_v27, %v1432_v26  ;;  %v8108_v39 = vld [vmem:[#allocation6 + $0x660] ss:$16 sps:$4 sm:$0xff]   ;;  %v1830_v48 = vsel %vm9316_vm8, %v1756_v38, 4286644096  ;;  %v8155_v26 = vld [vmem:[#allocation6 + $0x76c] ss:$16 sps:$4 sm:$0xff]  }
 0x272   :  { %3334 = vmatprep.subr.bf16.mxu0 %v8086_v37  ;;  %3407 = vmatprep.subr.bf16.mxu1 %v8089_v40  ;;  %v8111_v37 = vld [vmem:[#allocation6 + $0x668] ss:$16 sps:$4 sm:$0xff]   ;;  %v8116_v40 = vld [vmem:[#allocation6 + $0x644] ss:$16 sps:$4 sm:$0xff]  }
 0x273   :  { %v8153_v27 = vld [vmem:[#allocation6 + $0x768] ss:$16 sps:$4 sm:$0xff]  }
 0x274   :  { %v8171_v38 = vld [vmem:[#allocation6 + $0x708] ss:$16 sps:$4 sm:$0xff]  }
 0x275   :  { %3335 = vmatpush2.bf16.msra.mxu0 %v8084_v42  ;;  %3408 = vmatpush2.bf16.msra.mxu1 %v8087_v44  ;;  %v1757_v42 = vmax.bf16 %v7666_v36, %v7665_v35  ;;  %v8114_v44 = vld [vmem:[#allocation6 + $0x640] ss:$16 sps:$4 sm:$0xff]   ;;  %v8165_v35 = vld [vmem:[#allocation6 + $0x728] ss:$16 sps:$4 sm:$0xff]   ;;  %v8170_v36 = vld [vmem:[#allocation6 + $0x704] ss:$16 sps:$4 sm:$0xff]  }
 0x276   :  { %3336 = vmatprep.subr.bf16.mxu0 %v8092_v46  ;;  %3409 = vmatprep.subr.bf16.mxu1 %v8095_v47  ;;  %v8122_v46 = vld [vmem:[#allocation6 + $0x624] ss:$16 sps:$4 sm:$0xff]   ;;  %v8125_v47 = vld [vmem:[#allocation6 + $0x62c] ss:$16 sps:$4 sm:$0xff]  }
 0x277   :  { %v1833_v49 = vsel %vm9316_vm8, %v1757_v42, 4286644096  ;;  %v8176_v42 = vld [vmem:[#allocation6 + $0x6e4] ss:$16 sps:$4 sm:$0xff]  }
 0x279   :  { %3337 = vmatpush2.bf16.msra.mxu0 %v8090_v50  ;;  %3410 = vmatpush2.bf16.msra.mxu1 %v8093_v53  ;;  %v8120_v50 = vld [vmem:[#allocation6 + $0x620] ss:$16 sps:$4 sm:$0xff]   ;;  %v8123_v53 = vld [vmem:[#allocation6 + $0x628] ss:$16 sps:$4 sm:$0xff]  }
 0x27a   :  { %3338 = vmatprep.subr.bf16.mxu0 %v8098_v54  ;;  %3411 = vmatprep.subr.bf16.mxu1 %v8101_v56  ;;  %v9560_v54 = vmax.bf16 %v1833_v49, %v1830_v48  ;;  %v8128_v56 = vld [vmem:[#allocation6 + $0x604] ss:$16 sps:$4 sm:$0xff]   ;;  %v8177_v48 = vld [vmem:[#allocation6 + $0x6e8] ss:$16 sps:$4 sm:$0xff]  }
 0x27b   :  { %v8182_v49 = vld [vmem:[#allocation6 + $0x6c4] ss:$16 sps:$4 sm:$0xff]  }
 0x27c   :  { %v9564_v61 = vcombine.high %v9476_v30, %v9560_v54 }
 0x27d   :  { %3339 = vmatpush2.bf16.msra.mxu0 %v8096_v17  ;;  %3412 = vmatpush2.bf16.msra.mxu1 %v8099_v57  ;;  %v8140_v17 = vld [vmem:[#allocation6 + $0x5c4] ss:$16 sps:$4 sm:$0xff]   ;;  %v8143_v57 = vld [vmem:[#allocation6 + $0x5cc] ss:$16 sps:$4 sm:$0xff]  }
 0x27e   :  { %3856 = vmatprep.subr.bf16.mxu0 %v8104_v60  ;;  %3929 = vmatprep.subr.bf16.mxu1 %v8107_v18  ;;  %v9574_v60 = vcombine.low %v9476_v30, %v9560_v54  ;;  %v8138_v18 = vld [vmem:[#allocation6 + $0x5c0] ss:$16 sps:$4 sm:$0xff]  }
 0x27f   :  { %v8144_v30 = vld [vmem:[#allocation6 + $0x5a0] ss:$16 sps:$4 sm:$0xff]  }
 0x280   :  { %3341 = vmatmul.mubr.bf16.vlgmr.msra.gmra.mxu0 %v9382_v21  ;;  %3414 = vmatmul.mubr.bf16.vlgmr.msra.gmra.mxu1 %v9382_v21  ;;  %v8117_v21 = vld [vmem:[#allocation6 + $0x648] ss:$16 sps:$4 sm:$0xff]  }
 0x281   :  { %7199 = vmatprep.mubr.msk.bf16.mxu0 %vm607_vm4, %v9504_v43  ;;  %7203 = vmatprep.mubr.msk.bf16.mxu1 %vm607_vm4, %v9504_v43 }
 0x282   :  { %3857 = vmatpush1.bf16.msra.mxu0 %v8102_v1  ;;  %3930 = vmatpush1.bf16.msra.mxu1 %v8105_v29  ;;  %v8158_v1 = vld [vmem:[#allocation6 + $0x744] ss:$16 sps:$4 sm:$0xff]   ;;  %v8161_v29 = vld [vmem:[#allocation6 + $0x74c] ss:$16 sps:$4 sm:$0xff]  }
 0x283   :  { %3858 = vmatprep.subr.bf16.mxu0 %v8110_v0  ;;  %3931 = vmatprep.subr.bf16.mxu1 %v8113_v33  ;;  %v8164_v0 = vld [vmem:[#allocation6 + $0x724] ss:$16 sps:$4 sm:$0xff]   ;;  %v8167_v33 = vld [vmem:[#allocation6 + $0x72c] ss:$16 sps:$4 sm:$0xff]  }
 0x286   :  { %3859 = vmatpush1.bf16.msra.mxu0 %v8108_v39  ;;  %3932 = vmatpush1.bf16.msra.mxu1 %v8111_v37  ;;  %v8173_v39 = vld [vmem:[#allocation6 + $0x70c] ss:$16 sps:$4 sm:$0xff]   ;;  %v1182_v37 = vpop.f32.mrf.mxu0 }
 0x287   :  { %3860 = vmatprep.subr.bf16.mxu0 %v8116_v40  ;;  %3933 = vmatprep.subr.bf16.mxu1 %v8119_v41  ;;  %v1335_v40 = vpop.f32.mrf.mxu1  ;;  %v8168_v41 = vld [vmem:[#allocation6 + $0x700] ss:$16 sps:$4 sm:$0xff]  }
 0x288   :  { %3351 = vmatmul.mubr.bf16.gmra.mxu0 %v9514_v52  ;;  %3424 = vmatmul.mubr.bf16.gmra.mxu1 %v9514_v52 }
 0x289   :  { %7200 = vmatprep.mubr.msk.bf16.mxu0 %vm607_vm4, %v9518_v55  ;;  %7204 = vmatprep.mubr.msk.bf16.mxu1 %vm607_vm4, %v9518_v55 }
 0x28a   :  { %3861 = vmatpush1.bf16.msra.mxu0 %v8114_v44  ;;  %3934 = vmatpush1.bf16.msra.mxu1 %v8117_v21  ;;  %v8179_v44 = vld [vmem:[#allocation6 + $0x6ec] ss:$16 sps:$4 sm:$0xff]   ;;  %v1184_v21 = vpop.f32.mrf.mxu0 }
 0x28b   :  { %3862 = vmatprep.subr.bf16.mxu0 %v8122_v46  ;;  %3935 = vmatprep.subr.bf16.mxu1 %v8125_v47  ;;  %v1337_v46 = vpop.f32.mrf.mxu1  ;;  %v8174_v47 = vld [vmem:[#allocation6 + $0x6e0] ss:$16 sps:$4 sm:$0xff]  }
 0x28e   :  { %3863 = vmatpush1.bf16.msra.mxu0 %v8120_v50  ;;  %3936 = vmatpush1.bf16.msra.mxu1 %v8123_v53  ;;  %v8185_v50 = vld [vmem:[#allocation6 + $0x6cc] ss:$16 sps:$4 sm:$0xff]   ;;  %v1186_v53 = vpop.f32.mrf.mxu0 }
 0x28f   :  { %3864 = vmatprep.subr.bf16.mxu0 %v8128_v56  ;;  %3937 = vmatprep.subr.bf16.mxu1 %v8131_v59  ;;  %v1339_v56 = vpop.f32.mrf.mxu1  ;;  %v8180_v59 = vld [vmem:[#allocation6 + $0x6c0] ss:$16 sps:$4 sm:$0xff]  }
 0x290   :  { %3361 = vmatmul.mubr.bf16.gmra.mxu0 %v9528_v5  ;;  %3434 = vmatmul.mubr.bf16.gmra.mxu1 %v9528_v5 }
 0x291   :  { %7201 = vmatprep.mubr.msk.bf16.mxu0 %vm607_vm4, %v9564_v61  ;;  %7205 = vmatprep.mubr.msk.bf16.mxu1 %vm607_vm4, %v9564_v61 }
 0x292   :  { %3865 = vmatpush1.bf16.msra.mxu0 %v8126_v58  ;;  %3938 = vmatpush1.bf16.msra.mxu1 %v8129_v51  ;;  %v8183_v58 = vld [vmem:[#allocation6 + $0x6c8] ss:$16 sps:$4 sm:$0xff]   ;;  %v8188_v51 = vld [vmem:[#allocation6 + $0x6a4] ss:$16 sps:$4 sm:$0xff]  }
 0x293   :  { %3866 = vmatprep.subr.bf16.mxu0 %v8134_v2  ;;  %3939 = vmatprep.subr.bf16.mxu1 %v8137_v6  ;;  %v8191_v2 = vld [vmem:[#allocation6 + $0x6ac] ss:$16 sps:$4 sm:$0xff]   ;;  %v1183_v6 = vadd.f32 %v1182_v37, %v9296_v13  ;;  %v8200_v37 = vld [vmem:[#allocation6 + $0x844] ss:$16 sps:$4 sm:$0xff]  }
 0x296   :  { %3867 = vmatpush1.bf16.msra.mxu0 %v8132_v7  ;;  %3940 = vmatpush1.bf16.msra.mxu1 %v8135_v10  ;;  %v1336_v7 = vadd.f32 %v1335_v40, %v9299_v14  ;;  %v1185_v10 = vadd.f32 %v1184_v21, %v9302_v15  ;;  %v8203_v40 = vld [vmem:[#allocation6 + $0x84c] ss:$16 sps:$4 sm:$0xff]   ;;  %v8201_v21 = vld [vmem:[#allocation6 + $0x848] ss:$16 sps:$4 sm:$0xff]  }
 0x297   :  { %3868 = vmatprep.subr.bf16.mxu0 %v8140_v17  ;;  %3941 = vmatprep.subr.bf16.mxu1 %v8143_v57  ;;  %v1338_v17 = vadd.f32 %v1337_v46, %v9305_v16  ;;  %v1188_v57 = vpop.f32.mrf.mxu0  ;;  %v8206_v46 = vld [vmem:[#allocation6 + $0x824] ss:$16 sps:$4 sm:$0xff]  }
 0x298   :  { %3371 = vmatmul.mubr.bf16.gmra.mxu0 %v9574_v60  ;;  %3444 = vmatmul.mubr.bf16.gmra.mxu1 %v9574_v60 }
 0x299   :  { %7268 = vmatprep.mubr.msk.bf16.mxu0 %vm607_vm4, %v9396_v3  ;;  %7272 = vmatprep.mubr.msk.bf16.mxu1 %vm607_vm4, %v9396_v3  ;;  %v8159_v3 = vld [vmem:[#allocation6 + $0x748] ss:$16 sps:$4 sm:$0xff]  }
 0x29a   :  { %3869 = vmatpush1.bf16.msra.mxu0 %v8138_v18  ;;  %3942 = vmatpush1.bf16.msra.mxu1 %v8141_v19  ;;  %v1341_v18 = vpop.f32.mrf.mxu1  ;;  %v1187_v19 = vadd.f32 %v1186_v53, %v9296_v13 }
 0x29b   :  { %3870 = vmatprep.subr.bf16.mxu0 %v8146_v22  ;;  %3943 = vmatprep.subr.bf16.mxu1 %v8149_v23  ;;  %v1340_v22 = vadd.f32 %v1339_v56, %v9299_v14  ;;  %v1189_v23 = vadd.f32 %v1188_v57, %v9302_v15  ;;  %v8207_v56 = vld [vmem:[#allocation6 + $0x828] ss:$16 sps:$4 sm:$0xff]   ;;  %v8218_v57 = vld [vmem:[#allocation6 + $0x7e4] ss:$16 sps:$4 sm:$0xff]  }
 0x29c   :  { %v9598_v53 = vpop.f32.mrf.mxu1 }
 0x29e   :  { %3871 = vmatpush1.bf16.msra.mxu0 %v8144_v30  ;;  %3944 = vmatpush1.bf16.msra.mxu1 %v8147_v24  ;;  %v1342_v30 = vadd.f32 %v1341_v18, %v9305_v16  ;;  %v8186_v24 = vld [vmem:[#allocation6 + $0x6a0] ss:$16 sps:$4 sm:$0xff]  }
 0x29f   :  { %3874 = vmatprep.subr.bf16.mxu0 %v8152_v25  ;;  %3947 = vmatprep.subr.bf16.mxu1 %v8155_v26  ;;  %v8189_v25 = vld [vmem:[#allocation6 + $0x6a8] ss:$16 sps:$4 sm:$0xff]   ;;  %v8194_v26 = vld [vmem:[#allocation6 + $0x864] ss:$16 sps:$4 sm:$0xff]  }
 0x2a2   :  { %3875 = vmatpush2.bf16.msra.mxu0 %v8150_v20  ;;  %3948 = vmatpush2.bf16.msra.mxu1 %v8153_v27  ;;  %v8197_v20 = vld [vmem:[#allocation6 + $0x86c] ss:$16 sps:$4 sm:$0xff]   ;;  %v1434_v27 = vmax.f32 %v1183_v6, 0.0  ;;  %v9608_v6 = vpop.f32.mrf.mxu1 }
 0x2a3   :  { %3876 = vmatprep.subr.bf16.mxu0 %v8158_v1  ;;  %3949 = vmatprep.subr.bf16.mxu1 %v8161_v29  ;;  %v1436_v1 = vmax.f32 %v1336_v7, 0.0  ;;  %v1435_v29 = vmax.f32 %v1185_v10, 0.0  ;;  %v8210_v7 = vld [vmem:[#allocation6 + $0x800] ss:$16 sps:$4 sm:$0xff]   ;;  %v8213_v10 = vld [vmem:[#allocation6 + $0x808] ss:$16 sps:$4 sm:$0xff]  }
 0x2a6   :  { %3877 = vmatpush2.bf16.msra.mxu0 %v8156_v28  ;;  %3950 = vmatpush2.bf16.msra.mxu1 %v8159_v3  ;;  %v1437_v28 = vmax.f32 %v1338_v17, 0.0  ;;  %v1438_v3 = vmax.f32 %v1187_v19, 0.0  ;;  %v9618_v19 = vpop.f32.mrf.mxu1 }
 0x2a7   :  { %3878 = vmatprep.subr.bf16.mxu0 %v8164_v0  ;;  %3951 = vmatprep.subr.bf16.mxu1 %v8167_v33  ;;  %v1440_v0 = vmax.f32 %v1340_v22, 0.0  ;;  %v1439_v33 = vmax.f32 %v1189_v23, 0.0  ;;  %v8216_v22 = vld [vmem:[#allocation6 + $0x7e0] ss:$16 sps:$4 sm:$0xff]   ;;  %v8219_v23 = vld [vmem:[#allocation6 + $0x7e8] ss:$16 sps:$4 sm:$0xff]  }
 0x2aa   :  { %3879 = vmatpush2.bf16.msra.mxu0 %v8162_v34  ;;  %3952 = vmatpush2.bf16.msra.mxu1 %v8165_v35  ;;  %v1441_v34 = vmax.f32 %v1342_v30, 0.0  ;;  %v8192_v35 = vld [vmem:[#allocation6 + $0x860] ss:$16 sps:$4 sm:$0xff]   ;;  %v8224_v30 = vld [vmem:[#allocation6 + $0x7c4] ss:$16 sps:$4 sm:$0xff]  }
 0x2ab   :  { %3880 = vmatprep.subr.bf16.mxu0 %v8170_v36  ;;  %3953 = vmatprep.subr.bf16.mxu1 %v8173_v39  ;;  %v8195_v36 = vld [vmem:[#allocation6 + $0x868] ss:$16 sps:$4 sm:$0xff]   ;;  %v7667_v39 = vpack.c.bf16 %v1435_v29, %v1434_v27  ;;  %v8233_v29 = vld [vmem:[#allocation6 + $0x7ac] ss:$16 sps:$4 sm:$0xff]  }
 0x2ac   :  { %v8225_v27 = vld [vmem:[#allocation6 + $0x7c8] ss:$16 sps:$4 sm:$0xff]  }
 0x2ae   :  { %3881 = vmatpush2.bf16.msra.mxu0 %v8168_v41  ;;  %3954 = vmatpush2.bf16.msra.mxu1 %v8171_v38  ;;  %v7668_v41 = vpack.c.bf16 %v1437_v28, %v1436_v1  ;;  %v7669_v38 = vpack.c.bf16 %v1439_v33, %v1438_v3  ;;  %v8230_v1 = vld [vmem:[#allocation6 + $0x7a4] ss:$16 sps:$4 sm:$0xff]   ;;  %v8231_v33 = vld [vmem:[#allocation6 + $0x7a8] ss:$16 sps:$4 sm:$0xff]  }
 0x2af   :  { %3882 = vmatprep.subr.bf16.mxu0 %v8176_v42  ;;  %3955 = vmatprep.subr.bf16.mxu1 %v8179_v44  ;;  %v7670_v42 = vpack.c.bf16 %v1441_v34, %v1440_v0  ;;  %v8198_v44 = vld [vmem:[#allocation6 + $0x840] ss:$16 sps:$4 sm:$0xff]   ;;  %v8236_v34 = vld [vmem:[#allocation6 + $0x784] ss:$16 sps:$4 sm:$0xff]  }
 0x2b0   :  { %v8228_v0 = vld [vmem:[#allocation6 + $0x7a0] ss:$16 sps:$4 sm:$0xff]  }
 0x2b2   :  { %3883 = vmatpush2.bf16.msra.mxu0 %v8174_v47  ;;  %3956 = vmatpush2.bf16.msra.mxu1 %v8177_v48  ;;  %v8209_v47 = vld [vmem:[#allocation6 + $0x82c] ss:$16 sps:$4 sm:$0xff]   ;;  %v1758_v48 = vmax.bf16 %v7668_v41, %v7667_v39 }
 0x2b3   :  { %3884 = vmatprep.subr.bf16.mxu0 %v8182_v49  ;;  %3957 = vmatprep.subr.bf16.mxu1 %v8185_v50  ;;  %v1759_v49 = vmax.bf16 %v7670_v42, %v7669_v38  ;;  %v9596_v50 = vpop.f32.mrf.mxu0  ;;  %v8245_v41 = vld [vmem:[#allocation6 + $0x94c] ss:$16 sps:$4 sm:$0xff]  }
 0x2b6   :  { %3885 = vmatpush2.bf16.msra.mxu0 %v8180_v59  ;;  %3958 = vmatpush2.bf16.msra.mxu1 %v8183_v58  ;;  %v8215_v59 = vld [vmem:[#allocation6 + $0x80c] ss:$16 sps:$4 sm:$0xff]   ;;  %v1837_v58 = vsel %vm9316_vm8, %v1758_v48, 4286644096 }
 0x2b7   :  { %3886 = vmatprep.subr.bf16.mxu0 %v8188_v51  ;;  %3959 = vmatprep.subr.bf16.mxu1 %v8191_v2  ;;  %v1840_v51 = vsel %vm9316_vm8, %v1759_v49, 4286644096  ;;  %v9606_v2 = vpop.f32.mrf.mxu0  ;;  %v8246_v49 = vld [vmem:[#allocation6 + $0x920] ss:$16 sps:$4 sm:$0xff]  }
 0x2b8   :  { %v9614_v17 = vmax.bf16 %v1840_v51, %v1837_v58  ;;  %v8257_v58 = vld [vmem:[#allocation6 + $0x90c] ss:$16 sps:$4 sm:$0xff]   ;;  %v8252_v51 = vld [vmem:[#allocation6 + $0x900] ss:$16 sps:$4 sm:$0xff]  }
 0x2b9   :  { %v9616_v18 = vpop.f32.mrf.mxu0 }
 0x2ba   :  { %3887 = vmatpush2.bf16.msra.mxu0 %v8186_v24  ;;  %3960 = vmatpush2.bf16.msra.mxu1 %v8189_v25  ;;  %v8227_v24 = vld [vmem:[#allocation6 + $0x7cc] ss:$16 sps:$4 sm:$0xff]  }
 0x2bb   :  { %4404 = vmatprep.subr.bf16.mxu0 %v8194_v26  ;;  %4477 = vmatprep.subr.bf16.mxu1 %v8197_v20  ;;  %v9624_v25 = vpop.f32.mrf.mxu0  ;;  %v9626_v26 = vpop.f32.mrf.mxu1  ;;  %v8222_v20 = vld [vmem:[#allocation6 + $0x7c0] ss:$16 sps:$4 sm:$0xff]  }
 0x2bd   :  { %3889 = vmatmul.mubr.bf16.vlgmr.msra.gmra.mxu0 %v9400_v4  ;;  %3962 = vmatmul.mubr.bf16.vlgmr.msra.gmra.mxu1 %v9400_v4  ;;  %v8204_v4 = vld [vmem:[#allocation6 + $0x820] ss:$16 sps:$4 sm:$0xff]   ;;  %v9630_v28 = vpop.f32.mrf.mxu0  ;;  %v9632_v3 = vpop.f32.mrf.mxu1 }
 0x2be   :  { %7269 = vmatprep.mubr.msk.bf16.mxu0 %vm607_vm4, %v9438_v62  ;;  %7273 = vmatprep.mubr.msk.bf16.mxu1 %vm607_vm4, %v9438_v62  ;;  %v8212_v62 = vld [vmem:[#allocation6 + $0x804] ss:$16 sps:$4 sm:$0xff]  }
 0x2bf   :  { %4405 = vmatpush1.bf16.msra.mxu0 %v8192_v35  ;;  %4478 = vmatpush1.bf16.msra.mxu1 %v8195_v36  ;;  %v8239_v35 = vld [vmem:[#allocation6 + $0x78c] ss:$16 sps:$4 sm:$0xff]   ;;  %v9636_v36 = vpop.f32.mrf.mxu0  ;;  %v9638_v39 = vpop.f32.mrf.mxu1 }
 0x2c0   :  { %4406 = vmatprep.subr.bf16.mxu0 %v8200_v37  ;;  %4479 = vmatprep.subr.bf16.mxu1 %v8203_v40  ;;  %v8237_v37 = vld [vmem:[#allocation6 + $0x788] ss:$16 sps:$4 sm:$0xff]   ;;  %v8242_v40 = vld [vmem:[#allocation6 + $0x944] ss:$16 sps:$4 sm:$0xff]  }
 0x2c1   :  { %v9644_v38 = vpop.f32.mrf.mxu0  ;;  %v9646_v42 = vpop.f32.mrf.mxu1 }
 0x2c3   :  { %4407 = vmatpush1.bf16.msra.mxu0 %v8198_v44  ;;  %4480 = vmatpush1.bf16.msra.mxu1 %v8201_v21  ;;  %v8240_v44 = vld [vmem:[#allocation6 + $0x940] ss:$16 sps:$4 sm:$0xff]   ;;  %v8243_v21 = vld [vmem:[#allocation6 + $0x948] ss:$16 sps:$4 sm:$0xff]   ;;  %v9650_v48 = vpop.f32.mrf.mxu1 }
 0x2c4   :  { %4408 = vmatprep.subr.bf16.mxu0 %v8206_v46  ;;  %4481 = vmatprep.subr.bf16.mxu1 %v8209_v47  ;;  %v8248_v46 = vld [vmem:[#allocation6 + $0x924] ss:$16 sps:$4 sm:$0xff]   ;;  %v9648_v47 = vpop.f32.mrf.mxu0 }
 0x2c5   :  { %3899 = vmatmul.mubr.bf16.gmra.mxu0 %v9442_v63  ;;  %3972 = vmatmul.mubr.bf16.gmra.mxu1 %v9442_v63  ;;  %v8221_v63 = vld [vmem:[#allocation6 + $0x7ec] ss:$16 sps:$4 sm:$0xff]  }
 0x2c6   :  { %7270 = vmatprep.mubr.msk.bf16.mxu0 %vm607_vm4, %v9480_v31  ;;  %7274 = vmatprep.mubr.msk.bf16.mxu1 %vm607_vm4, %v9480_v31  ;;  %v7207_v31 = vcombine.high %v9560_v54, %v9614_v17 }
 0x2c7   :  { %4409 = vmatpush1.bf16.msra.mxu0 %v8204_v4  ;;  %4482 = vmatpush1.bf16.msra.mxu1 %v8207_v56  ;;  %v8249_v4 = vld [vmem:[#allocation6 + $0x928] ss:$16 sps:$4 sm:$0xff]   ;;  %v9652_v56 = vpop.f32.mrf.mxu0 }
 0x2c8   :  { %4410 = vmatprep.subr.bf16.mxu0 %v8212_v62  ;;  %4483 = vmatprep.subr.bf16.mxu1 %v8215_v59  ;;  %v9654_v62 = vpop.f32.mrf.mxu1  ;;  %v8254_v59 = vld [vmem:[#allocation6 + $0x904] ss:$16 sps:$4 sm:$0xff]  }
 0x2cb   :  { %4411 = vmatpush1.bf16.msra.mxu0 %v8210_v7  ;;  %4484 = vmatpush1.bf16.msra.mxu1 %v8213_v10  ;;  %v8255_v7 = vld [vmem:[#allocation6 + $0x908] ss:$16 sps:$4 sm:$0xff]   ;;  %v9656_v10 = vpop.f32.mrf.mxu0 }
 0x2cc   :  { %4412 = vmatprep.subr.bf16.mxu0 %v8218_v57  ;;  %4485 = vmatprep.subr.bf16.mxu1 %v8221_v63  ;;  %v9658_v57 = vpop.f32.mrf.mxu1  ;;  %v8260_v63 = vld [vmem:[#allocation6 + $0x8e4] ss:$16 sps:$4 sm:$0xff]  }
 0x2cd   :  { %3909 = vmatmul.mubr.bf16.gmra.mxu0 %v9484_v32  ;;  %3982 = vmatmul.mubr.bf16.gmra.mxu1 %v9484_v32  ;;  %v7206_v32 = vcombine.low %v9560_v54, %v9614_v17  ;;  %v8234_v54 = vld [vmem:[#allocation6 + $0x780] ss:$16 sps:$4 sm:$0xff]  }
 0x2ce   :  { %7271 = vmatprep.mubr.msk.bf16.mxu0 %vm607_vm4, %v7207_v31  ;;  %7275 = vmatprep.mubr.msk.bf16.mxu1 %vm607_vm4, %v7207_v31  ;;  %v8261_v31 = vld [vmem:[#allocation6 + $0x8e8] ss:$16 sps:$4 sm:$0xff]  }
 0x2cf   :  { %4413 = vmatpush1.bf16.msra.mxu0 %v8216_v22  ;;  %4486 = vmatpush1.bf16.msra.mxu1 %v8219_v23  ;;  %v8263_v22 = vld [vmem:[#allocation6 + $0x8ec] ss:$16 sps:$4 sm:$0xff]   ;;  %v8258_v23 = vld [vmem:[#allocation6 + $0x8e0] ss:$16 sps:$4 sm:$0xff]  }
 0x2d0   :  { %4414 = vmatprep.subr.bf16.mxu0 %v8224_v30  ;;  %4487 = vmatprep.subr.bf16.mxu1 %v8227_v24  ;;  %v9660_v30 = vpop.f32.mrf.mxu0  ;;  %v9662_v24 = vpop.f32.mrf.mxu1 }
 0x2d3   :  { %4415 = vmatpush1.bf16.msra.mxu0 %v8222_v20  ;;  %4488 = vmatpush1.bf16.msra.mxu1 %v8225_v27  ;;  %v8266_v20 = vld [vmem:[#allocation6 + $0x8c4] ss:$16 sps:$4 sm:$0xff]   ;;  %v8269_v27 = vld [vmem:[#allocation6 + $0x8cc] ss:$16 sps:$4 sm:$0xff]  }
 0x2d4   :  { %4416 = vmatprep.subr.bf16.mxu0 %v8230_v1  ;;  %4489 = vmatprep.subr.bf16.mxu1 %v8233_v29  ;;  %v8264_v1 = vld [vmem:[#allocation6 + $0x8c0] ss:$16 sps:$4 sm:$0xff]   ;;  %v8267_v29 = vld [vmem:[#allocation6 + $0x8c8] ss:$16 sps:$4 sm:$0xff]  }
 0x2d5   :  { %3919 = vmatmul.mubr.bf16.gmra.mxu0 %v7206_v32  ;;  %3992 = vmatmul.mubr.bf16.gmra.mxu1 %v7206_v32  ;;  %v9664_v32 = vpop.f32.mrf.mxu0 }
 0x2d6   :  { %7338 = vmatprep.mubr.msk.bf16.mxu0 %vm607_vm4, %v9504_v43  ;;  %7342 = vmatprep.mubr.msk.bf16.mxu1 %vm607_vm4, %v9504_v43  ;;  %v8251_v43 = vld [vmem:[#allocation6 + $0x92c] ss:$16 sps:$4 sm:$0xff]  }
 0x2d7   :  { %4417 = vmatpush1.bf16.msra.mxu0 %v8228_v0  ;;  %4490 = vmatpush1.bf16.msra.mxu1 %v8231_v33  ;;  %v9666_v0 = vpop.f32.mrf.mxu1  ;;  %v8272_v33 = vld [vmem:[#allocation6 + $0x8a4] ss:$16 sps:$4 sm:$0xff]  }
 0x2d8   :  { %4418 = vmatprep.subr.bf16.mxu0 %v8236_v34  ;;  %4491 = vmatprep.subr.bf16.mxu1 %v8239_v35  ;;  %v8275_v34 = vld [vmem:[#allocation6 + $0x8ac] ss:$16 sps:$4 sm:$0xff]  }
 0x2db   :  { %4419 = vmatpush1.bf16.msra.mxu0 %v8234_v54  ;;  %4492 = vmatpush1.bf16.msra.mxu1 %v8237_v37  ;;  %v8270_v37 = vld [vmem:[#allocation6 + $0x8a0] ss:$16 sps:$4 sm:$0xff]  }
 0x2dc   :  { %4422 = vmatprep.subr.bf16.mxu0 %v8242_v40  ;;  %4495 = vmatprep.subr.bf16.mxu1 %v8245_v41  ;;  %v9668_v35 = vpop.f32.mrf.mxu0  ;;  %v9670_v54 = vpop.f32.mrf.mxu1  ;;  %v8273_v40 = vld [vmem:[#allocation6 + $0x8a8] ss:$16 sps:$4 sm:$0xff]   ;;  %v8278_v41 = vld [vmem:[#allocation6 + $0x884] ss:$16 sps:$4 sm:$0xff]  }
 0x2df   :  { %4423 = vmatpush2.bf16.msra.mxu0 %v8240_v44  ;;  %4496 = vmatpush2.bf16.msra.mxu1 %v8243_v21  ;;  %v8281_v44 = vld [vmem:[#allocation6 + $0x88c] ss:$16 sps:$4 sm:$0xff]   ;;  %v1193_v21 = vadd.f32 %v9596_v50, %v9296_v13  ;;  %v1352_v50 = vadd.f32 %v9626_v26, %v9305_v16 }
 0x2e0   :  { %4424 = vmatprep.subr.bf16.mxu0 %v8248_v46  ;;  %4497 = vmatprep.subr.bf16.mxu1 %v8251_v43  ;;  %v1346_v46 = vadd.f32 %v9598_v53, %v9299_v14  ;;  %v1195_v43 = vadd.f32 %v9606_v2, %v9302_v15  ;;  %v9690_v53 = vpop.f32.mrf.mxu1  ;;  %v8276_v2 = vld [vmem:[#allocation6 + $0x880] ss:$16 sps:$4 sm:$0xff]  }
 0x2e3   :  { %4425 = vmatpush2.bf16.msra.mxu0 %v8246_v49  ;;  %4498 = vmatpush2.bf16.msra.mxu1 %v8249_v4  ;;  %v1348_v49 = vadd.f32 %v9608_v6, %v9305_v16  ;;  %v1197_v4 = vadd.f32 %v9616_v18, %v9296_v13  ;;  %v8279_v6 = vld [vmem:[#allocation6 + $0x888] ss:$16 sps:$4 sm:$0xff]   ;;  %v1442_v13 = vmax.f32 %v1193_v21, 0.0  ;;  %v1444_v18 = vmax.f32 %v1346_v46, 0.0  ;;  %v9694_v16 = vpop.f32.mrf.mxu1 }
 0x2e4   :  { %4426 = vmatprep.subr.bf16.mxu0 %v8254_v59  ;;  %4499 = vmatprep.subr.bf16.mxu1 %v8257_v58  ;;  %v1350_v59 = vadd.f32 %v9618_v19, %v9299_v14  ;;  %v1199_v58 = vadd.f32 %v9624_v25, %v9302_v15  ;;  %v1449_v25 = vmax.f32 %v1352_v50, 0.0 }
 0x2e5   :  { %v1445_v14 = vmax.f32 %v1348_v49, 0.0  ;;  %v1446_v19 = vmax.f32 %v1197_v4, 0.0 }
 0x2e6   :  { %v1447_v15 = vmax.f32 %v1199_v58, 0.0 }
 0x2e7   :  { %4427 = vmatpush2.bf16.msra.mxu0 %v8252_v51  ;;  %4500 = vmatpush2.bf16.msra.mxu1 %v8255_v7  ;;  %v9688_v51 = vpop.f32.mrf.mxu0  ;;  %v1443_v7 = vmax.f32 %v1195_v43, 0.0 }
 0x2e8   :  { %4428 = vmatprep.subr.bf16.mxu0 %v8260_v63  ;;  %4501 = vmatprep.subr.bf16.mxu1 %v8263_v22  ;;  %v1448_v63 = vmax.f32 %v1350_v59, 0.0 }
 0x2e9   :  { %v9692_v22 = vpop.f32.mrf.mxu0  ;;  %v7671_v26 = vpack.c.bf16 %v1443_v7, %v1442_v13 }
 0x2eb   :  { %4429 = vmatpush2.bf16.msra.mxu0 %v8258_v23  ;;  %4502 = vmatpush2.bf16.msra.mxu1 %v8261_v31  ;;  %v7672_v23 = vpack.c.bf16 %v1445_v14, %v1444_v18  ;;  %v7673_v31 = vpack.c.bf16 %v1447_v15, %v1446_v19 }
 0x2ec   :  { %4430 = vmatprep.subr.bf16.mxu0 %v8266_v20  ;;  %4503 = vmatprep.subr.bf16.mxu1 %v8269_v27  ;;  %v7674_v20 = vpack.c.bf16 %v1449_v25, %v1448_v63  ;;  %v9696_v27 = vpop.f32.mrf.mxu0 }
 0x2ef   :  { %4431 = vmatpush2.bf16.msra.mxu0 %v8264_v1  ;;  %4504 = vmatpush2.bf16.msra.mxu1 %v8267_v29  ;;  %v9698_v1 = vpop.f32.mrf.mxu1 }
 0x2f0   :  { %4432 = vmatprep.subr.bf16.mxu0 %v8272_v33  ;;  %4505 = vmatprep.subr.bf16.mxu1 %v8275_v34  ;;  %v1760_v34 = vmax.bf16 %v7672_v23, %v7671_v26 }
 0x2f3   :  { %4433 = vmatpush2.bf16.msra.mxu0 %v8270_v37  ;;  %4506 = vmatpush2.bf16.msra.mxu1 %v8273_v40  ;;  %v1761_v37 = vmax.bf16 %v7674_v20, %v7673_v31 }
 0x2f4   :  { %4434 = vmatprep.subr.bf16.mxu0 %v8278_v41  ;;  %4507 = vmatprep.subr.bf16.mxu1 %v8281_v44 }
 0x2f7   :  { %4435 = vmatpush2.bf16.msra.mxu0 %v8276_v2  ;;  %4508 = vmatpush2.bf16.msra.mxu1 %v8279_v6 }
 0x2fa   :  { %4437 = vmatmul.mubr.bf16.vlgmr.msra.gmra.mxu0 %v9514_v52  ;;  %4510 = vmatmul.mubr.bf16.vlgmr.msra.gmra.mxu1 %v9514_v52  ;;  %v1844_v52 = vsel %vm9316_vm8, %v1760_v34, 4286644096 }
 0x2fb   :  { %7339 = vmatprep.mubr.msk.bf16.mxu0 %vm607_vm4, %v9518_v55  ;;  %7343 = vmatprep.mubr.msk.bf16.mxu1 %vm607_vm4, %v9518_v55  ;;  %v1847_v55 = vsel %vm9316_vm8, %v1761_v37, 4286644096 }
 0x2fc   :  { %v9706_v29 = vpop.f32.mrf.mxu0  ;;  %v9708_v33 = vpop.f32.mrf.mxu1  ;;  %v1849_v45 = vmax.bf16 %v1847_v55, %v1844_v52 }
 0x2fe   :  { %v9710_v40 = vpop.f32.mrf.mxu0  ;;  %v9712_v41 = vpop.f32.mrf.mxu1  ;;  %v7277_v2 = vcombine.high %v9614_v17, %v1849_v45  ;;  %v7276_v19 = vcombine.low %v9614_v17, %v1849_v45 }
 0x300   :  { %v9714_v44 = vpop.f32.mrf.mxu0  ;;  %v9716_v21 = vpop.f32.mrf.mxu1 }
 0x302   :  { %4447 = vmatmul.mubr.bf16.gmra.mxu0 %v9528_v5  ;;  %4520 = vmatmul.mubr.bf16.gmra.mxu1 %v9528_v5  ;;  %v9724_v46 = vpop.f32.mrf.mxu0  ;;  %v9726_v43 = vpop.f32.mrf.mxu1 }
 0x303   :  { %7340 = vmatprep.mubr.msk.bf16.mxu0 %vm607_vm4, %v9564_v61  ;;  %7344 = vmatprep.mubr.msk.bf16.mxu1 %vm607_vm4, %v9564_v61 }
 0x304   :  { %v9732_v49 = vpop.f32.mrf.mxu0  ;;  %v9734_v4 = vpop.f32.mrf.mxu1 }
 0x306   :  { %v9736_v59 = vpop.f32.mrf.mxu0  ;;  %v9738_v58 = vpop.f32.mrf.mxu1 }
 0x308   :  { %v9740_v5 = vpop.f32.mrf.mxu0  ;;  %v9742_v50 = vpop.f32.mrf.mxu1 }
 0x30a   :  { %4457 = vmatmul.mubr.bf16.gmra.mxu0 %v9574_v60  ;;  %4530 = vmatmul.mubr.bf16.gmra.mxu1 %v9574_v60  ;;  %v9747_v61 = vpop.f32.mrf.mxu0  ;;  %v9749_v6 = vpop.f32.mrf.mxu1 }
 0x30b   :  { %7341 = vmatprep.mubr.msk.bf16.mxu0 %vm607_vm4, %v7277_v2  ;;  %7345 = vmatprep.mubr.msk.bf16.mxu1 %vm607_vm4, %v7277_v2 }
 0x30c   :  { %v9753_v13 = vpop.f32.mrf.mxu0  ;;  %v9755_v18 = vpop.f32.mrf.mxu1 }
 0x30e   :  { %v9757_v7 = vpop.f32.mrf.mxu0  ;;  %v9759_v14 = vpop.f32.mrf.mxu1 }
 0x310   :  { %v9762_v63 = vpop.f32.mrf.mxu0  ;;  %v9764_v60 = vpop.f32.mrf.mxu1 }
 0x312   :  { %4467 = vmatmul.mubr.bf16.gmra.mxu0 %v7276_v19  ;;  %4540 = vmatmul.mubr.bf16.gmra.mxu1 %v7276_v19  ;;  %v2842_v15 = vpop.f32.mrf.mxu0  ;;  %v2915_v25 = vpop.f32.mrf.mxu1 }
 0x313   :  { %v9767_v26 = vadd.f32 %v2842_v15, %v9664_v32  ;;  %v9770_v23 = vadd.f32 %v2915_v25, %v9666_v0 }
 0x314   :  { %v2846_v31 = vpop.f32.mrf.mxu0  ;;  %v2919_v20 = vpop.f32.mrf.mxu1 }
 0x315   :  { %10137 = vst [vmem:[#allocation20_spill] sm:$0xff] %v9767_v26  ;;  %10138 = vst [vmem:[#allocation21_spill] sm:$0xff] %v9770_v23  ;;  %v9773_v34 = vadd.f32 %v2846_v31, %v9668_v35  ;;  %v9776_v17 = vadd.f32 %v2919_v20, %v9670_v54  ;;  %v8284_v20 = vld [vmem:[#allocation9 + $0x274] ss:$16 sps:$4 sm:$0xff]  }
 0x316   :  { %v2848_v37 = vpop.f32.mrf.mxu0  ;;  %v2921_v52 = vpop.f32.mrf.mxu1  ;;  %5175 = vmatprep.subr.bf16.mxu0 %v8284_v20 }
 0x317   :  { %v9779_v55 = vadd.f32 %v2848_v37, %v9688_v51  ;;  %v9782_v45 = vadd.f32 %v2921_v52, %v9690_v53  ;;  %v8282_v53 = vld [vmem:[#allocation9 + $0x270] ss:$16 sps:$4 sm:$0xff]   ;;  %v8285_v37 = vld [vmem:[#allocation9 + $0x278] ss:$16 sps:$4 sm:$0xff]  }
 0x318   :  { %v2850_v32 = vpop.f32.mrf.mxu0  ;;  %v2923_v2 = vpop.f32.mrf.mxu1  ;;  %5176 = vmatpush1.bf16.msra.mxu0 %v8282_v53 }
 0x319   :  { %v9785_v0 = vadd.f32 %v2850_v32, %v9692_v22  ;;  %v9788_v19 = vadd.f32 %v2923_v2, %v9694_v16  ;;  %v8287_v16 = vld [vmem:[#allocation9 + $0x27c] ss:$16 sps:$4 sm:$0xff]   ;;  %v8290_v32 = vld [vmem:[#allocation9 + $0x254] ss:$16 sps:$4 sm:$0xff]  }
 0x31a   :  { %v2852_v35 = vpop.f32.mrf.mxu0  ;;  %v2925_v15 = vpop.f32.mrf.mxu1  ;;  %5216 = vmatprep.subr.bf16.mxu1 %v8287_v16  ;;  %5177 = vmatprep.subr.bf16.mxu0 %v8290_v32  ;;  %v8297_v16 = vld [vmem:[#allocation9 + $0x238] ss:$16 sps:$4 sm:$0xff]   ;;  %v8305_v32 = vld [vmem:[#allocation9 + $0x21c] ss:$16 sps:$4 sm:$0xff]  }
 0x31b   :  { %v9791_v54 = vadd.f32 %v2852_v35, %v9696_v27  ;;  %v9794_v25 = vadd.f32 %v2925_v15, %v9698_v1  ;;  %v8293_v27 = vld [vmem:[#allocation9 + $0x25c] ss:$16 sps:$4 sm:$0xff]   ;;  %v8288_v15 = vld [vmem:[#allocation9 + $0x250] ss:$16 sps:$4 sm:$0xff]   ;;  %5217 = vmatpush1.bf16.msra.mxu1 %v8285_v37 }
 0x31c   :  { %v2856_v51 = vpop.f32.mrf.mxu0  ;;  %v2929_v31 = vpop.f32.mrf.mxu1  ;;  %5218 = vmatprep.subr.bf16.mxu1 %v8293_v27  ;;  %5178 = vmatpush1.bf16.msra.mxu0 %v8288_v15  ;;  %v8294_v37 = vld [vmem:[#allocation9 + $0x230] ss:$16 sps:$4 sm:$0xff]   ;;  %v8303_v27 = vld [vmem:[#allocation9 + $0x218] ss:$16 sps:$4 sm:$0xff]   ;;  %v8314_v15 = vld [vmem:[#allocation9 + $0x1d4] ss:$16 sps:$4 sm:$0xff]  }
 0x31d   :  { %v9797_v52 = vadd.f32 %v2856_v51, %v9706_v29  ;;  %v9800_v22 = vadd.f32 %v2929_v31, %v9708_v33  ;;  %v8291_v33 = vld [vmem:[#allocation9 + $0x258] ss:$16 sps:$4 sm:$0xff]   ;;  %v8296_v31 = vld [vmem:[#allocation9 + $0x234] ss:$16 sps:$4 sm:$0xff]  }
 0x31e   :  { %v2858_v2 = vpop.f32.mrf.mxu0  ;;  %v2931_v23 = vpop.f32.mrf.mxu1  ;;  %5179 = vmatprep.subr.bf16.mxu0 %v8296_v31  ;;  %v8312_v31 = vld [vmem:[#allocation9 + $0x1d0] ss:$16 sps:$4 sm:$0xff]  }
 0x31f   :  { %v9803_v1 = vadd.f32 %v2858_v2, %v9710_v40  ;;  %v9806_v35 = vadd.f32 %v2931_v23, %v9712_v41  ;;  %v8299_v40 = vld [vmem:[#allocation9 + $0x23c] ss:$16 sps:$4 sm:$0xff]   ;;  %5219 = vmatpush1.bf16.msra.mxu1 %v8291_v33 }
 0x320   :  { %v2860_v29 = vpop.f32.mrf.mxu0  ;;  %v2933_v51 = vpop.f32.mrf.mxu1  ;;  %5220 = vmatprep.subr.bf16.mxu1 %v8299_v40  ;;  %5180 = vmatpush1.bf16.msra.mxu0 %v8294_v37  ;;  %v8317_v33 = vld [vmem:[#allocation9 + $0x1dc] ss:$16 sps:$4 sm:$0xff]   ;;  %v8315_v40 = vld [vmem:[#allocation9 + $0x1d8] ss:$16 sps:$4 sm:$0xff]   ;;  %v8318_v37 = vld [vmem:[#allocation9 + $0x1b0] ss:$16 sps:$4 sm:$0xff]  }
 0x321   :  { %v9809_v26 = vadd.f32 %v2860_v29, %v9714_v44  ;;  %v9812_v20 = vadd.f32 %v2933_v51, %v9716_v21  ;;  %v8302_v44 = vld [vmem:[#allocation9 + $0x214] ss:$16 sps:$4 sm:$0xff]   ;;  %v8300_v21 = vld [vmem:[#allocation9 + $0x210] ss:$16 sps:$4 sm:$0xff]  }
 0x322   :  { %v2862_v2 = vpop.f32.mrf.mxu0  ;;  %v2935_v41 = vpop.f32.mrf.mxu1  ;;  %5181 = vmatprep.subr.bf16.mxu0 %v8302_v44  ;;  %v8308_v29 = vld [vmem:[#allocation9 + $0x1f4] ss:$16 sps:$4 sm:$0xff]   ;;  %v8306_v51 = vld [vmem:[#allocation9 + $0x1f0] ss:$16 sps:$4 sm:$0xff]   ;;  %v2827_v44 = vadd.f32 %v9732_v49, %v9630_v28  ;;  %v2831_v28 = vadd.f32 %v9740_v5, %v9644_v38 }
 0x323   :  { %v9815_v23 = vadd.f32 %v2862_v2, %v9724_v46  ;;  %v9818_v53 = vadd.f32 %v2935_v41, %v9726_v43  ;;  %5221 = vmatpush1.bf16.msra.mxu1 %v8297_v16  ;;  %v8311_v46 = vld [vmem:[#allocation9 + $0x1fc] ss:$16 sps:$4 sm:$0xff]   ;;  %v8309_v43 = vld [vmem:[#allocation9 + $0x1f8] ss:$16 sps:$4 sm:$0xff]   ;;  %v8320_v2 = vld [vmem:[#allocation9 + $0x1b4] ss:$16 sps:$4 sm:$0xff]  }
 0x324   :  { %5222 = vmatprep.subr.bf16.mxu1 %v8305_v32  ;;  %5182 = vmatpush1.bf16.msra.mxu0 %v8300_v21  ;;  %v8323_v41 = vld [vmem:[#allocation9 + $0x1bc] ss:$16 sps:$4 sm:$0xff]   ;;  %v8321_v16 = vld [vmem:[#allocation9 + $0x1b8] ss:$16 sps:$4 sm:$0xff]   ;;  %v2900_v32 = vadd.f32 %v9734_v4, %v9632_v3  ;;  %v8326_v21 = vld [vmem:[#allocation9 + $0x194] ss:$16 sps:$4 sm:$0xff]   ;;  %v2904_v3 = vadd.f32 %v9742_v50, %v9646_v42  ;;  %v2906_v42 = vadd.f32 %v9749_v6, %v9650_v48 }
 0x325   :  { %5183 = vmatprep.subr.bf16.mxu0 %v8308_v29  ;;  %v2829_v29 = vadd.f32 %v9736_v59, %v9636_v36  ;;  %v4901_v4 = vld [vmem:[#allocation9 + $0x310] sm:$0xff]  ;;  %v4902_v59 = vld [vmem:[#allocation9 + $0x318] sm:$0xff]  ;;  %v2910_v48 = vadd.f32 %v9755_v18, %v9654_v62 }
 0x326   :  { %v7412_v5 = vcombine.low %v4901_v4, %v4901_v4  ;;  %v8334_v62 = vld [vmem:[#allocation9 + $0x2f0] ss:$16 sps:$4 sm:$0xff]   ;;  %v8337_v18 = vld [vmem:[#allocation9 + $0x2f8] ss:$16 sps:$4 sm:$0xff]  }
 0x327   :  { %5223 = vmatpush1.bf16.msra.mxu1 %v8303_v27  ;;  %v8329_v27 = vld [vmem:[#allocation9 + $0x19c] ss:$16 sps:$4 sm:$0xff]  }
 0x328   :  { %5224 = vmatprep.subr.bf16.mxu1 %v8311_v46  ;;  %5184 = vmatpush1.bf16.msra.mxu0 %v8306_v51 }
 0x329   :  { %5185 = vmatprep.subr.bf16.mxu0 %v8314_v15  ;;  %v8327_v15 = vld [vmem:[#allocation9 + $0x198] ss:$16 sps:$4 sm:$0xff]  }
 0x32b   :  { %5225 = vmatpush1.bf16.msra.mxu1 %v8309_v43  ;;  %v8324_v43 = vld [vmem:[#allocation9 + $0x190] ss:$16 sps:$4 sm:$0xff]  }
 0x32c   :  { %5226 = vmatprep.subr.bf16.mxu1 %v8317_v33  ;;  %5186 = vmatpush1.bf16.msra.mxu0 %v8312_v31  ;;  %v2902_v33 = vadd.f32 %v9738_v58, %v9638_v39  ;;  %v7413_v58 = vcombine.high %v4901_v4, %v4901_v4 }
 0x32d   :  { %5187 = vmatprep.subr.bf16.mxu0 %v8320_v2 }
 0x32f   :  { %5227 = vmatpush1.bf16.msra.mxu1 %v8315_v40 }
 0x330   :  { %5228 = vmatprep.subr.bf16.mxu1 %v8323_v41  ;;  %5188 = vmatpush1.bf16.msra.mxu0 %v8318_v37  ;;  %v7415_v41 = vcombine.high %v4902_v59, %v4902_v59  ;;  %v2833_v37 = vadd.f32 %v9747_v61, %v9648_v47  ;;  %v5164_v61 = vsel %vm1762_vm6, %v7412_v5, 0 }
 0x331   :  { %5189 = vmatprep.subr.bf16.mxu0 %v8326_v21  ;;  %v2837_v21 = vadd.f32 %v9753_v13, %v9652_v56  ;;  %v2839_v56 = vadd.f32 %v9757_v7, %v9656_v10  ;;  %v2912_v13 = vadd.f32 %v9759_v14, %v9658_v57  ;;  %v8342_v57 = vld [vmem:[#allocation9 + $0x2d4] ss:$16 sps:$4 sm:$0xff]   ;;  %v8345_v14 = vld [vmem:[#allocation9 + $0x2dc] ss:$16 sps:$4 sm:$0xff]  }
 0x333   :  { %5229 = vmatpush1.bf16.msra.mxu1 %v8321_v16 }
 0x334   :  { %5230 = vmatprep.subr.bf16.mxu1 %v8329_v27  ;;  %5190 = vmatpush1.bf16.msra.mxu0 %v8324_v43 }
 0x335   :  { %7416 = vmatprep.subr.msk.bf16.mxu0 %vm1762_vm6, %v7413_v58  ;;  %v8340_v58 = vld [vmem:[#allocation9 + $0x2d0] ss:$16 sps:$4 sm:$0xff]  }
 0x337   :  { %5231 = vmatpush1.bf16.msra.mxu1 %v8327_v15  ;;  %v8336_v15 = vld [vmem:[#allocation9 + $0x2f4] ss:$16 sps:$4 sm:$0xff]  }
 0x338   :  { %7418 = vmatprep.subr.msk.bf16.mxu1 %vm1762_vm6, %v7415_v41  ;;  %5198 = vmatpush2.bf16.msra.mxu0 %v5164_v61  ;;  %v8343_v41 = vld [vmem:[#allocation9 + $0x2d8] ss:$16 sps:$4 sm:$0xff]  }
 0x339   :  { %5199 = vmatprep.subr.bf16.mxu0 %v8336_v15  ;;  %v8349_v61 = vld [vmem:[#allocation9 + $0x2b8] ss:$16 sps:$4 sm:$0xff]  }
 0x33c   :  { %5200 = vmatpush2.bf16.msra.mxu0 %v8334_v62  ;;  %v8352_v62 = vld [vmem:[#allocation9 + $0x290] ss:$16 sps:$4 sm:$0xff]  }
 0x33d   :  { %5201 = vmatprep.subr.bf16.mxu0 %v8342_v57 }
 0x340   :  { %v3342_v46 = vpop.f32.mrf.mxu0  ;;  %v3415_v51 = vpop.f32.mrf.mxu1  ;;  %5202 = vmatpush2.bf16.msra.mxu0 %v8340_v58 }
 0x341   :  { %v9828_v31 = vadd.f32 %v3342_v46, %v2827_v44  ;;  %v9830_v40 = vadd.f32 %v3415_v51, %v2900_v32  ;;  %v7414_v44 = vcombine.low %v4902_v59, %v4902_v59 }
 0x342   :  { %v3344_v36 = vpop.f32.mrf.mxu0  ;;  %v3417_v49 = vpop.f32.mrf.mxu1 }
 0x343   :  { %v9836_v2 = vadd.f32 %v3344_v36, %v2829_v29  ;;  %v9838_v39 = vadd.f32 %v3417_v49, %v2902_v33  ;;  %v5170_v29 = vsel %vm1762_vm6, %v7414_v44, 0  ;;  %v8339_v33 = vld [vmem:[#allocation9 + $0x2fc] ss:$16 sps:$4 sm:$0xff]   ;;  %v8348_v44 = vld [vmem:[#allocation9 + $0x2b4] ss:$16 sps:$4 sm:$0xff]  }
 0x344   :  { %v3346_v16 = vpop.f32.mrf.mxu0  ;;  %v3419_v38 = vpop.f32.mrf.mxu1  ;;  %5239 = vmatpush2.bf16.msra.mxu1 %v5170_v29  ;;  %5203 = vmatprep.subr.bf16.mxu0 %v8348_v44 }
 0x345   :  { %v9844_v50 = vadd.f32 %v3346_v16, %v2831_v28  ;;  %v9846_v32 = vadd.f32 %v3419_v38, %v2904_v3  ;;  %5240 = vmatprep.subr.bf16.mxu1 %v8339_v33 }
 0x346   :  { %v3348_v27 = vpop.f32.mrf.mxu0  ;;  %v3421_v47 = vpop.f32.mrf.mxu1 }
 0x347   :  { %v9856_v6 = vadd.f32 %v3348_v27, %v2833_v37  ;;  %v9858_v46 = vadd.f32 %v3421_v47, %v2906_v42  ;;  %v8351_v42 = vld [vmem:[#allocation9 + $0x2bc] ss:$16 sps:$4 sm:$0xff]   ;;  %v8346_v47 = vld [vmem:[#allocation9 + $0x2b0] ss:$16 sps:$4 sm:$0xff]  }
 0x348   :  { %v3352_v51 = vpop.f32.mrf.mxu0  ;;  %v3425_v43 = vpop.f32.mrf.mxu1  ;;  %5241 = vmatpush2.bf16.msra.mxu1 %v8337_v18  ;;  %5204 = vmatpush2.bf16.msra.mxu0 %v8346_v47  ;;  %v8355_v18 = vld [vmem:[#allocation9 + $0x298] ss:$16 sps:$4 sm:$0xff]   ;;  %v8360_v47 = vld [vmem:[#allocation9 + $0xe4] ss:$16 sps:$4 sm:$0xff]  }
 0x349   :  { %v9864_v28 = vadd.f32 %v3352_v51, %v2837_v21  ;;  %v9866_v3 = vadd.f32 %v3425_v43, %v2910_v48  ;;  %5242 = vmatprep.subr.bf16.mxu1 %v8345_v14 }
 0x34a   :  { %v3354_v36 = vpop.f32.mrf.mxu0  ;;  %v3427_v49 = vpop.f32.mrf.mxu1 }
 0x34b   :  { %v9868_v4 = vadd.f32 %v3354_v36, %v2839_v56  ;;  %v9870_v59 = vadd.f32 %v3427_v49, %v2912_v13  ;;  %v8354_v56 = vld [vmem:[#allocation9 + $0x294] ss:$16 sps:$4 sm:$0xff]  }
 0x34c   :  { %v9872_v10 = vpop.f32.mrf.mxu0  ;;  %v9874_v7 = vpop.f32.mrf.mxu1  ;;  %5243 = vmatpush2.bf16.msra.mxu1 %v8343_v41  ;;  %5205 = vmatprep.subr.bf16.mxu0 %v8354_v56 }
 0x34d   :  { %10139 = vst [vmem:[#allocation22_spill] sm:$0xff] %v9870_v59  ;;  %5244 = vmatprep.subr.bf16.mxu1 %v8351_v42  ;;  %5206 = vmatpush2.bf16.msra.mxu0 %v8352_v62 }
 0x34e   :  { %v9876_v37 = vpop.f32.mrf.mxu0  ;;  %v9878_v16 = vpop.f32.mrf.mxu1  ;;  %5528 = vmatprep.subr.bf16.mxu0 %v8360_v47 }
 0x350   :  { %v3362_v38 = vpop.f32.mrf.mxu0  ;;  %v3435_v5 = vpop.f32.mrf.mxu1  ;;  %5245 = vmatpush2.bf16.msra.mxu1 %v8349_v61  ;;  %v8363_v61 = vld [vmem:[#allocation9 + $0xec] ss:$16 sps:$4 sm:$0xff]  }
 0x351   :  { %v9881_v21 = vadd.f32 %v3362_v38, %v9773_v34  ;;  %v9884_v27 = vadd.f32 %v3435_v5, %v9776_v17  ;;  %v8357_v34 = vld [vmem:[#allocation9 + $0x29c] ss:$16 sps:$4 sm:$0xff]  }
 0x352   :  { %v3364_v29 = vpop.f32.mrf.mxu0  ;;  %v3437_v48 = vpop.f32.mrf.mxu1  ;;  %5246 = vmatprep.subr.bf16.mxu1 %v8357_v34 }
 0x353   :  { %v3471_v51 = vadd.f32 %v3364_v29, %v9779_v55  ;;  %v3473_v43 = vadd.f32 %v3437_v48, %v9782_v45 }
 0x354   :  { %v3366_v15 = vpop.f32.mrf.mxu0  ;;  %v3439_v33 = vpop.f32.mrf.mxu1  ;;  %5247 = vmatpush2.bf16.msra.mxu1 %v8355_v18 }
 0x355   :  { %v3474_v13 = vadd.f32 %v3366_v15, %v9785_v0  ;;  %v3476_v17 = vadd.f32 %v3439_v33, %v9788_v19  ;;  %5569 = vmatprep.subr.bf16.mxu1 %v8363_v61 }
 0x356   :  { %v3368_v36 = vpop.f32.mrf.mxu0  ;;  %v3441_v49 = vpop.f32.mrf.mxu1 }
 0x357   :  { %v3475_v55 = vadd.f32 %v3368_v36, %v9791_v54  ;;  %v3477_v45 = vadd.f32 %v3441_v49, %v9794_v25 }
 0x358   :  { %v3372_v57 = vpop.f32.mrf.mxu0  ;;  %v3445_v14 = vpop.f32.mrf.mxu1 }
 0x359   :  { %v3478_v58 = vadd.f32 %v3372_v57, %v9797_v52  ;;  %v3480_v0 = vadd.f32 %v3445_v14, %v9800_v22 }
 0x35a   :  { %v3374_v41 = vpop.f32.mrf.mxu0  ;;  %v3447_v19 = vpop.f32.mrf.mxu1 }
 0x35b   :  { %v3479_v38 = vadd.f32 %v3374_v41, %v9803_v1  ;;  %v3481_v5 = vadd.f32 %v3447_v19, %v9806_v35 }
 0x35c   :  { %v3376_v44 = vpop.f32.mrf.mxu0  ;;  %v3449_v42 = vpop.f32.mrf.mxu1 }
 0x35d   :  { %v3482_v54 = vadd.f32 %v3376_v44, %v9809_v26  ;;  %v3484_v25 = vadd.f32 %v3449_v42, %v9812_v20 }
 0x35e   :  { %v3378_v29 = vpop.f32.mrf.mxu0  ;;  %v3451_v48 = vpop.f32.mrf.mxu1 }
 0x35f   :  { %v3483_v52 = vadd.f32 %v3378_v29, %v9815_v23  ;;  %v3485_v22 = vadd.f32 %v3451_v48, %v9818_v53 }
 0x37d   :  { %v3890_v15 = vpop.f32.mrf.mxu0  ;;  %v3963_v1 = vpop.f32.mrf.mxu1 }
 0x37f   :  { %v3892_v33 = vpop.f32.mrf.mxu0  ;;  %v3965_v35 = vpop.f32.mrf.mxu1 }
 0x381   :  { %v9900_v56 = vpop.f32.mrf.mxu0  ;;  %v9902_v34 = vpop.f32.mrf.mxu1 }
 0x383   :  { %v9904_v26 = vpop.f32.mrf.mxu0  ;;  %v9906_v20 = vpop.f32.mrf.mxu1 }
 0x385   :  { %v9908_v62 = vpop.f32.mrf.mxu0  ;;  %v9910_v18 = vpop.f32.mrf.mxu1 }
 0x387   :  { %v9912_v23 = vpop.f32.mrf.mxu0  ;;  %v9914_v53 = vpop.f32.mrf.mxu1 }
 0x388   :  { %10140 = vst [vmem:[#allocation23_spill] sm:$0xff] %v9912_v23  ;;  %10141 = vst [vmem:[#allocation24_spill] sm:$0xff] %v9914_v53 }
 0x389   :  { %v9916_v36 = vpop.f32.mrf.mxu0  ;;  %v9918_v49 = vpop.f32.mrf.mxu1 }
 0x38a   :  { %10142 = vst [vmem:[#allocation25_spill] sm:$0xff] %v9916_v36  ;;  %10143 = vst [vmem:[#allocation26_spill] sm:$0xff] %v9918_v49 }
 0x38b   :  { %v9920_v57 = vpop.f32.mrf.mxu0  ;;  %v9922_v14 = vpop.f32.mrf.mxu1 }
 0x38c   :  { %10144 = vst [vmem:[#allocation27_spill] sm:$0xff] %v9920_v57  ;;  %10145 = vst [vmem:[#allocation28_spill] sm:$0xff] %v9922_v14 }
 0x38d   :  { %v3910_v41 = vpop.f32.mrf.mxu0  ;;  %v3983_v19 = vpop.f32.mrf.mxu1 }
 0x38e   :  { %v9925_v44 = vadd.f32 %v3910_v41, %v9881_v21  ;;  %v9928_v42 = vadd.f32 %v3983_v19, %v9884_v27 }
 0x38f   :  { %v3912_v47 = vpop.f32.mrf.mxu0  ;;  %v3985_v61 = vpop.f32.mrf.mxu1 }
 0x390   :  { %v9930_v29 = vadd.f32 %v3912_v47, %v3471_v51  ;;  %v9932_v48 = vadd.f32 %v3985_v61, %v3473_v43 }
 0x391   :  { %v3914_v36 = vpop.f32.mrf.mxu0  ;;  %v3987_v49 = vpop.f32.mrf.mxu1 }
 0x392   :  { %v9934_v53 = vadd.f32 %v3914_v36, %v3474_v13  ;;  %v9936_v57 = vadd.f32 %v3987_v49, %v3476_v17 }
 0x393   :  { %v3916_v14 = vpop.f32.mrf.mxu0  ;;  %v3989_v59 = vpop.f32.mrf.mxu1 }
 0x394   :  { %v9938_v23 = vadd.f32 %v3916_v14, %v3475_v55  ;;  %v9940_v21 = vadd.f32 %v3989_v59, %v3477_v45 }
 0x395   :  { %v3920_v27 = vpop.f32.mrf.mxu0  ;;  %v3993_v41 = vpop.f32.mrf.mxu1 }
 0x396   :  { %v9942_v19 = vadd.f32 %v3920_v27, %v3478_v58  ;;  %v9944_v51 = vadd.f32 %v3993_v41, %v3480_v0  ;;  %v4582_v0 = vld [vmem:[#allocation7] sm:$0xf]  ;;  %v2841_v27 = vadd.f32 %v9762_v63, %v9660_v30 }
 0x397   :  { %v3922_v43 = vpop.f32.mrf.mxu0  ;;  %v3995_v47 = vpop.f32.mrf.mxu1  ;;  %v9968_v41 = vrot.slane %v4582_v0, %v9289_v9 }
 0x398   :  { %v9946_v61 = vadd.f32 %v3922_v43, %v3479_v38  ;;  %v9948_v13 = vadd.f32 %v3995_v47, %v3481_v5  ;;  %v2914_v38 = vadd.f32 %v9764_v60, %v9662_v24  ;;  %v9963_v5 = vrot.slane %v4582_v0, %v9287_v8 }
 0x399   :  { %v3924_v17 = vpop.f32.mrf.mxu0  ;;  %v3997_v36 = vpop.f32.mrf.mxu1  ;;  %v9976_v24 = vrot.slane %v4582_v0, %v9293_v12  ;;  %v4003_v60 = vadd.f32 %v3892_v33, %v9836_v2 }
 0x39a   :  { %v9950_v49 = vadd.f32 %v3924_v17, %v3482_v54  ;;  %v9952_v55 = vadd.f32 %v3997_v36, %v3484_v25  ;;  %v4002_v54 = vadd.f32 %v3890_v15, %v9828_v31  ;;  %v4004_v25 = vadd.f32 %v3963_v1, %v9830_v40  ;;  %v10146_v1 = vld [vmem:[#allocation20_spill] sm:$0xff]  ;;  %v10147_v17 = vld [vmem:[#allocation21_spill] sm:$0xff] }
 0x39b   :  { %v3926_v59 = vpop.f32.mrf.mxu0  ;;  %v3999_v45 = vpop.f32.mrf.mxu1  ;;  %v3468_v30 = vadd.f32 %v9874_v7, %v2914_v38  ;;  %v4005_v31 = vadd.f32 %v3965_v35, %v9838_v39  ;;  %v3467_v47 = vadd.f32 %v9876_v37, %v10146_v1  ;;  %v4006_v7 = vadd.f32 %v9900_v56, %v9844_v50  ;;  %v10149_v38 = vld [vmem:[#allocation22_spill] sm:$0xff] }
 0x39c   :  { %v9954_v14 = vadd.f32 %v3926_v59, %v3483_v52  ;;  %v9956_v58 = vadd.f32 %v3999_v45, %v3485_v22  ;;  %v9971_v52 = vrot.slane %v4582_v0, %v9291_v11  ;;  %v3466_v22 = vadd.f32 %v9872_v10, %v2841_v27  ;;  %v10148_v0 = vld [vmem:[#allocation23_spill] sm:$0xff] }
 0x39d   :  { %v3469_v10 = vadd.f32 %v9878_v16, %v10147_v17  ;;  %v4008_v36 = vadd.f32 %v9902_v34, %v9846_v32  ;;  %v4007_v37 = vadd.f32 %v9904_v26, %v9856_v6  ;;  %v4009_v16 = vadd.f32 %v9906_v20, %v9858_v46 }
 0x39e   :  { %v4010_v50 = vadd.f32 %v9908_v62, %v9864_v28  ;;  %v4012_v32 = vadd.f32 %v9910_v18, %v9866_v3  ;;  %v4011_v27 = vadd.f32 %v10148_v0, %v9868_v4  ;;  %v10152_v4 = vld [vmem:[#allocation26_spill] sm:$0xff] }
 0x39f   :  { %v4016_v1 = vadd.f32 %v10152_v4, %v3468_v30  ;;  %v8382_v30 = vld [vmem:[#allocation9 + $0x60] ss:$16 sps:$4 sm:$0xff]  }
 0x3ba   :  { %v4438_v63 = vpop.f32.mrf.mxu0  ;;  %v4511_v43 = vpop.f32.mrf.mxu1 }
 0x3bb   :  { %v4550_v40 = vadd.f32 %v4438_v63, %v4002_v54  ;;  %v4552_v15 = vadd.f32 %v4511_v43, %v4004_v25  ;;  %v10150_v54 = vld [vmem:[#allocation24_spill] sm:$0xff] }
 0x3bc   :  { %v4440_v59 = vpop.f32.mrf.mxu0  ;;  %v4513_v45 = vpop.f32.mrf.mxu1  ;;  %v4013_v25 = vadd.f32 %v10150_v54, %v10149_v38 }
 0x3bd   :  { %v4604_v2 = vadd.f32 %v9963_v5, %v4550_v40  ;;  %v4606_v39 = vadd.f32 %v9968_v41, %v4552_v15  ;;  %v4551_v33 = vadd.f32 %v4440_v59, %v4003_v60  ;;  %v4553_v35 = vadd.f32 %v4513_v45, %v4005_v31  ;;  %v10151_v40 = vld [vmem:[#allocation25_spill] sm:$0xff] }
 0x3be   :  { %v4442_v56 = vpop.f32.mrf.mxu0  ;;  %v4515_v34 = vpop.f32.mrf.mxu1  ;;  %v4014_v15 = vadd.f32 %v10151_v40, %v3466_v22 }
 0x3bf   :  { %v4605_v63 = vadd.f32 %v9971_v52, %v4551_v33  ;;  %v4607_v6 = vadd.f32 %v9976_v24, %v4553_v35  ;;  %v4636_v26 = vmax.f32 %v4604_v2, 0.0  ;;  %v4638_v46 = vmax.f32 %v4606_v39, 0.0 }
 0x3c0   :  { %v4554_v20 = vadd.f32 %v4442_v56, %v4006_v7  ;;  %v4556_v43 = vadd.f32 %v4515_v34, %v4008_v36  ;;  %v4444_v28 = vpop.f32.mrf.mxu0  ;;  %v4517_v62 = vpop.f32.mrf.mxu1 }
 0x3c1   :  { %v4637_v60 = vmax.f32 %v4605_v63, 0.0  ;;  %v4639_v3 = vmax.f32 %v4607_v6, 0.0  ;;  %v4555_v18 = vadd.f32 %v4444_v28, %v4007_v37  ;;  %v4557_v31 = vadd.f32 %v4517_v62, %v4009_v16  ;;  %v10155_v6 = vld [vmem:[#allocation27_spill] sm:$0xff]  ;;  %v10156_v28 = vld [vmem:[#allocation28_spill] sm:$0xff] }
 0x3c2   :  { %v4608_v17 = vadd.f32 %v9963_v5, %v4554_v20  ;;  %v4610_v59 = vadd.f32 %v9968_v41, %v4556_v43  ;;  %v4448_v45 = vpop.f32.mrf.mxu0  ;;  %v4521_v33 = vpop.f32.mrf.mxu1  ;;  %v4017_v62 = vadd.f32 %v10156_v28, %v3469_v10 }
 0x3c3   :  { %v7675_v2 = vpack.c.bf16 %v4637_v60, %v4636_v26  ;;  %v7676_v39 = vpack.c.bf16 %v4639_v3, %v4638_v46  ;;  %v4609_v7 = vadd.f32 %v9971_v52, %v4555_v18  ;;  %v4611_v36 = vadd.f32 %v9976_v24, %v4557_v31 }
 0x3c4   :  { %v4640_v35 = vmax.f32 %v4608_v17, 0.0  ;;  %v4642_v56 = vmax.f32 %v4610_v59, 0.0  ;;  %v4558_v37 = vadd.f32 %v4448_v45, %v4010_v50  ;;  %v4560_v16 = vadd.f32 %v4521_v33, %v4012_v32  ;;  %v4450_v34 = vpop.f32.mrf.mxu0  ;;  %v4523_v22 = vpop.f32.mrf.mxu1 }
 0x3c5   :  { %v4764_v0 = vmax.bf16 %v7676_v39, %v7675_v2  ;;  %v4641_v38 = vmax.f32 %v4609_v7, 0.0  ;;  %v4643_v54 = vmax.f32 %v4611_v36, 0.0  ;;  %v4559_v63 = vadd.f32 %v4450_v34, %v4011_v27 }
 0x3c6   :  { %v4015_v26 = vadd.f32 %v10155_v6, %v3467_v47  ;;  %v4612_v46 = vadd.f32 %v9963_v5, %v4558_v37  ;;  %v4614_v20 = vadd.f32 %v9968_v41, %v4560_v16  ;;  %v4561_v50 = vadd.f32 %v4523_v22, %v4013_v25  ;;  %v4452_v32 = vpop.f32.mrf.mxu0  ;;  %v4525_v43 = vpop.f32.mrf.mxu1 }
 0x3c7   :  { %v7677_v60 = vpack.c.bf16 %v4641_v38, %v4640_v35  ;;  %v7678_v3 = vpack.c.bf16 %v4643_v54, %v4642_v56  ;;  %v4613_v18 = vadd.f32 %v9971_v52, %v4559_v63  ;;  %v10023_v31 = vsel %vm10012_vm10, %v4764_v0, 4286644096 }
 0x3c8   :  { %v4644_v27 = vmax.f32 %v4612_v46, 0.0  ;;  %v4615_v47 = vadd.f32 %v9976_v24, %v4561_v50  ;;  %v4562_v40 = vadd.f32 %v4452_v32, %v4014_v15  ;;  %v4454_v4 = vpop.f32.mrf.mxu0  ;;  %v4527_v17 = vpop.f32.mrf.mxu1  ;;  %v4564_v45 = vadd.f32 %v4525_v43, %v4016_v1 }
 0x3c9   :  { %v4765_v59 = vmax.bf16 %v7678_v3, %v7677_v60  ;;  %v4645_v25 = vmax.f32 %v4613_v18, 0.0  ;;  %v4563_v33 = vadd.f32 %v4454_v4, %v4015_v26  ;;  %v4646_v2 = vmax.f32 %v4614_v20, 0.0 }
 0x3ca   :  { %v4647_v10 = vmax.f32 %v4615_v47, 0.0  ;;  %v4616_v39 = vadd.f32 %v9963_v5, %v4562_v40  ;;  %v4565_v7 = vadd.f32 %v4527_v17, %v4017_v62  ;;  %v4458_v36 = vpop.f32.mrf.mxu0  ;;  %v4531_v35 = vpop.f32.mrf.mxu1  ;;  %v4618_v15 = vadd.f32 %v9968_v41, %v4564_v45 }
 0x3cb   :  { %v10029_v56 = vsel %vm10012_vm10, %v4765_v59, 4286644096  ;;  %v7679_v37 = vpack.c.bf16 %v4645_v25, %v4644_v27  ;;  %v4617_v16 = vadd.f32 %v9971_v52, %v4563_v33  ;;  %v4566_v0 = vadd.f32 %v4458_v36, %v9925_v44 }
 0x3cc   :  { %v7680_v34 = vpack.c.bf16 %v4647_v10, %v4646_v2  ;;  %v4648_v22 = vmax.f32 %v4616_v39, 0.0  ;;  %v4619_v1 = vadd.f32 %v9976_v24, %v4565_v7  ;;  %v4460_v38 = vpop.f32.mrf.mxu0  ;;  %v4533_v54 = vpop.f32.mrf.mxu1  ;;  %v4650_v63 = vmax.f32 %v4618_v15, 0.0 }
 0x3cd   :  { %v4649_v6 = vmax.f32 %v4617_v16, 0.0  ;;  %v4568_v26 = vadd.f32 %v4531_v35, %v9928_v42  ;;  %v4567_v46 = vadd.f32 %v4460_v38, %v9930_v29  ;;  %v4620_v32 = vadd.f32 %v9963_v5, %v4566_v0 }
 0x3ce   :  { %v4766_v20 = vmax.bf16 %v7680_v34, %v7679_v37  ;;  %v4651_v50 = vmax.f32 %v4619_v1, 0.0  ;;  %v4569_v43 = vadd.f32 %v4533_v54, %v9932_v48  ;;  %v4462_v28 = vpop.f32.mrf.mxu0  ;;  %v4535_v62 = vpop.f32.mrf.mxu1 }
 0x3cf   :  { %v7681_v60 = vpack.c.bf16 %v4649_v6, %v4648_v22  ;;  %v4622_v3 = vadd.f32 %v9968_v41, %v4568_v26  ;;  %v4621_v44 = vadd.f32 %v9971_v52, %v4567_v46  ;;  %v4570_v18 = vadd.f32 %v4462_v28, %v9934_v53 }
 0x3d0   :  { %v4782_v42 = vsel %vm10012_vm10, %v4766_v20, 4286644096  ;;  %v7682_v27 = vpack.c.bf16 %v4651_v50, %v4650_v63  ;;  %v4652_v29 = vmax.f32 %v4620_v32, 0.0  ;;  %v4623_v47 = vadd.f32 %v9976_v24, %v4569_v43  ;;  %v4464_v40 = vpop.f32.mrf.mxu0  ;;  %v4537_v4 = vpop.f32.mrf.mxu1 }
 0x3d1   :  { %v4654_v17 = vmax.f32 %v4622_v3, 0.0  ;;  %v4653_v48 = vmax.f32 %v4621_v44, 0.0  ;;  %v4624_v59 = vadd.f32 %v9963_v5, %v4570_v18  ;;  %v4572_v25 = vadd.f32 %v4535_v62, %v9936_v57 }
 0x3d2   :  { %v4767_v45 = vmax.bf16 %v7682_v27, %v7681_v60  ;;  %v4655_v33 = vmax.f32 %v4623_v47, 0.0  ;;  %v4571_v2 = vadd.f32 %v4464_v40, %v9938_v23  ;;  %v4573_v53 = vadd.f32 %v4537_v4, %v9940_v21  ;;  %v4468_v10 = vpop.f32.mrf.mxu0  ;;  %v4541_v39 = vpop.f32.mrf.mxu1 }
 0x3d3   :  { %v7683_v7 = vpack.c.bf16 %v4653_v48, %v4652_v29  ;;  %v4656_v36 = vmax.f32 %v4624_v59, 0.0  ;;  %v4626_v35 = vadd.f32 %v9968_v41, %v4572_v25  ;;  %v4574_v37 = vadd.f32 %v4468_v10, %v9942_v19  ;;  %v8358_v10 = vld [vmem:[#allocation9 + $0xe0] ss:$16 sps:$4 sm:$0xff]  }
 0x3d4   :  { %v4785_v15 = vsel %vm10012_vm10, %v4767_v45, 4286644096  ;;  %v7684_v16 = vpack.c.bf16 %v4655_v33, %v4654_v17  ;;  %v4625_v57 = vadd.f32 %v9971_v52, %v4571_v2  ;;  %v4627_v34 = vadd.f32 %v9976_v24, %v4573_v53  ;;  %v4470_v22 = vpop.f32.mrf.mxu0  ;;  %v4543_v23 = vpop.f32.mrf.mxu1 }
 0x3d5   :  { %v4658_v21 = vmax.f32 %v4626_v35, 0.0  ;;  %v4628_v1 = vadd.f32 %v9963_v5, %v4574_v37  ;;  %v4576_v0 = vadd.f32 %v4541_v39, %v9944_v51  ;;  %v4575_v38 = vadd.f32 %v4470_v22, %v9946_v61 }
 0x3d6   :  { %v4768_v54 = vmax.bf16 %v7684_v16, %v7683_v7  ;;  %v4657_v19 = vmax.f32 %v4625_v57, 0.0  ;;  %v4659_v63 = vmax.f32 %v4627_v34, 0.0  ;;  %v4577_v6 = vadd.f32 %v4543_v23, %v9948_v13  ;;  %v4472_v26 = vpop.f32.mrf.mxu0  ;;  %v4545_v46 = vpop.f32.mrf.mxu1  ;;  %v8372_v57 = vld [vmem:[#allocation9 + $0xa4] ss:$16 sps:$4 sm:$0xff]   ;;  %v8375_v34 = vld [vmem:[#allocation9 + $0xac] ss:$16 sps:$4 sm:$0xff]  }
 0x3d7   :  { %v4660_v20 = vmax.f32 %v4628_v1, 0.0  ;;  %v4630_v50 = vadd.f32 %v9968_v41, %v4576_v0  ;;  %v4629_v32 = vadd.f32 %v9971_v52, %v4575_v38  ;;  %v4578_v43 = vadd.f32 %v4472_v26, %v9950_v49  ;;  %v8370_v23 = vld [vmem:[#allocation9 + $0xa0] ss:$16 sps:$4 sm:$0xff]   ;;  %v8378_v0 = vld [vmem:[#allocation9 + $0x84] ss:$16 sps:$4 sm:$0xff]  }
 0x3d8   :  { %v4789_v28 = vsel %vm10012_vm10, %v4768_v54, 4286644096  ;;  %v7685_v51 = vpack.c.bf16 %v4657_v19, %v4656_v36  ;;  %v7686_v62 = vpack.c.bf16 %v4659_v63, %v4658_v21  ;;  %v4631_v61 = vadd.f32 %v9976_v24, %v4577_v6  ;;  %v4474_v60 = vpop.f32.mrf.mxu0  ;;  %v4547_v3 = vpop.f32.mrf.mxu1  ;;  %v8373_v21 = vld [vmem:[#allocation9 + $0xa8] ss:$16 sps:$4 sm:$0xff]   ;;  %v8381_v38 = vld [vmem:[#allocation9 + $0x8c] ss:$16 sps:$4 sm:$0xff]  }
 0x3d9   :  { %v4662_v44 = vmax.f32 %v4630_v50, 0.0  ;;  %v4661_v13 = vmax.f32 %v4629_v32, 0.0  ;;  %v4632_v18 = vadd.f32 %v9963_v5, %v4578_v43  ;;  %v4580_v27 = vadd.f32 %v4545_v46, %v9952_v55  ;;  %v8376_v54 = vld [vmem:[#allocation9 + $0x80] ss:$16 sps:$4 sm:$0xff]   ;;  %v8379_v19 = vld [vmem:[#allocation9 + $0x88] ss:$16 sps:$4 sm:$0xff]  }
 0x3da   :  { %v4769_v29 = vmax.bf16 %v7686_v62, %v7685_v51  ;;  %v4663_v47 = vmax.f32 %v4631_v61, 0.0  ;;  %v4579_v40 = vadd.f32 %v4474_v60, %v9954_v14  ;;  %v4581_v49 = vadd.f32 %v4547_v3, %v9956_v58  ;;  %v8361_v14 = vld [vmem:[#allocation9 + $0xe8] ss:$16 sps:$4 sm:$0xff]   ;;  %v8384_v63 = vld [vmem:[#allocation9 + $0x64] ss:$16 sps:$4 sm:$0xff]  }
 0x3db   :  { %v7687_v4 = vpack.c.bf16 %v4661_v13, %v4660_v20  ;;  %v4664_v17 = vmax.f32 %v4632_v18, 0.0  ;;  %v4634_v48 = vadd.f32 %v9968_v41, %v4580_v27  ;;  %v4787_v59 = vmax.bf16 %v4785_v15, %v4782_v42  ;;  %v8367_v15 = vld [vmem:[#allocation9 + $0xc8] ss:$16 sps:$4 sm:$0xff]   ;;  %v8387_v6 = vld [vmem:[#allocation9 + $0x6c] ss:$16 sps:$4 sm:$0xff]   ;;  %v4850_v3 = vld [vmem:[#allocation9 + $0x180] sm:$0xff] }
 0x3dc   :  { %v4792_v25 = vsel %vm10012_vm10, %v4769_v29, 4286644096  ;;  %v7688_v45 = vpack.c.bf16 %v4663_v47, %v4662_v44  ;;  %v4633_v33 = vadd.f32 %v9971_v52, %v4579_v40  ;;  %v4635_v5 = vadd.f32 %v9976_v24, %v4581_v49  ;;  %v8366_v52 = vld [vmem:[#allocation9 + $0xc4] ss:$16 sps:$4 sm:$0xff]   ;;  %v8369_v24 = vld [vmem:[#allocation9 + $0xcc] ss:$16 sps:$4 sm:$0xff]  }
 0x3dd   :  { %v4666_v55 = vmax.f32 %v4634_v48, 0.0  ;;  %v7362_v2 = vcombine.low %v4787_v59, %v4787_v59  ;;  %v7363_v53 = vcombine.high %v4787_v59, %v4787_v59  ;;  %v10076_v58 = vmax.bf16 %v10029_v56, %v10023_v31  ;;  %v8364_v56 = vld [vmem:[#allocation9 + $0xc0] ss:$16 sps:$4 sm:$0xff]   ;;  %v8385_v26 = vld [vmem:[#allocation9 + $0x68] ss:$16 sps:$4 sm:$0xff]  }
 0x3de   :  { %v4770_v39 = vmax.bf16 %v7688_v45, %v7687_v4  ;;  %v4665_v41 = vmax.f32 %v4633_v33, 0.0  ;;  %v4667_v42 = vmax.f32 %v4635_v5, 0.0  ;;  %v10078_v7 = vmax.bf16 %v4792_v25, %v4789_v28  ;;  %v8390_v46 = vld [vmem:[#allocation9 + $0x44] ss:$16 sps:$4 sm:$0xff]   ;;  %v8393_v20 = vld [vmem:[#allocation9 + $0x4c] ss:$16 sps:$4 sm:$0xff]  }
 0x3df   :  { %7417 = vmatprep.mubr.msk.bf16.mxu0 %vm5159_vm11, %v7363_v53  ;;  %7419 = vmatprep.mubr.msk.bf16.mxu1 %vm5159_vm11, %v7363_v53  ;;  %v7421_v31 = vcombine.high %v10076_v58, %v10076_v58  ;;  %v8388_v50 = vld [vmem:[#allocation9 + $0x40] ss:$16 sps:$4 sm:$0xff]   ;;  %v8391_v32 = vld [vmem:[#allocation9 + $0x48] ss:$16 sps:$4 sm:$0xff]   ;;  %v8396_v43 = vld [vmem:[#allocation9 + $0x24] ss:$16 sps:$4 sm:$0xff]   ;;  %v7471_v27 = vcombine.high %v4850_v3, %v4850_v3  ;;  %v7470_v47 = vcombine.low %v4850_v3, %v4850_v3 }
 0x3e0   :  { %v4796_v36 = vsel %vm10012_vm10, %v4770_v39, 4286644096  ;;  %v7689_v35 = vpack.c.bf16 %v4665_v41, %v4664_v17  ;;  %v7690_v37 = vpack.c.bf16 %v4667_v42, %v4666_v55  ;;  %5208 = vmatmul.mubr.bf16.vlgmr.msra.gmra.mxu0 %v7362_v2  ;;  %5249 = vmatmul.mubr.bf16.vlgmr.msra.gmra.mxu1 %v7362_v2  ;;  %v8399_v28 = vld [vmem:[#allocation9 + $0x2c] ss:$16 sps:$4 sm:$0xff]   ;;  %v8394_v51 = vld [vmem:[#allocation9 + $0x20] ss:$16 sps:$4 sm:$0xff]  }
 0x3e1   :  { %5529 = vmatpush1.bf16.msra.mxu0 %v8358_v10  ;;  %5570 = vmatpush1.bf16.msra.mxu1 %v8361_v14  ;;  %v8397_v62 = vld [vmem:[#allocation9 + $0x28] ss:$16 sps:$4 sm:$0xff]   ;;  %v8402_v61 = vld [vmem:[#allocation9 + $0x4] ss:$16 sps:$4 sm:$0xff]   ;;  %v8405_v60 = vld [vmem:[#allocation9 + $0xc] ss:$16 sps:$4 sm:$0xff]  }
 0x3e2   :  { %v4771_v16 = vmax.bf16 %v7690_v37, %v7689_v35  ;;  %7475 = vmatprep.mubr.msk.bf16.mxu0 %vm5159_vm11, %v7421_v31  ;;  %7477 = vmatprep.mubr.msk.bf16.mxu1 %vm5159_vm11, %v7421_v31  ;;  %v4851_v44 = vld [vmem:[#allocation9 + $0x188] sm:$0xff]  ;;  %v8400_v13 = vld [vmem:[#allocation9] ss:$16 sps:$4 sm:$0xff]   ;;  %v5517_v49 = vsel %vm1762_vm6, %v7470_v47, 0  ;;  %v8412_v17 = vld [vmem:[#allocation9 + $0x164] ss:$16 sps:$4 sm:$0xff]   ;;  %v7420_v37 = vcombine.low %v10076_v58, %v10076_v58 }
 0x3e3   :  { %5530 = vmatprep.subr.bf16.mxu0 %v8366_v52  ;;  %5571 = vmatprep.subr.bf16.mxu1 %v8369_v24  ;;  %v8403_v18 = vld [vmem:[#allocation9 + $0x8] ss:$16 sps:$4 sm:$0xff]   ;;  %v7473_v29 = vcombine.high %v4851_v44, %v4851_v44  ;;  %v7472_v40 = vcombine.low %v4851_v44, %v4851_v44  ;;  %v8415_v48 = vld [vmem:[#allocation9 + $0x16c] ss:$16 sps:$4 sm:$0xff]   ;;  %v8410_v59 = vld [vmem:[#allocation9 + $0x160] ss:$16 sps:$4 sm:$0xff]  }
 0x3e4   :  { %v4799_v22 = vsel %vm10012_vm10, %v4771_v16, 4286644096  ;;  %v8413_v25 = vld [vmem:[#allocation9 + $0x168] ss:$16 sps:$4 sm:$0xff]   ;;  %v8418_v45 = vld [vmem:[#allocation9 + $0x144] ss:$16 sps:$4 sm:$0xff]  }
 0x3e5   :  { %5531 = vmatpush1.bf16.msra.mxu0 %v8364_v56  ;;  %5572 = vmatpush1.bf16.msra.mxu1 %v8367_v15  ;;  %v10090_v1 = vmax.bf16 %v4799_v22, %v4796_v36  ;;  %v5523_v4 = vsel %vm1762_vm6, %v7472_v40, 0  ;;  %v8421_v33 = vld [vmem:[#allocation9 + $0x14c] ss:$16 sps:$4 sm:$0xff]   ;;  %v8416_v5 = vld [vmem:[#allocation9 + $0x140] ss:$16 sps:$4 sm:$0xff]   ;;  %v7479_v56 = vcombine.high %v10078_v7, %v10078_v7 }
 0x3e6   :  { %5532 = vmatprep.subr.bf16.mxu0 %v8372_v57  ;;  %5573 = vmatprep.subr.bf16.mxu1 %v8375_v34  ;;  %v8419_v55 = vld [vmem:[#allocation9 + $0x148] ss:$16 sps:$4 sm:$0xff]   ;;  %v8424_v2 = vld [vmem:[#allocation9 + $0x124] ss:$16 sps:$4 sm:$0xff]   ;;  %v8427_v53 = vld [vmem:[#allocation9 + $0x12c] ss:$16 sps:$4 sm:$0xff]  }
 0x3e7   :  { %v8422_v10 = vld [vmem:[#allocation9 + $0x120] ss:$16 sps:$4 sm:$0xff]   ;;  %v8425_v14 = vld [vmem:[#allocation9 + $0x128] ss:$16 sps:$4 sm:$0xff]   ;;  %v8430_v39 = vld [vmem:[#allocation9 + $0x104] ss:$16 sps:$4 sm:$0xff]  }
 0x3e8   :  { %v8433_v41 = vld [vmem:[#allocation9 + $0x10c] ss:$16 sps:$4 sm:$0xff]   ;;  %v8428_v42 = vld [vmem:[#allocation9 + $0x100] ss:$16 sps:$4 sm:$0xff]   ;;  %v8431_v52 = vld [vmem:[#allocation9 + $0x108] ss:$16 sps:$4 sm:$0xff]  }
 0x3e9   :  { %5533 = vmatpush1.bf16.msra.mxu0 %v8370_v23  ;;  %5574 = vmatpush1.bf16.msra.mxu1 %v8373_v21  ;;  %v8436_v24 = vld [vmem:[#allocation9 + $0x404] ss:$16 sps:$4 sm:$0xff]   ;;  %v8439_v36 = vld [vmem:[#allocation9 + $0x40c] ss:$16 sps:$4 sm:$0xff]   ;;  %v8434_v35 = vld [vmem:[#allocation9 + $0x400] ss:$16 sps:$4 sm:$0xff]  }
 0x3ea   :  { %5534 = vmatprep.subr.bf16.mxu0 %v8378_v0  ;;  %5575 = vmatprep.subr.bf16.mxu1 %v8381_v38  ;;  %v8437_v31 = vld [vmem:[#allocation9 + $0x408] ss:$16 sps:$4 sm:$0xff]   ;;  %v8442_v15 = vld [vmem:[#allocation9 + $0x3e4] ss:$16 sps:$4 sm:$0xff]   ;;  %v8445_v16 = vld [vmem:[#allocation9 + $0x3ec] ss:$16 sps:$4 sm:$0xff]  }
 0x3eb   :  { %v8440_v57 = vld [vmem:[#allocation9 + $0x3e0] ss:$16 sps:$4 sm:$0xff]   ;;  %v8443_v34 = vld [vmem:[#allocation9 + $0x3e8] ss:$16 sps:$4 sm:$0xff]   ;;  %v8448_v22 = vld [vmem:[#allocation9 + $0x3c4] ss:$16 sps:$4 sm:$0xff]  }
 0x3ec   :  { %v8451_v58 = vld [vmem:[#allocation9 + $0x3cc] ss:$16 sps:$4 sm:$0xff]   ;;  %v8446_v23 = vld [vmem:[#allocation9 + $0x3c0] ss:$16 sps:$4 sm:$0xff]   ;;  %v8449_v21 = vld [vmem:[#allocation9 + $0x3c8] ss:$16 sps:$4 sm:$0xff]  }
 0x3ed   :  { %5535 = vmatpush1.bf16.msra.mxu0 %v8376_v54  ;;  %5576 = vmatpush1.bf16.msra.mxu1 %v8379_v19  ;;  %v8454_v0 = vld [vmem:[#allocation9 + $0x3a4] ss:$16 sps:$4 sm:$0xff]   ;;  %v8457_v38 = vld [vmem:[#allocation9 + $0x3ac] ss:$16 sps:$4 sm:$0xff]   ;;  %v8452_v54 = vld [vmem:[#allocation9 + $0x3a0] ss:$16 sps:$4 sm:$0xff]  }
 0x3ee   :  { %5536 = vmatprep.subr.bf16.mxu0 %v8384_v63  ;;  %5577 = vmatprep.subr.bf16.mxu1 %v8387_v6  ;;  %v8455_v19 = vld [vmem:[#allocation9 + $0x3a8] ss:$16 sps:$4 sm:$0xff]   ;;  %v8460_v63 = vld [vmem:[#allocation9 + $0x384] ss:$16 sps:$4 sm:$0xff]   ;;  %v8463_v6 = vld [vmem:[#allocation9 + $0x38c] ss:$16 sps:$4 sm:$0xff]  }
 0x3ef   :  { %v5659_v3 = vld [vmem:[#allocation9 + $0x4a0] sm:$0xff]  ;;  %v5660_v44 = vld [vmem:[#allocation9 + $0x4a8] sm:$0xff] }
 0x3f0   :  { %v7531_v47 = vcombine.high %v5660_v44, %v5660_v44  ;;  %v7530_v40 = vcombine.low %v5660_v44, %v5660_v44  ;;  %v8552_v44 = vld [vmem:[#allocation9 + $0x4b0] ss:$16 sps:$4 sm:$0xff]  }
 0x3f1   :  { %5537 = vmatpush1.bf16.msra.mxu0 %v8382_v30  ;;  %5578 = vmatpush1.bf16.msra.mxu1 %v8385_v26  ;;  %v8458_v30 = vld [vmem:[#allocation9 + $0x380] ss:$16 sps:$4 sm:$0xff]   ;;  %v8461_v26 = vld [vmem:[#allocation9 + $0x388] ss:$16 sps:$4 sm:$0xff]  }
 0x3f2   :  { %5538 = vmatprep.subr.bf16.mxu0 %v8390_v46  ;;  %5579 = vmatprep.subr.bf16.mxu1 %v8393_v20  ;;  %v8466_v46 = vld [vmem:[#allocation9 + $0x364] ss:$16 sps:$4 sm:$0xff]   ;;  %v8469_v20 = vld [vmem:[#allocation9 + $0x36c] ss:$16 sps:$4 sm:$0xff]  }
 0x3f5   :  { %5539 = vmatpush1.bf16.msra.mxu0 %v8388_v50  ;;  %5580 = vmatpush1.bf16.msra.mxu1 %v8391_v32  ;;  %v8464_v50 = vld [vmem:[#allocation9 + $0x360] ss:$16 sps:$4 sm:$0xff]   ;;  %v8467_v32 = vld [vmem:[#allocation9 + $0x368] ss:$16 sps:$4 sm:$0xff]  }
 0x3f6   :  { %5540 = vmatprep.subr.bf16.mxu0 %v8396_v43  ;;  %5581 = vmatprep.subr.bf16.mxu1 %v8399_v28  ;;  %v8472_v43 = vld [vmem:[#allocation9 + $0x344] ss:$16 sps:$4 sm:$0xff]   ;;  %v8475_v28 = vld [vmem:[#allocation9 + $0x34c] ss:$16 sps:$4 sm:$0xff]  }
 0x3f9   :  { %5541 = vmatpush1.bf16.msra.mxu0 %v8394_v51  ;;  %5582 = vmatpush1.bf16.msra.mxu1 %v8397_v62  ;;  %v8470_v51 = vld [vmem:[#allocation9 + $0x340] ss:$16 sps:$4 sm:$0xff]   ;;  %v8473_v62 = vld [vmem:[#allocation9 + $0x348] ss:$16 sps:$4 sm:$0xff]  }
 0x3fa   :  { %5542 = vmatprep.subr.bf16.mxu0 %v8402_v61  ;;  %5583 = vmatprep.subr.bf16.mxu1 %v8405_v60  ;;  %v8478_v61 = vld [vmem:[#allocation9 + $0x324] ss:$16 sps:$4 sm:$0xff]   ;;  %v8481_v60 = vld [vmem:[#allocation9 + $0x32c] ss:$16 sps:$4 sm:$0xff]  }
 0x3fd   :  { %5543 = vmatpush1.bf16.msra.mxu0 %v8400_v13  ;;  %5584 = vmatpush1.bf16.msra.mxu1 %v8403_v18  ;;  %v8476_v13 = vld [vmem:[#allocation9 + $0x320] ss:$16 sps:$4 sm:$0xff]   ;;  %v8479_v18 = vld [vmem:[#allocation9 + $0x328] ss:$16 sps:$4 sm:$0xff]  }
 0x3fe   :  { %7474 = vmatprep.subr.msk.bf16.mxu0 %vm1762_vm6, %v7471_v27  ;;  %7476 = vmatprep.subr.msk.bf16.mxu1 %vm1762_vm6, %v7473_v29  ;;  %v7529_v27 = vcombine.high %v5659_v3, %v5659_v3  ;;  %v7528_v29 = vcombine.low %v5659_v3, %v5659_v3  ;;  %v6068_v3 = vld [vmem:[#allocation9 + $0x638] sm:$0xff] }
 0x401   :  { %5551 = vmatpush2.bf16.msra.mxu0 %v5517_v49  ;;  %5592 = vmatpush2.bf16.msra.mxu1 %v5523_v4  ;;  %v5921_v49 = vsel %vm1762_vm6, %v7528_v29, 0  ;;  %v8488_v4 = vld [vmem:[#allocation9 + $0x484] ss:$16 sps:$4 sm:$0xff]   ;;  %v7589_v29 = vcombine.high %v6068_v3, %v6068_v3 }
 0x402   :  { %5552 = vmatprep.subr.bf16.mxu0 %v8412_v17  ;;  %5593 = vmatprep.subr.bf16.mxu1 %v8415_v48  ;;  %v5927_v17 = vsel %vm1762_vm6, %v7530_v40, 0  ;;  %v8491_v48 = vld [vmem:[#allocation9 + $0x48c] ss:$16 sps:$4 sm:$0xff]  }
 0x405   :  { %5553 = vmatpush2.bf16.msra.mxu0 %v8410_v59  ;;  %5594 = vmatpush2.bf16.msra.mxu1 %v8413_v25  ;;  %v8486_v59 = vld [vmem:[#allocation9 + $0x480] ss:$16 sps:$4 sm:$0xff]   ;;  %v8489_v25 = vld [vmem:[#allocation9 + $0x488] ss:$16 sps:$4 sm:$0xff]  }
 0x406   :  { %5554 = vmatprep.subr.bf16.mxu0 %v8418_v45  ;;  %5595 = vmatprep.subr.bf16.mxu1 %v8421_v33  ;;  %v8494_v45 = vld [vmem:[#allocation9 + $0x464] ss:$16 sps:$4 sm:$0xff]   ;;  %v8497_v33 = vld [vmem:[#allocation9 + $0x46c] ss:$16 sps:$4 sm:$0xff]  }
 0x409   :  { %5555 = vmatpush2.bf16.msra.mxu0 %v8416_v5  ;;  %5596 = vmatpush2.bf16.msra.mxu1 %v8419_v55  ;;  %v8492_v5 = vld [vmem:[#allocation9 + $0x460] ss:$16 sps:$4 sm:$0xff]   ;;  %v8495_v55 = vld [vmem:[#allocation9 + $0x468] ss:$16 sps:$4 sm:$0xff]  }
 0x40a   :  { %5556 = vmatprep.subr.bf16.mxu0 %v8424_v2  ;;  %5597 = vmatprep.subr.bf16.mxu1 %v8427_v53  ;;  %v8500_v2 = vld [vmem:[#allocation9 + $0x444] ss:$16 sps:$4 sm:$0xff]   ;;  %v8503_v53 = vld [vmem:[#allocation9 + $0x44c] ss:$16 sps:$4 sm:$0xff]  }
 0x40d   :  { %5557 = vmatpush2.bf16.msra.mxu0 %v8422_v10  ;;  %5598 = vmatpush2.bf16.msra.mxu1 %v8425_v14  ;;  %v8498_v10 = vld [vmem:[#allocation9 + $0x440] ss:$16 sps:$4 sm:$0xff]   ;;  %v8501_v14 = vld [vmem:[#allocation9 + $0x448] ss:$16 sps:$4 sm:$0xff]  }
 0x40e   :  { %5558 = vmatprep.subr.bf16.mxu0 %v8430_v39  ;;  %5599 = vmatprep.subr.bf16.mxu1 %v8433_v41  ;;  %v8506_v39 = vld [vmem:[#allocation9 + $0x424] ss:$16 sps:$4 sm:$0xff]   ;;  %v8509_v41 = vld [vmem:[#allocation9 + $0x42c] ss:$16 sps:$4 sm:$0xff]  }
 0x411   :  { %5559 = vmatpush2.bf16.msra.mxu0 %v8428_v42  ;;  %5600 = vmatpush2.bf16.msra.mxu1 %v8431_v52  ;;  %v8504_v42 = vld [vmem:[#allocation9 + $0x420] ss:$16 sps:$4 sm:$0xff]   ;;  %v8507_v52 = vld [vmem:[#allocation9 + $0x428] ss:$16 sps:$4 sm:$0xff]  }
 0x412   :  { %5932 = vmatprep.subr.bf16.mxu0 %v8436_v24  ;;  %5973 = vmatprep.subr.bf16.mxu1 %v8439_v36  ;;  %v8512_v24 = vld [vmem:[#allocation9 + $0x594] ss:$16 sps:$4 sm:$0xff]   ;;  %v8515_v36 = vld [vmem:[#allocation9 + $0x59c] ss:$16 sps:$4 sm:$0xff]  }
 0x414   :  { %5561 = vmatmul.mubr.bf16.vlgmr.msra.gmra.mxu0 %v7420_v37  ;;  %5602 = vmatmul.mubr.bf16.vlgmr.msra.gmra.mxu1 %v7420_v37  ;;  %v7478_v37 = vcombine.low %v10078_v7, %v10078_v7  ;;  %v8527_v7 = vld [vmem:[#allocation9 + $0x55c] ss:$16 sps:$4 sm:$0xff]  }
 0x415   :  { %5933 = vmatpush1.bf16.msra.mxu0 %v8434_v35  ;;  %7533 = vmatprep.mubr.msk.bf16.mxu0 %vm5159_vm11, %v7479_v56  ;;  %v8510_v35 = vld [vmem:[#allocation9 + $0x590] ss:$16 sps:$4 sm:$0xff]  }
 0x416   :  { %5974 = vmatpush1.bf16.msra.mxu1 %v8437_v31  ;;  %7535 = vmatprep.mubr.msk.bf16.mxu1 %vm5159_vm11, %v7479_v56  ;;  %v8513_v31 = vld [vmem:[#allocation9 + $0x598] ss:$16 sps:$4 sm:$0xff]   ;;  %v8518_v56 = vld [vmem:[#allocation9 + $0x574] ss:$16 sps:$4 sm:$0xff]  }
 0x417   :  { %5934 = vmatprep.subr.bf16.mxu0 %v8442_v15  ;;  %5975 = vmatprep.subr.bf16.mxu1 %v8445_v16  ;;  %v7537_v15 = vcombine.high %v10090_v1, %v10090_v1  ;;  %v8521_v16 = vld [vmem:[#allocation9 + $0x57c] ss:$16 sps:$4 sm:$0xff]  }
 0x419   :  { %5935 = vmatpush1.bf16.msra.mxu0 %v8440_v57  ;;  %v8516_v57 = vld [vmem:[#allocation9 + $0x570] ss:$16 sps:$4 sm:$0xff]  }
 0x41a   :  { %5976 = vmatpush1.bf16.msra.mxu1 %v8443_v34  ;;  %5936 = vmatprep.subr.bf16.mxu0 %v8448_v22  ;;  %v8519_v34 = vld [vmem:[#allocation9 + $0x578] ss:$16 sps:$4 sm:$0xff]   ;;  %v8524_v22 = vld [vmem:[#allocation9 + $0x554] ss:$16 sps:$4 sm:$0xff]  }
 0x41b   :  { %5977 = vmatprep.subr.bf16.mxu1 %v8451_v58  ;;  %v8522_v58 = vld [vmem:[#allocation9 + $0x550] ss:$16 sps:$4 sm:$0xff]  }
 0x41d   :  { %5937 = vmatpush1.bf16.msra.mxu0 %v8446_v23  ;;  %v8525_v23 = vld [vmem:[#allocation9 + $0x558] ss:$16 sps:$4 sm:$0xff]  }
 0x41e   :  { %5978 = vmatpush1.bf16.msra.mxu1 %v8449_v21  ;;  %5938 = vmatprep.subr.bf16.mxu0 %v8454_v0  ;;  %v8530_v21 = vld [vmem:[#allocation9 + $0x534] ss:$16 sps:$4 sm:$0xff]   ;;  %v8533_v0 = vld [vmem:[#allocation9 + $0x53c] ss:$16 sps:$4 sm:$0xff]  }
 0x41f   :  { %5979 = vmatprep.subr.bf16.mxu1 %v8457_v38  ;;  %v8528_v38 = vld [vmem:[#allocation9 + $0x530] ss:$16 sps:$4 sm:$0xff]  }
 0x421   :  { %5939 = vmatpush1.bf16.msra.mxu0 %v8452_v54  ;;  %v8531_v54 = vld [vmem:[#allocation9 + $0x538] ss:$16 sps:$4 sm:$0xff]  }
 0x422   :  { %5980 = vmatpush1.bf16.msra.mxu1 %v8455_v19  ;;  %5940 = vmatprep.subr.bf16.mxu0 %v8460_v63  ;;  %v8536_v19 = vld [vmem:[#allocation9 + $0x514] ss:$16 sps:$4 sm:$0xff]   ;;  %v8539_v63 = vld [vmem:[#allocation9 + $0x51c] ss:$16 sps:$4 sm:$0xff]  }
 0x423   :  { %5981 = vmatprep.subr.bf16.mxu1 %v8463_v6  ;;  %v8534_v6 = vld [vmem:[#allocation9 + $0x510] ss:$16 sps:$4 sm:$0xff]  }
 0x425   :  { %5941 = vmatpush1.bf16.msra.mxu0 %v8458_v30  ;;  %v8537_v30 = vld [vmem:[#allocation9 + $0x518] ss:$16 sps:$4 sm:$0xff]  }
 0x426   :  { %5982 = vmatpush1.bf16.msra.mxu1 %v8461_v26  ;;  %5942 = vmatprep.subr.bf16.mxu0 %v8466_v46  ;;  %v8542_v26 = vld [vmem:[#allocation9 + $0x4f4] ss:$16 sps:$4 sm:$0xff]   ;;  %v8545_v46 = vld [vmem:[#allocation9 + $0x4fc] ss:$16 sps:$4 sm:$0xff]  }
 0x427   :  { %5983 = vmatprep.subr.bf16.mxu1 %v8469_v20  ;;  %v8540_v20 = vld [vmem:[#allocation9 + $0x4f0] ss:$16 sps:$4 sm:$0xff]  }
 0x429   :  { %5943 = vmatpush1.bf16.msra.mxu0 %v8464_v50  ;;  %v8543_v50 = vld [vmem:[#allocation9 + $0x4f8] ss:$16 sps:$4 sm:$0xff]  }
 0x42a   :  { %5984 = vmatpush1.bf16.msra.mxu1 %v8467_v32  ;;  %5944 = vmatprep.subr.bf16.mxu0 %v8472_v43  ;;  %v8548_v32 = vld [vmem:[#allocation9 + $0x4d4] ss:$16 sps:$4 sm:$0xff]   ;;  %v8551_v43 = vld [vmem:[#allocation9 + $0x4dc] ss:$16 sps:$4 sm:$0xff]  }
 0x42b   :  { %5985 = vmatprep.subr.bf16.mxu1 %v8475_v28  ;;  %v8546_v28 = vld [vmem:[#allocation9 + $0x4d0] ss:$16 sps:$4 sm:$0xff]  }
 0x42d   :  { %5945 = vmatpush1.bf16.msra.mxu0 %v8470_v51  ;;  %v8549_v51 = vld [vmem:[#allocation9 + $0x4d8] ss:$16 sps:$4 sm:$0xff]  }
 0x42e   :  { %5986 = vmatpush1.bf16.msra.mxu1 %v8473_v62  ;;  %5946 = vmatprep.subr.bf16.mxu0 %v8478_v61  ;;  %v8554_v62 = vld [vmem:[#allocation9 + $0x4b4] ss:$16 sps:$4 sm:$0xff]   ;;  %v8557_v61 = vld [vmem:[#allocation9 + $0x4bc] ss:$16 sps:$4 sm:$0xff]  }
 0x42f   :  { %5987 = vmatprep.subr.bf16.mxu1 %v8481_v60  ;;  %v6067_v60 = vld [vmem:[#allocation9 + $0x630] sm:$0xff] }
 0x431   :  { %5947 = vmatpush1.bf16.msra.mxu0 %v8476_v13  ;;  %v8555_v13 = vld [vmem:[#allocation9 + $0x4b8] ss:$16 sps:$4 sm:$0xff]  }
 0x432   :  { %5988 = vmatpush1.bf16.msra.mxu1 %v8479_v18  ;;  %7532 = vmatprep.subr.msk.bf16.mxu0 %vm1762_vm6, %v7529_v27  ;;  %v7587_v18 = vcombine.high %v6067_v60, %v6067_v60  ;;  %v7586_v27 = vcombine.low %v6067_v60, %v6067_v60  ;;  %v8611_v60 = vld [vmem:[#allocation12 + $0xc8] sm:$0xff]  }
 0x433   :  { %7534 = vmatprep.subr.msk.bf16.mxu1 %vm1762_vm6, %v7531_v47  ;;  %v7588_v47 = vcombine.low %v6068_v3, %v6068_v3  ;;  %v8612_v3 = vld [vmem:[#allocation12 + $0x8] sm:$0xff]  }
 0x434   :  { %v6329_v40 = vsel %vm1762_vm6, %v7586_v27, 0  ;;  %v8616_v27 = vld [vmem:[#allocation12] sm:$0xff]  }
 0x435   :  { %5955 = vmatpush2.bf16.msra.mxu0 %v5921_v49  ;;  %v8564_v49 = vld [vmem:[#allocation9 + $0x614] ss:$16 sps:$4 sm:$0xff]  }
 0x436   :  { %5996 = vmatpush2.bf16.msra.mxu1 %v5927_v17  ;;  %5956 = vmatprep.subr.bf16.mxu0 %v8488_v4  ;;  %v6335_v4 = vsel %vm1762_vm6, %v7588_v47, 0  ;;  %v8567_v17 = vld [vmem:[#allocation9 + $0x61c] ss:$16 sps:$4 sm:$0xff]  }
 0x437   :  { %5997 = vmatprep.subr.bf16.mxu1 %v8491_v48  ;;  %v8562_v48 = vld [vmem:[#allocation9 + $0x610] ss:$16 sps:$4 sm:$0xff]  }
 0x439   :  { %5957 = vmatpush2.bf16.msra.mxu0 %v8486_v59  ;;  %v8565_v59 = vld [vmem:[#allocation9 + $0x618] ss:$16 sps:$4 sm:$0xff]  }
 0x43a   :  { %5998 = vmatpush2.bf16.msra.mxu1 %v8489_v25  ;;  %5958 = vmatprep.subr.bf16.mxu0 %v8494_v45  ;;  %v8570_v25 = vld [vmem:[#allocation9 + $0x5f4] ss:$16 sps:$4 sm:$0xff]   ;;  %v8573_v45 = vld [vmem:[#allocation9 + $0x5fc] ss:$16 sps:$4 sm:$0xff]  }
 0x43b   :  { %5999 = vmatprep.subr.bf16.mxu1 %v8497_v33  ;;  %v8568_v33 = vld [vmem:[#allocation9 + $0x5f0] ss:$16 sps:$4 sm:$0xff]  }
 0x43d   :  { %5959 = vmatpush2.bf16.msra.mxu0 %v8492_v5  ;;  %v8571_v5 = vld [vmem:[#allocation9 + $0x5f8] ss:$16 sps:$4 sm:$0xff]  }
 0x43e   :  { %6000 = vmatpush2.bf16.msra.mxu1 %v8495_v55  ;;  %5960 = vmatprep.subr.bf16.mxu0 %v8500_v2  ;;  %v8576_v55 = vld [vmem:[#allocation9 + $0x5d4] ss:$16 sps:$4 sm:$0xff]   ;;  %v8579_v2 = vld [vmem:[#allocation9 + $0x5dc] ss:$16 sps:$4 sm:$0xff]  }
 0x43f   :  { %6001 = vmatprep.subr.bf16.mxu1 %v8503_v53  ;;  %v8574_v53 = vld [vmem:[#allocation9 + $0x5d0] ss:$16 sps:$4 sm:$0xff]  }
 0x441   :  { %5961 = vmatpush2.bf16.msra.mxu0 %v8498_v10  ;;  %v8577_v10 = vld [vmem:[#allocation9 + $0x5d8] ss:$16 sps:$4 sm:$0xff]  }
 0x442   :  { %6002 = vmatpush2.bf16.msra.mxu1 %v8501_v14  ;;  %5962 = vmatprep.subr.bf16.mxu0 %v8506_v39  ;;  %v8582_v14 = vld [vmem:[#allocation9 + $0x5b4] ss:$16 sps:$4 sm:$0xff]   ;;  %v8585_v39 = vld [vmem:[#allocation9 + $0x5bc] ss:$16 sps:$4 sm:$0xff]  }
 0x443   :  { %6003 = vmatprep.subr.bf16.mxu1 %v8509_v41  ;;  %v8580_v41 = vld [vmem:[#allocation9 + $0x5b0] ss:$16 sps:$4 sm:$0xff]  }
 0x445   :  { %5963 = vmatpush2.bf16.msra.mxu0 %v8504_v42  ;;  %v8583_v42 = vld [vmem:[#allocation9 + $0x5b8] ss:$16 sps:$4 sm:$0xff]  }
 0x446   :  { %6004 = vmatpush2.bf16.msra.mxu1 %v8507_v52  ;;  %6340 = vmatprep.subr.bf16.mxu0 %v8512_v24  ;;  %v7536_v52 = vcombine.low %v10090_v1, %v10090_v1  ;;  %v8586_v24 = vld [vmem:[#allocation12 + $0x78] sm:$0xff]   ;;  %v8596_v1 = vld [vmem:[#allocation12 + $0x28] sm:$0xff]  }
 0x447   :  { %6381 = vmatprep.subr.bf16.mxu1 %v8515_v36  ;;  %v8587_v36 = vld [vmem:[#allocation12 + $0xf8] sm:$0xff]  }
 0x448   :  { %5965 = vmatmul.mubr.bf16.vlgmr.msra.gmra.mxu0 %v7478_v37 }
 0x449   :  { %6006 = vmatmul.mubr.bf16.vlgmr.msra.gmra.mxu1 %v7478_v37  ;;  %6341 = vmatpush1.bf16.msra.mxu0 %v8510_v35  ;;  %v8588_v35 = vld [vmem:[#allocation12 + $0x38] sm:$0xff]  }
 0x44a   :  { %7591 = vmatprep.mubr.msk.bf16.mxu0 %vm5159_vm11, %v7537_v15  ;;  %6382 = vmatpush1.bf16.msra.mxu1 %v8513_v31  ;;  %v8589_v37 = vld [vmem:[#allocation12 + $0xb8] sm:$0xff]   ;;  %v8590_v31 = vld [vmem:[#allocation12 + $0x70] sm:$0xff]  }
 0x44b   :  { %7593 = vmatprep.mubr.msk.bf16.mxu1 %vm5159_vm11, %v7537_v15  ;;  %6342 = vmatprep.subr.bf16.mxu0 %v8518_v56  ;;  %v8591_v56 = vld [vmem:[#allocation12 + $0xf0] sm:$0xff]  }
 0x44c   :  { %6383 = vmatprep.subr.bf16.mxu1 %v8521_v16  ;;  %v8592_v15 = vld [vmem:[#allocation12 + $0x30] sm:$0xff]  }
 0x44d   :  { %6343 = vmatpush1.bf16.msra.mxu0 %v8516_v57  ;;  %v8593_v16 = vld [vmem:[#allocation12 + $0xb0] sm:$0xff]   ;;  %v8594_v57 = vld [vmem:[#allocation12 + $0x68] sm:$0xff]  }
 0x44e   :  { %6384 = vmatpush1.bf16.msra.mxu1 %v8519_v34  ;;  %6344 = vmatprep.subr.bf16.mxu0 %v8524_v22  ;;  %v8595_v34 = vld [vmem:[#allocation12 + $0xe8] sm:$0xff]  }
 0x44f   :  { %6385 = vmatprep.subr.bf16.mxu1 %v8527_v7  ;;  %v8597_v22 = vld [vmem:[#allocation12 + $0xa8] sm:$0xff]   ;;  %v8598_v7 = vld [vmem:[#allocation12 + $0x60] sm:$0xff]  }
 0x451   :  { %6345 = vmatpush1.bf16.msra.mxu0 %v8522_v58  ;;  %v8599_v58 = vld [vmem:[#allocation12 + $0xe0] sm:$0xff]  }
 0x452   :  { %6386 = vmatpush1.bf16.msra.mxu1 %v8525_v23  ;;  %6346 = vmatprep.subr.bf16.mxu0 %v8530_v21  ;;  %v8600_v23 = vld [vmem:[#allocation12 + $0x20] sm:$0xff]  }
 0x453   :  { %6387 = vmatprep.subr.bf16.mxu1 %v8533_v0  ;;  %v8601_v21 = vld [vmem:[#allocation12 + $0xa0] sm:$0xff]   ;;  %v8602_v0 = vld [vmem:[#allocation12 + $0x58] sm:$0xff]  }
 0x455   :  { %6347 = vmatpush1.bf16.msra.mxu0 %v8528_v38  ;;  %v8603_v38 = vld [vmem:[#allocation12 + $0xd8] sm:$0xff]  }
 0x456   :  { %6388 = vmatpush1.bf16.msra.mxu1 %v8531_v54  ;;  %6348 = vmatprep.subr.bf16.mxu0 %v8536_v19  ;;  %v8604_v54 = vld [vmem:[#allocation12 + $0x18] sm:$0xff]  }
 0x457   :  { %6389 = vmatprep.subr.bf16.mxu1 %v8539_v63  ;;  %v8605_v19 = vld [vmem:[#allocation12 + $0x98] sm:$0xff]  }
 0x459   :  { %6349 = vmatpush1.bf16.msra.mxu0 %v8534_v6 }
 0x45a   :  { %6390 = vmatpush1.bf16.msra.mxu1 %v8537_v30  ;;  %6350 = vmatprep.subr.bf16.mxu0 %v8542_v26 }
 0x45b   :  { %6391 = vmatprep.subr.bf16.mxu1 %v8545_v46 }
 0x45d   :  { %6351 = vmatpush1.bf16.msra.mxu0 %v8540_v20 }
 0x45e   :  { %6392 = vmatpush1.bf16.msra.mxu1 %v8543_v50  ;;  %6352 = vmatprep.subr.bf16.mxu0 %v8548_v32 }
 0x45f   :  { %6393 = vmatprep.subr.bf16.mxu1 %v8551_v43  ;;  %v8606_v43 = vld [vmem:[#allocation12 + $0x50] sm:$0xff]  }
 0x461   :  { %6353 = vmatpush1.bf16.msra.mxu0 %v8546_v28  ;;  %v8607_v28 = vld [vmem:[#allocation12 + $0xd0] sm:$0xff]  }
 0x462   :  { %6394 = vmatpush1.bf16.msra.mxu1 %v8549_v51  ;;  %6354 = vmatprep.subr.bf16.mxu0 %v8554_v62  ;;  %v8608_v51 = vld [vmem:[#allocation12 + $0x10] sm:$0xff]  }
 0x463   :  { %6395 = vmatprep.subr.bf16.mxu1 %v8557_v61  ;;  %v8609_v62 = vld [vmem:[#allocation12 + $0x90] sm:$0xff]   ;;  %v8610_v61 = vld [vmem:[#allocation12 + $0x48] sm:$0xff]  }
 0x465   :  { %6355 = vmatpush1.bf16.msra.mxu0 %v8552_v44  ;;  %v8613_v44 = vld [vmem:[#allocation12 + $0x88] sm:$0xff]  }
 0x466   :  { %6396 = vmatpush1.bf16.msra.mxu1 %v8555_v13  ;;  %7590 = vmatprep.subr.msk.bf16.mxu0 %vm1762_vm6, %v7587_v18  ;;  %v8614_v13 = vld [vmem:[#allocation12 + $0x40] sm:$0xff]  }
 0x467   :  { %7592 = vmatprep.subr.msk.bf16.mxu1 %vm1762_vm6, %v7589_v29  ;;  %v8615_v18 = vld [vmem:[#allocation12 + $0xc0] sm:$0xff]  }
 0x468   :  { %v8617_v29 = vld [vmem:[#allocation12 + $0x80] sm:$0xff]  }
 0x469   :  { %6363 = vmatpush2.bf16.msra.mxu0 %v6329_v40 }
 0x46a   :  { %6404 = vmatpush2.bf16.msra.mxu1 %v6335_v4  ;;  %6364 = vmatprep.subr.bf16.mxu0 %v8564_v49 }
 0x46b   :  { %6405 = vmatprep.subr.bf16.mxu1 %v8567_v17 }
 0x46d   :  { %6365 = vmatpush2.bf16.msra.mxu0 %v8562_v48 }
 0x46e   :  { %6406 = vmatpush2.bf16.msra.mxu1 %v8565_v59  ;;  %6366 = vmatprep.subr.bf16.mxu0 %v8570_v25 }
 0x46f   :  { %6407 = vmatprep.subr.bf16.mxu1 %v8573_v45 }
 0x471   :  { %6367 = vmatpush2.bf16.msra.mxu0 %v8568_v33 }
 0x472   :  { %6408 = vmatpush2.bf16.msra.mxu1 %v8571_v5  ;;  %6368 = vmatprep.subr.bf16.mxu0 %v8576_v55 }
 0x473   :  { %6409 = vmatprep.subr.bf16.mxu1 %v8579_v2 }
 0x475   :  { %6369 = vmatpush2.bf16.msra.mxu0 %v8574_v53 }
 0x476   :  { %6410 = vmatpush2.bf16.msra.mxu1 %v8577_v10  ;;  %6370 = vmatprep.subr.bf16.mxu0 %v8582_v14 }
 0x477   :  { %6411 = vmatprep.subr.bf16.mxu1 %v8585_v39 }
 0x479   :  { %6371 = vmatpush2.bf16.msra.mxu0 %v8580_v41 }
 0x47a   :  { %6412 = vmatpush2.bf16.msra.mxu1 %v8583_v42  ;;  %7691 = vmatprep.subr.bf16.mxu0 %v8586_v24  ;;  %v6426_v24 = vld [vmem:[#allocation10] sm:$0xf] }
 0x47b   :  { %7713 = vmatprep.subr.bf16.mxu1 %v8587_v36 }
 0x47c   :  { %6373 = vmatmul.mubr.bf16.vlgmr.msra.gmra.mxu0 %v7536_v52 }
 0x47d   :  { %6414 = vmatmul.mubr.bf16.vlgmr.msra.gmra.mxu1 %v7536_v52  ;;  %7692 = vmatpush3.bf16.msra.mxu0 %v8588_v35  ;;  %v6431_v35 = vrot.slane %v6426_v24, %v9287_v8 }
 0x47e   :  { %7714 = vmatpush3.bf16.msra.mxu1 %v8589_v37  ;;  %7693 = vmatprep.subr.bf16.mxu0 %v8590_v31 }
 0x47f   :  { %7715 = vmatprep.subr.bf16.mxu1 %v8591_v56  ;;  %v6439_v56 = vrot.slane %v6426_v24, %v9289_v9 }
 0x481   :  { %7694 = vmatpush3.bf16.msra.mxu0 %v8592_v15 }
 0x482   :  { %7716 = vmatpush3.bf16.msra.mxu1 %v8593_v16  ;;  %7695 = vmatprep.subr.bf16.mxu0 %v8594_v57 }
 0x483   :  { %7717 = vmatprep.subr.bf16.mxu1 %v8595_v34  ;;  %v6435_v34 = vrot.slane %v6426_v24, %v9291_v11 }
 0x485   :  { %7696 = vmatpush3.bf16.msra.mxu0 %v8596_v1 }
 0x486   :  { %7718 = vmatpush3.bf16.msra.mxu1 %v8597_v22  ;;  %7697 = vmatprep.subr.bf16.mxu0 %v8598_v7 }
 0x487   :  { %7719 = vmatprep.subr.bf16.mxu1 %v8599_v58  ;;  %v6443_v58 = vrot.slane %v6426_v24, %v9293_v12 }
 0x489   :  { %7698 = vmatpush3.bf16.msra.mxu0 %v8600_v23 }
 0x48a   :  { %7720 = vmatpush3.bf16.msra.mxu1 %v8601_v21  ;;  %7699 = vmatprep.subr.bf16.mxu0 %v8602_v0 }
 0x48b   :  { %7721 = vmatprep.subr.bf16.mxu1 %v8603_v38 }
 0x48d   :  { %7700 = vmatpush3.bf16.msra.mxu0 %v8604_v54 }
 0x48e   :  { %7722 = vmatpush3.bf16.msra.mxu1 %v8605_v19  ;;  %7701 = vmatprep.subr.bf16.mxu0 %v8606_v43 }
 0x48f   :  { %7723 = vmatprep.subr.bf16.mxu1 %v8607_v28 }
 0x491   :  { %7702 = vmatpush3.bf16.msra.mxu0 %v8608_v51 }
 0x492   :  { %7724 = vmatpush3.bf16.msra.mxu1 %v8609_v62  ;;  %7703 = vmatprep.subr.bf16.mxu0 %v8610_v61  ;;  %v7594_v62 = vld [vmem:[#allocation13] ss:$0 sm:$0xff] }
 0x493   :  { %7725 = vmatprep.subr.bf16.mxu1 %v8611_v60 }
 0x495   :  { %7704 = vmatpush3.bf16.msra.mxu0 %v8612_v3 }
 0x496   :  { %7726 = vmatpush3.bf16.msra.mxu1 %v8613_v44  ;;  %7705 = vmatprep.subr.bf16.mxu0 %v8614_v13 }
 0x497   :  { %7727 = vmatprep.subr.bf16.mxu1 %v8615_v18 }
 0x499   :  { %7706 = vmatpush3.bf16.msra.mxu0 %v8616_v27 }
 0x49a   :  { %7728 = vmatpush3.bf16.msra.mxu1 %v8617_v29 }
 0x4a0   :  { %v5209_v63 = vpop.f32.mrf.mxu0  ;;  %v5250_v6 = vpop.f32.mrf.mxu1 }
 0x4a2   :  { %v5211_v30 = vpop.f32.mrf.mxu0  ;;  %v5252_v26 = vpop.f32.mrf.mxu1 }
 0x4a4   :  { %v5213_v46 = vpop.f32.mrf.mxu0  ;;  %v5254_v20 = vpop.f32.mrf.mxu1 }
 0x4a6   :  { %v5214_v50 = vpop.f32.mrf.mxu0  ;;  %v5255_v32 = vpop.f32.mrf.mxu1 }
 0x4d4   :  { %v5562_v47 = vpop.f32.mrf.mxu0  ;;  %v5603_v40 = vpop.f32.mrf.mxu1 }
 0x4d5   :  { %v5563_v49 = vadd.f32 %v5562_v47, %v5209_v63  ;;  %v5604_v4 = vadd.f32 %v5603_v40, %v5250_v6 }
 0x4d6   :  { %v5564_v17 = vpop.f32.mrf.mxu0  ;;  %v5605_v48 = vpop.f32.mrf.mxu1 }
 0x4d7   :  { %v5565_v59 = vadd.f32 %v5564_v17, %v5211_v30  ;;  %v5606_v25 = vadd.f32 %v5605_v48, %v5252_v26 }
 0x4d8   :  { %v5566_v45 = vpop.f32.mrf.mxu0  ;;  %v5607_v33 = vpop.f32.mrf.mxu1 }
 0x4da   :  { %v5567_v5 = vpop.f32.mrf.mxu0  ;;  %v5608_v55 = vpop.f32.mrf.mxu1 }
 0x508   :  { %v5966_v2 = vpop.f32.mrf.mxu0 }
 0x509   :  { %v6007_v53 = vpop.f32.mrf.mxu1  ;;  %v6014_v36 = vadd.f32 %v5966_v2, %v5563_v49 }
 0x50a   :  { %v5968_v10 = vpop.f32.mrf.mxu0  ;;  %v6016_v37 = vadd.f32 %v6007_v53, %v5604_v4 }
 0x50b   :  { %v6009_v14 = vpop.f32.mrf.mxu1  ;;  %v6015_v15 = vadd.f32 %v5968_v10, %v5565_v59 }
 0x50c   :  { %v5970_v39 = vpop.f32.mrf.mxu0  ;;  %v6017_v1 = vadd.f32 %v6009_v14, %v5606_v25 }
 0x50d   :  { %v6011_v41 = vpop.f32.mrf.mxu1 }
 0x50e   :  { %v5971_v42 = vpop.f32.mrf.mxu0 }
 0x50f   :  { %v6012_v52 = vpop.f32.mrf.mxu1 }
 0x53c   :  { %v6374_v31 = vpop.f32.mrf.mxu0 }
 0x53d   :  { %v6422_v16 = vadd.f32 %v6374_v31, %v6014_v36  ;;  %v6415_v57 = vpop.f32.mrf.mxu1 }
 0x53e   :  { %v6424_v22 = vadd.f32 %v6415_v57, %v6016_v37  ;;  %v6376_v7 = vpop.f32.mrf.mxu0 }
 0x53f   :  { %v6448_v23 = vadd.f32 %v6431_v35, %v6422_v16  ;;  %v6423_v21 = vadd.f32 %v6376_v7, %v6015_v15  ;;  %v6417_v0 = vpop.f32.mrf.mxu1 }
 0x540   :  { %v6450_v38 = vadd.f32 %v6439_v56, %v6424_v22  ;;  %v6425_v54 = vadd.f32 %v6417_v0, %v6017_v1  ;;  %v6378_v8 = vpop.f32.mrf.mxu0 }
 0x541   :  { %v6449_v19 = vadd.f32 %v6435_v34, %v6423_v21  ;;  %v6419_v63 = vpop.f32.mrf.mxu1  ;;  %v6452_v6 = vmax.f32 %v6448_v23, 0.0 }
 0x542   :  { %v6451_v9 = vadd.f32 %v6443_v58, %v6425_v54  ;;  %v6379_v30 = vpop.f32.mrf.mxu0  ;;  %v6454_v26 = vmax.f32 %v6450_v38, 0.0 }
 0x543   :  { %v6453_v46 = vmax.f32 %v6449_v19, 0.0  ;;  %v6420_v20 = vpop.f32.mrf.mxu1  ;;  %v6456_v32 = vpack.c.bf16 %v6452_v6, %v6452_v6 }
 0x544   :  { %v6455_v11 = vmax.f32 %v6451_v9, 0.0  ;;  %v6458_v28 = vpack.c.bf16 %v6454_v26, %v6454_v26 }
 0x545   :  { %v6457_v50 = vpack.c.bf16 %v6453_v46, %v6453_v46 }
 0x546   :  { %v6459_v43 = vpack.c.bf16 %v6455_v11, %v6455_v11 }
 0x547   :  { %6755 = vmatprep.mubr.bf16.mxu0 %v6457_v50 }
 0x548   :  { %6795 = vmatprep.mubr.bf16.mxu1 %v6459_v43  ;;  %6756 = vmatmul.mubr.bf16.vlgmr.msra.gmra.mxu0 %v6456_v32 }
 0x549   :  { %6796 = vmatmul.mubr.bf16.vlgmr.msra.gmra.mxu1 %v6458_v28 }
 0x608   :  { %v7707_v12 = vpop.f32.mrf.mxu0 }
 0x609   :  { %v7729_v51 = vpop.f32.mrf.mxu1 }
 0x60a   :  { %v7708_v61 = vpop.f32.mrf.mxu0 }
 0x60b   :  { %v7709_v60 = vadd.f32 %v7708_v61, %v7707_v12  ;;  %v7730_v3 = vpop.f32.mrf.mxu1 }
 0x60c   :  { %v7710_v44 = vpop.f32.mrf.mxu0  ;;  %v7731_v18 = vadd.f32 %v7730_v3, %v7729_v51 }
 0x60d   :  { %v6758_v13 = vadd.f32 %v7709_v60, %v7594_v62  ;;  %v7732_v27 = vpop.f32.mrf.mxu1 }
 0x60e   :  { %v7711_v29 = vpop.f32.mrf.mxu0 }
 0x60f   :  { %v7733_v47 = vpop.f32.mrf.mxu1  ;;  %v6798_v40 = vadd.f32 %v7731_v18, %v6758_v13 }
 0x611   :  { %6803 = vmax.xlane.f32.xlu0 %v6798_v40 }
 0x69a   :  { %v6804_v49 = vpop.xlane.xlu0 %6803 }
 0x69b   :  { %v6805_v4 = vsub.f32 %v6798_v40, %v6804_v49 }
 0x69d   :  { %v6806_v17 = vmul.f32 1.442695, %v6805_v4 }
 0x69f   :  { %8618 = vpow2.f32 %v6806_v17 }
 0x6ac   :  { %v8619_v48 = vpop.eup %8618 }
 0x6ad   :  { %6808 = vadd.xlane.f32.xlu1 %v8619_v48 }
 0x736   :  { %v6809_v59 = vpop.xlane.xlu1 %6808 }
 0x737   :  { %8620 = vlog2.f32 %v6809_v59 }
 0x744   :  { %v8621_v25 = vpop.eup %8620 }
 0x745   :  { %v6811_v45 = vmul.f32 0.6931472, %v8621_v25 }
 0x747   :  { %v6812_v33 = vsub.f32 %v6805_v4, %v6811_v45 }
 0x749   :  { %6813 = vst [vmem:[%s10134_s9] sm:$0xff] %v6812_v33 }
 0x74a   :  { %6818 = vsyncpa [#allocation3], 1 }
 0x74b   :  { %6819 = vsyncpa [#allocation5], 1 }
 0x74c   :  { %6820 = vsyncpa [#allocation8], 1 }
 0x74d   :  { %6821 = vsyncpa [#allocation11], 1 }
 0x74e   :  { %6822 = vsyncpa [#allocation14], 1 }

</bundles_post_ra>
